<compile_context>
chip_gen: v7x
topology: tpu7x:2x2x1
jax: 0.10.0
libtpu: 0.0.40
codegen_flags: <defaults>
</compile_context>

<pallas_src>
import jax
import jax.numpy as jnp
from jax.experimental import pallas as pl
from jax.experimental.pallas import tpu as pltpu

INPUT_SIZE = 50
HIDDEN_SIZE = 50
OUT1 = 10
OUT2 = 7
HP = 128           # padded per-gate / hidden width (lane-aligned)
IP = 128           # padded input width for the layer-0 projection
G3 = 3 * HP        # 384: one layer's fused gate width


# --------------------------------- kernel ---------------------------------

def gru_head_kernel(x_ref,       # (T*B, IP)        bf16, time-major rows: row = t*B + b
                    w_ih0_ref,   # (IP, 3*HP)       bf16
                    w_bd_ref,    # (2*HP, 6*HP)     bf16  blockdiag(w_hh0, w_hh1)
                    w_misc_ref,  # (HP, 4*HP)       bf16  [w_ih1 | w_head]
                    b_ref,       # (8, 3*HP)        f32   bias slab (rows 0..2 used)
                    out_ref,     # (B, HP)          f32   lane-dense padded output
                    gi0_ref):    # (T*B, 3*HP)      f32   VMEM scratch (layer-0 input proj)
    B = out_ref.shape[0]
    T = x_ref.shape[0] // B
    bf16 = jnp.bfloat16

    # ---- hoist all weight / bias loads out of the serial time loop ----
    biases = b_ref[...]
    b0 = biases[0:1, :]                         # combined b_ih+b_hh (r,z) and b_ih (n), layer 0
    b1 = biases[1:2, :]                         # same, layer 1
    bhn0 = biases[2:3, 0 * HP:1 * HP]           # b_hh n-gate, layer 0
    bhn1 = biases[2:3, 1 * HP:2 * HP]           # b_hh n-gate, layer 1
    b_head = biases[2:3, 2 * HP:3 * HP]         # folded head bias (lane-padded)

    w_bd = w_bd_ref[...]                        # (256, 768)
    w_ih1 = w_misc_ref[:, 0:G3]                 # (128, 384)
    w_head = w_misc_ref[:, G3:G3 + HP]          # (128, 128)

    # ---- prologue: layer-0 input projection for ALL timesteps, parked in VMEM scratch ----
    gi0_ref[...] = (jnp.dot(x_ref[...], w_ih0_ref[...],
                            preferred_element_type=jnp.float32) + b0)

    def gates(gi, gh, h, b_hn):
        # gi already contains the input projection + combined biases.
        r = jax.nn.sigmoid(gi[:, 0 * HP:1 * HP] + gh[:, 0 * HP:1 * HP])
        z = jax.nn.sigmoid(gi[:, 1 * HP:2 * HP] + gh[:, 1 * HP:2 * HP])
        n = jnp.tanh(gi[:, 2 * HP:3 * HP] + r * (gh[:, 2 * HP:3 * HP] + b_hn))
        return (1.0 - z) * n + z * h

    h0 = jnp.zeros((B, HP), jnp.float32)
    h1 = jnp.zeros((B, HP), jnp.float32)

    # T is small and static: fully-unrolled serial recurrence, 2 MXU ops per step.
    for t in range(T):
        # Both layers' hidden projections in ONE matmul (uses previous h0, h1: legal).
        h_cat = jnp.concatenate([h0, h1], axis=1).astype(bf16)           # (B, 256)
        gh_both = jnp.dot(h_cat, w_bd, preferred_element_type=jnp.float32)  # (B, 768)
        gh0 = gh_both[:, 0:G3]
        gh1 = gh_both[:, G3:2 * G3]

        gi0 = gi0_ref[t * B:(t + 1) * B, :]      # static, sublane-aligned slice
        h0 = gates(gi0, gh0, h0, bhn0)

        gi1 = (jnp.dot(h0.astype(bf16), w_ih1,
                       preferred_element_type=jnp.float32) + b1)
        h1 = gates(gi1, gh1, h1, bhn1)

    # ---- folded head: single (B,HP)@(HP,HP) matmul, lane-dense padded output ----
    out_ref[...] = (jnp.dot(h1.astype(bf16), w_head,
                            preferred_element_type=jnp.float32) + b_head)


def gru_forward(x, kernel_params):
    """x: (B, T, INPUT_SIZE) float32  ->  (B, OUT2) float32."""
    B, T, I = x.shape
    # Time-major flatten: rows for timestep t are the contiguous block [t*B, (t+1)*B).
    x_tm = jnp.transpose(x, (1, 0, 2)).reshape(T * B, I)
    # Zero-pad the contraction dim to a full lane tile and cast MXU operand to bf16.
    x_pad = jnp.pad(x_tm, ((0, 0), (0, IP - I))).astype(jnp.bfloat16)

    n_in = 1 + len(kernel_params)
    out_padded = pl.pallas_call(
        gru_head_kernel,
        out_shape=jax.ShapeDtypeStruct((B, HP), jnp.float32),
        in_specs=[pl.BlockSpec(memory_space=pltpu.MemorySpace.VMEM)
                  for _ in range(n_in)],
        out_specs=pl.BlockSpec(memory_space=pltpu.MemorySpace.VMEM),
        scratch_shapes=[pltpu.VMEM((T * B, G3), jnp.float32)],
    )(x_pad, *kernel_params)
    return out_padded[:, :OUT2]


# ---------------- deterministic parameter construction (PyTorch-style init) ----------------

def init_params(key):
    H, I = HIDDEN_SIZE, INPUT_SIZE
    k_gru = 1.0 / jnp.sqrt(H)
    keys = jax.random.split(key, 12)

    def unif(k, shape, bound):
        return jax.random.uniform(k, shape, jnp.float32, -bound, bound)

    raw = {
        "w_ih_l0": unif(keys[0], (3 * H, I), k_gru),
        "w_hh_l0": unif(keys[1], (3 * H, H), k_gru),
        "b_ih_l0": unif(keys[2], (3 * H,), k_gru),
        "b_hh_l0": unif(keys[3], (3 * H,), k_gru),
        "w_ih_l1": unif(keys[4], (3 * H, H), k_gru),
        "w_hh_l1": unif(keys[5], (3 * H, H), k_gru),
        "b_ih_l1": unif(keys[6], (3 * H,), k_gru),
        "b_hh_l1": unif(keys[7], (3 * H,), k_gru),
        "w_out1": unif(keys[8], (OUT1, H), 1.0 / jnp.sqrt(H)),
        "b_out1": unif(keys[9], (OUT1,), 1.0 / jnp.sqrt(H)),
        "w_out2": unif(keys[10], (OUT2, OUT1), 1.0 / jnp.sqrt(OUT1)),
        "b_out2": unif(keys[11], (OUT2,), 1.0 / jnp.sqrt(OUT1)),
    }
    return raw


def pack_for_kernel(raw):
    """Repack PyTorch-layout weights into gate-fused, lane-padded, bf16 kernel layout."""
    H, I = HIDDEN_SIZE, INPUT_SIZE
    f32, bf16 = jnp.float32, jnp.bfloat16

    def pack_gates(w, in_dim, in_pad):
        # (3H, in_dim) gates r,z,n stacked along rows -> (in_pad, 3*HP);
        # gate g occupies columns [g*HP, g*HP + H); padded rows/cols are zero.
        w3 = w.reshape(3, H, in_dim)
        out = jnp.zeros((in_pad, G3), f32)
        for g in range(3):
            out = out.at[:in_dim, g * HP:g * HP + H].set(w3[g].T)
        return out

    w_ih0 = pack_gates(raw["w_ih_l0"], I, IP)      # (128, 384)
    w_hh0 = pack_gates(raw["w_hh_l0"], H, HP)      # (128, 384)
    w_ih1 = pack_gates(raw["w_ih_l1"], H, HP)      # (128, 384)
    w_hh1 = pack_gates(raw["w_hh_l1"], H, HP)      # (128, 384)

    # Block-diagonal recurrent weights: one K=256 matmul handles both layers' h-projections.
    w_bd = jnp.zeros((2 * HP, 2 * G3), f32)
    w_bd = w_bd.at[0:HP, 0:G3].set(w_hh0)
    w_bd = w_bd.at[HP:2 * HP, G3:2 * G3].set(w_hh1)

    # Folded head: out2(out1(h)) = h @ (W1.T @ W2.T) + (b1 @ W2.T + b2)   (no nonlinearity).
    w_fold = raw["w_out1"].T @ raw["w_out2"].T                      # (H, OUT2)
    b_fold = raw["b_out1"] @ raw["w_out2"].T + raw["b_out2"]        # (OUT2,)
    w_head = jnp.zeros((HP, HP), f32).at[:H, :OUT2].set(w_fold)     # lane-padded

    # Misc weight slab: [ w_ih1 | w_head ]  -> (128, 512)
    w_misc = jnp.concatenate([w_ih1, w_head], axis=1)

    # Bias slab (8, 384), f32 (added post-accumulation):
    #   row 0: layer-0 combined bias   (r: b_ir+b_hr, z: b_iz+b_hz, n: b_in)
    #   row 1: layer-1 combined bias
    #   row 2: [ b_hn layer0 | b_hn layer1 | folded head bias ]
    def comb_bias(b_ih, b_hh):
        bi = b_ih.reshape(3, H)
        bh = b_hh.reshape(3, H)
        b = jnp.zeros((G3,), f32)
        b = b.at[0 * HP:0 * HP + H].set(bi[0] + bh[0])
        b = b.at[1 * HP:1 * HP + H].set(bi[1] + bh[1])
        b = b.at[2 * HP:2 * HP + H].set(bi[2])
        bhn = jnp.zeros((HP,), f32).at[:H].set(bh[2])
        return b, bhn

    b0, bhn0 = comb_bias(raw["b_ih_l0"], raw["b_hh_l0"])
    b1, bhn1 = comb_bias(raw["b_ih_l1"], raw["b_hh_l1"])
    head_bias_row = jnp.concatenate(
        [bhn0, bhn1, jnp.zeros((HP,), f32).at[:OUT2].set(b_fold)])
    biases = jnp.zeros((8, G3), f32)
    biases = biases.at[0].set(b0)
    biases = biases.at[1].set(b1)
    biases = biases.at[2].set(head_bias_row)

    return [w_ih0.astype(bf16), w_bd.astype(bf16), w_misc.astype(bf16), biases]


# ---------------- pure-JAX reference (mirrors torch.nn.GRU semantics, f32) ----------------

def ref_forward(x, raw):
    B, T, I = x.shape
    H = HIDDEN_SIZE
    h0 = jnp.zeros((B, H), jnp.float32)
    h1 = jnp.zeros((B, H), jnp.float32)

    def cell(xi, h, w_ih, w_hh, b_ih, b_hh):
        gi = xi @ w_ih.T + b_ih
        gh = h @ w_hh.T + b_hh
        i_r, i_z, i_n = jnp.split(gi, 3, axis=-1)
        h_r, h_z, h_n = jnp.split(gh, 3, axis=-1)
        r = jax.nn.sigmoid(i_r + h_r)
        z = jax.nn.sigmoid(i_z + h_z)
        n = jnp.tanh(i_n + r * h_n)
        return (1.0 - z) * n + z * h

    for t in range(T):
        h0 = cell(x[:, t], h0, raw["w_ih_l0"], raw["w_hh_l0"],
                  raw["b_ih_l0"], raw["b_hh_l0"])
        h1 = cell(h0, h1, raw["w_ih_l1"], raw["w_hh_l1"],
                  raw["b_ih_l1"], raw["b_hh_l1"])
    o = h1 @ raw["w_out1"].T + raw["b_out1"]
    return o @ raw["w_out2"].T + raw["b_out2"]


if __name__ == "__main__":
    key = jax.random.PRNGKey(0)
    k_x, k_p = jax.random.split(key)

    B, T = 8, 8   # batch = 8 fills sublanes / MXU rows
    x = jax.random.normal(k_x, (B, T, INPUT_SIZE), jnp.float32)

    raw = init_params(k_p)
    kernel_params = pack_for_kernel(raw)

    out = gru_forward(x, kernel_params)
    out = jax.block_until_ready(out)

    ref = ref_forward(x, raw)
    assert out.shape == (B, OUT2)
    # bf16 MXU operands (f32 accumulation) => compare with bf16-appropriate tolerance.
    max_err = float(jnp.max(jnp.abs(out - ref)))
    assert jnp.allclose(out, ref, atol=3e-2, rtol=3e-2), \
        f"mismatch vs JAX reference (max abs err {max_err})"

    print("KERNEL_OK")
</pallas_src>

<mosaic_0001>
module attributes {stable_mosaic.version = 11 : i64} {
  func.func @gru_head_kernel(%arg0: memref<64x128xbf16, #tpu.memory_space<vmem>>, %arg1: memref<128x384xbf16, #tpu.memory_space<vmem>>, %arg2: memref<256x768xbf16, #tpu.memory_space<vmem>>, %arg3: memref<128x512xbf16, #tpu.memory_space<vmem>>, %arg4: memref<8x384xf32, #tpu.memory_space<vmem>>, %arg5: memref<8x128xf32, #tpu.memory_space<vmem>>, %arg6: memref<64x384xf32, #tpu.memory_space<vmem>>) attributes {dimension_semantics = [], scalar_prefetch = 0 : i64, scratch_operands = 1 : i64, tpu.core_type = #tpu.core_type<tc>} {
    %c0 = arith.constant 0 : index
    %c0_0 = arith.constant 0 : index
    %0 = vector.load %arg4[%c0, %c0_0] : memref<8x384xf32, #tpu.memory_space<vmem>>, vector<8x384xf32>
    %1 = vector.extract_strided_slice %0 {offsets = [0, 0], sizes = [1, 384], strides = [1, 1]} : vector<8x384xf32> to vector<1x384xf32>
    %2 = vector.extract_strided_slice %0 {offsets = [1, 0], sizes = [1, 384], strides = [1, 1]} : vector<8x384xf32> to vector<1x384xf32>
    %3 = vector.extract_strided_slice %0 {offsets = [2, 0], sizes = [1, 128], strides = [1, 1]} : vector<8x384xf32> to vector<1x128xf32>
    %4 = vector.extract_strided_slice %0 {offsets = [2, 128], sizes = [1, 128], strides = [1, 1]} : vector<8x384xf32> to vector<1x128xf32>
    %5 = vector.extract_strided_slice %0 {offsets = [2, 256], sizes = [1, 128], strides = [1, 1]} : vector<8x384xf32> to vector<1x128xf32>
    %c0_1 = arith.constant 0 : index
    %c0_2 = arith.constant 0 : index
    %6 = vector.load %arg2[%c0_1, %c0_2] : memref<256x768xbf16, #tpu.memory_space<vmem>>, vector<256x768xbf16>
    %c0_3 = arith.constant 0 : index
    %c0_4 = arith.constant 0 : index
    %7 = vector.load %arg3[%c0_3, %c0_4] : memref<128x512xbf16, #tpu.memory_space<vmem>>, vector<128x384xbf16>
    %c0_5 = arith.constant 0 : index
    %c384 = arith.constant 384 : index
    %8 = vector.load %arg3[%c0_5, %c384] : memref<128x512xbf16, #tpu.memory_space<vmem>>, vector<128x128xbf16>
    %c0_6 = arith.constant 0 : index
    %c0_7 = arith.constant 0 : index
    %9 = vector.load %arg0[%c0_6, %c0_7] : memref<64x128xbf16, #tpu.memory_space<vmem>>, vector<64x128xbf16>
    %c0_8 = arith.constant 0 : index
    %c0_9 = arith.constant 0 : index
    %10 = vector.load %arg1[%c0_8, %c0_9] : memref<128x384xbf16, #tpu.memory_space<vmem>>, vector<128x384xbf16>
    %cst = arith.constant dense<0.000000e+00> : vector<64x384xf32>
    %11 = tpu.matmul %9, %10, %cst {dimension_numbers = #tpu.dot_dimension_numbers<[1], [0], [0], [1], [0, 0, 1, 1], [], []>} : vector<64x128xbf16>, vector<128x384xbf16>, vector<64x384xf32> -> vector<64x384xf32>
    %12 = vector.broadcast %1 : vector<1x384xf32> to vector<64x384xf32>
    %13 = arith.addf %11, %12 : vector<64x384xf32>
    %c0_10 = arith.constant 0 : index
    %c0_11 = arith.constant 0 : index
    %14 = vector.load %arg6[%c0_10, %c0_11] : memref<64x384xf32, #tpu.memory_space<vmem>>, vector<64x384xf32>
    tpu.vector_store %arg6[%c0_10, %c0_11], %13 {strides = array<i32>} : memref<64x384xf32, #tpu.memory_space<vmem>>, vector<64x384xf32>,
    %cst_12 = arith.constant 0.000000e+00 : f32
    %15 = vector.broadcast %cst_12 : f32 to vector<8x128xf32>
    %cst_13 = arith.constant 0.000000e+00 : f32
    %16 = vector.broadcast %cst_13 : f32 to vector<8x128xf32>
    %17 = tpu.concatenate %15, %16 in 1 : vector<8x128xf32>, vector<8x128xf32> -> vector<8x256xf32>
    %18 = arith.truncf %17 : vector<8x256xf32> to vector<8x256xbf16>
    %cst_14 = arith.constant dense<0.000000e+00> : vector<8x768xf32>
    %19 = tpu.matmul %18, %6, %cst_14 {dimension_numbers = #tpu.dot_dimension_numbers<[1], [0], [0], [1], [0, 0, 1, 1], [], []>} : vector<8x256xbf16>, vector<256x768xbf16>, vector<8x768xf32> -> vector<8x768xf32>
    %20 = vector.extract_strided_slice %19 {offsets = [0, 0], sizes = [8, 384], strides = [1, 1]} : vector<8x768xf32> to vector<8x384xf32>
    %21 = vector.extract_strided_slice %19 {offsets = [0, 384], sizes = [8, 384], strides = [1, 1]} : vector<8x768xf32> to vector<8x384xf32>
    %c0_15 = arith.constant 0 : index
    %c0_16 = arith.constant 0 : index
    %22 = vector.load %arg6[%c0_15, %c0_16] : memref<64x384xf32, #tpu.memory_space<vmem>>, vector<8x384xf32>
    %23 = vector.extract_strided_slice %22 {offsets = [0, 0], sizes = [8, 128], strides = [1, 1]} : vector<8x384xf32> to vector<8x128xf32>
    %24 = vector.extract_strided_slice %20 {offsets = [0, 0], sizes = [8, 128], strides = [1, 1]} : vector<8x384xf32> to vector<8x128xf32>
    %25 = arith.addf %23, %24 : vector<8x128xf32>
    %26 = arith.negf %25 : vector<8x128xf32>
    %27 = math.exp %26 : vector<8x128xf32>
    %cst_17 = arith.constant 1.000000e+00 : f32
    %28 = vector.broadcast %cst_17 : f32 to vector<8x128xf32>
    %29 = arith.addf %28, %27 : vector<8x128xf32>
    %30 = arith.divf %28, %29 : vector<8x128xf32>
    %31 = vector.extract_strided_slice %22 {offsets = [0, 128], sizes = [8, 128], strides = [1, 1]} : vector<8x384xf32> to vector<8x128xf32>
    %32 = vector.extract_strided_slice %20 {offsets = [0, 128], sizes = [8, 128], strides = [1, 1]} : vector<8x384xf32> to vector<8x128xf32>
    %33 = arith.addf %31, %32 : vector<8x128xf32>
    %34 = arith.negf %33 : vector<8x128xf32>
    %35 = math.exp %34 : vector<8x128xf32>
    %cst_18 = arith.constant 1.000000e+00 : f32
    %36 = vector.broadcast %cst_18 : f32 to vector<8x128xf32>
    %37 = arith.addf %36, %35 : vector<8x128xf32>
    %38 = arith.divf %36, %37 : vector<8x128xf32>
    %39 = vector.extract_strided_slice %22 {offsets = [0, 256], sizes = [8, 128], strides = [1, 1]} : vector<8x384xf32> to vector<8x128xf32>
    %40 = vector.extract_strided_slice %20 {offsets = [0, 256], sizes = [8, 128], strides = [1, 1]} : vector<8x384xf32> to vector<8x128xf32>
    %41 = vector.broadcast %3 : vector<1x128xf32> to vector<8x128xf32>
    %42 = arith.addf %40, %41 : vector<8x128xf32>
    %43 = arith.mulf %30, %42 : vector<8x128xf32>
    %44 = arith.addf %39, %43 : vector<8x128xf32>
    %45 = math.tanh %44 : vector<8x128xf32>
    %cst_19 = arith.constant 1.000000e+00 : f32
    %46 = vector.broadcast %cst_19 : f32 to vector<8x128xf32>
    %47 = arith.subf %46, %38 : vector<8x128xf32>
    %48 = arith.mulf %47, %45 : vector<8x128xf32>
    %49 = arith.mulf %38, %15 : vector<8x128xf32>
    %50 = arith.addf %48, %49 : vector<8x128xf32>
    %51 = arith.truncf %50 : vector<8x128xf32> to vector<8x128xbf16>
    %cst_20 = arith.constant dense<0.000000e+00> : vector<8x384xf32>
    %52 = tpu.matmul %51, %7, %cst_20 {dimension_numbers = #tpu.dot_dimension_numbers<[1], [0], [0], [1], [0, 0, 1, 1], [], []>} : vector<8x128xbf16>, vector<128x384xbf16>, vector<8x384xf32> -> vector<8x384xf32>
    %53 = vector.broadcast %2 : vector<1x384xf32> to vector<8x384xf32>
    %54 = arith.addf %52, %53 : vector<8x384xf32>
    %55 = vector.extract_strided_slice %54 {offsets = [0, 0], sizes = [8, 128], strides = [1, 1]} : vector<8x384xf32> to vector<8x128xf32>
    %56 = vector.extract_strided_slice %21 {offsets = [0, 0], sizes = [8, 128], strides = [1, 1]} : vector<8x384xf32> to vector<8x128xf32>
    %57 = arith.addf %55, %56 : vector<8x128xf32>
    %58 = arith.negf %57 : vector<8x128xf32>
    %59 = math.exp %58 : vector<8x128xf32>
    %cst_21 = arith.constant 1.000000e+00 : f32
    %60 = vector.broadcast %cst_21 : f32 to vector<8x128xf32>
    %61 = arith.addf %60, %59 : vector<8x128xf32>
    %62 = arith.divf %60, %61 : vector<8x128xf32>
    %63 = vector.extract_strided_slice %54 {offsets = [0, 128], sizes = [8, 128], strides = [1, 1]} : vector<8x384xf32> to vector<8x128xf32>
    %64 = vector.extract_strided_slice %21 {offsets = [0, 128], sizes = [8, 128], strides = [1, 1]} : vector<8x384xf32> to vector<8x128xf32>
    %65 = arith.addf %63, %64 : vector<8x128xf32>
    %66 = arith.negf %65 : vector<8x128xf32>
    %67 = math.exp %66 : vector<8x128xf32>
    %cst_22 = arith.constant 1.000000e+00 : f32
    %68 = vector.broadcast %cst_22 : f32 to vector<8x128xf32>
    %69 = arith.addf %68, %67 : vector<8x128xf32>
    %70 = arith.divf %68, %69 : vector<8x128xf32>
    %71 = vector.extract_strided_slice %54 {offsets = [0, 256], sizes = [8, 128], strides = [1, 1]} : vector<8x384xf32> to vector<8x128xf32>
    %72 = vector.extract_strided_slice %21 {offsets = [0, 256], sizes = [8, 128], strides = [1, 1]} : vector<8x384xf32> to vector<8x128xf32>
    %73 = vector.broadcast %4 : vector<1x128xf32> to vector<8x128xf32>
    %74 = arith.addf %72, %73 : vector<8x128xf32>
    %75 = arith.mulf %62, %74 : vector<8x128xf32>
    %76 = arith.addf %71, %75 : vector<8x128xf32>
    %77 = math.tanh %76 : vector<8x128xf32>
    %cst_23 = arith.constant 1.000000e+00 : f32
    %78 = vector.broadcast %cst_23 : f32 to vector<8x128xf32>
    %79 = arith.subf %78, %70 : vector<8x128xf32>
    %80 = arith.mulf %79, %77 : vector<8x128xf32>
    %81 = arith.mulf %70, %16 : vector<8x128xf32>
    %82 = arith.addf %80, %81 : vector<8x128xf32>
    %83 = tpu.concatenate %50, %82 in 1 : vector<8x128xf32>, vector<8x128xf32> -> vector<8x256xf32>
    %84 = arith.truncf %83 : vector<8x256xf32> to vector<8x256xbf16>
    %cst_24 = arith.constant dense<0.000000e+00> : vector<8x768xf32>
    %85 = tpu.matmul %84, %6, %cst_24 {dimension_numbers = #tpu.dot_dimension_numbers<[1], [0], [0], [1], [0, 0, 1, 1], [], []>} : vector<8x256xbf16>, vector<256x768xbf16>, vector<8x768xf32> -> vector<8x768xf32>
    %86 = vector.extract_strided_slice %85 {offsets = [0, 0], sizes = [8, 384], strides = [1, 1]} : vector<8x768xf32> to vector<8x384xf32>
    %87 = vector.extract_strided_slice %85 {offsets = [0, 384], sizes = [8, 384], strides = [1, 1]} : vector<8x768xf32> to vector<8x384xf32>
    %c8 = arith.constant 8 : index
    %c0_25 = arith.constant 0 : index
    %88 = vector.load %arg6[%c8, %c0_25] : memref<64x384xf32, #tpu.memory_space<vmem>>, vector<8x384xf32>
    %89 = vector.extract_strided_slice %88 {offsets = [0, 0], sizes = [8, 128], strides = [1, 1]} : vector<8x384xf32> to vector<8x128xf32>
    %90 = vector.extract_strided_slice %86 {offsets = [0, 0], sizes = [8, 128], strides = [1, 1]} : vector<8x384xf32> to vector<8x128xf32>
    %91 = arith.addf %89, %90 : vector<8x128xf32>
    %92 = arith.negf %91 : vector<8x128xf32>
    %93 = math.exp %92 : vector<8x128xf32>
    %cst_26 = arith.constant 1.000000e+00 : f32
    %94 = vector.broadcast %cst_26 : f32 to vector<8x128xf32>
    %95 = arith.addf %94, %93 : vector<8x128xf32>
    %96 = arith.divf %94, %95 : vector<8x128xf32>
    %97 = vector.extract_strided_slice %88 {offsets = [0, 128], sizes = [8, 128], strides = [1, 1]} : vector<8x384xf32> to vector<8x128xf32>
    %98 = vector.extract_strided_slice %86 {offsets = [0, 128], sizes = [8, 128], strides = [1, 1]} : vector<8x384xf32> to vector<8x128xf32>
    %99 = arith.addf %97, %98 : vector<8x128xf32>
    %100 = arith.negf %99 : vector<8x128xf32>
    %101 = math.exp %100 : vector<8x128xf32>
    %cst_27 = arith.constant 1.000000e+00 : f32
    %102 = vector.broadcast %cst_27 : f32 to vector<8x128xf32>
    %103 = arith.addf %102, %101 : vector<8x128xf32>
    %104 = arith.divf %102, %103 : vector<8x128xf32>
    %105 = vector.extract_strided_slice %88 {offsets = [0, 256], sizes = [8, 128], strides = [1, 1]} : vector<8x384xf32> to vector<8x128xf32>
    %106 = vector.extract_strided_slice %86 {offsets = [0, 256], sizes = [8, 128], strides = [1, 1]} : vector<8x384xf32> to vector<8x128xf32>
    %107 = vector.broadcast %3 : vector<1x128xf32> to vector<8x128xf32>
    %108 = arith.addf %106, %107 : vector<8x128xf32>
    %109 = arith.mulf %96, %108 : vector<8x128xf32>
    %110 = arith.addf %105, %109 : vector<8x128xf32>
    %111 = math.tanh %110 : vector<8x128xf32>
    %cst_28 = arith.constant 1.000000e+00 : f32
    %112 = vector.broadcast %cst_28 : f32 to vector<8x128xf32>
    %113 = arith.subf %112, %104 : vector<8x128xf32>
    %114 = arith.mulf %113, %111 : vector<8x128xf32>
    %115 = arith.mulf %104, %50 : vector<8x128xf32>
    %116 = arith.addf %114, %115 : vector<8x128xf32>
    %117 = arith.truncf %116 : vector<8x128xf32> to vector<8x128xbf16>
    %cst_29 = arith.constant dense<0.000000e+00> : vector<8x384xf32>
    %118 = tpu.matmul %117, %7, %cst_29 {dimension_numbers = #tpu.dot_dimension_numbers<[1], [0], [0], [1], [0, 0, 1, 1], [], []>} : vector<8x128xbf16>, vector<128x384xbf16>, vector<8x384xf32> -> vector<8x384xf32>
    %119 = vector.broadcast %2 : vector<1x384xf32> to vector<8x384xf32>
    %120 = arith.addf %118, %119 : vector<8x384xf32>
    %121 = vector.extract_strided_slice %120 {offsets = [0, 0], sizes = [8, 128], strides = [1, 1]} : vector<8x384xf32> to vector<8x128xf32>
    %122 = vector.extract_strided_slice %87 {offsets = [0, 0], sizes = [8, 128], strides = [1, 1]} : vector<8x384xf32> to vector<8x128xf32>
    %123 = arith.addf %121, %122 : vector<8x128xf32>
    %124 = arith.negf %123 : vector<8x128xf32>
    %125 = math.exp %124 : vector<8x128xf32>
    %cst_30 = arith.constant 1.000000e+00 : f32
    %126 = vector.broadcast %cst_30 : f32 to vector<8x128xf32>
    %127 = arith.addf %126, %125 : vector<8x128xf32>
    %128 = arith.divf %126, %127 : vector<8x128xf32>
    %129 = vector.extract_strided_slice %120 {offsets = [0, 128], sizes = [8, 128], strides = [1, 1]} : vector<8x384xf32> to vector<8x128xf32>
    %130 = vector.extract_strided_slice %87 {offsets = [0, 128], sizes = [8, 128], strides = [1, 1]} : vector<8x384xf32> to vector<8x128xf32>
    %131 = arith.addf %129, %130 : vector<8x128xf32>
    %132 = arith.negf %131 : vector<8x128xf32>
    %133 = math.exp %132 : vector<8x128xf32>
    %cst_31 = arith.constant 1.000000e+00 : f32
    %134 = vector.broadcast %cst_31 : f32 to vector<8x128xf32>
    %135 = arith.addf %134, %133 : vector<8x128xf32>
    %136 = arith.divf %134, %135 : vector<8x128xf32>
    %137 = vector.extract_strided_slice %120 {offsets = [0, 256], sizes = [8, 128], strides = [1, 1]} : vector<8x384xf32> to vector<8x128xf32>
    %138 = vector.extract_strided_slice %87 {offsets = [0, 256], sizes = [8, 128], strides = [1, 1]} : vector<8x384xf32> to vector<8x128xf32>
    %139 = vector.broadcast %4 : vector<1x128xf32> to vector<8x128xf32>
    %140 = arith.addf %138, %139 : vector<8x128xf32>
    %141 = arith.mulf %128, %140 : vector<8x128xf32>
    %142 = arith.addf %137, %141 : vector<8x128xf32>
    %143 = math.tanh %142 : vector<8x128xf32>
    %cst_32 = arith.constant 1.000000e+00 : f32
    %144 = vector.broadcast %cst_32 : f32 to vector<8x128xf32>
    %145 = arith.subf %144, %136 : vector<8x128xf32>
    %146 = arith.mulf %145, %143 : vector<8x128xf32>
    %147 = arith.mulf %136, %82 : vector<8x128xf32>
    %148 = arith.addf %146, %147 : vector<8x128xf32>
    %149 = tpu.concatenate %116, %148 in 1 : vector<8x128xf32>, vector<8x128xf32> -> vector<8x256xf32>
    %150 = arith.truncf %149 : vector<8x256xf32> to vector<8x256xbf16>
    %cst_33 = arith.constant dense<0.000000e+00> : vector<8x768xf32>
    %151 = tpu.matmul %150, %6, %cst_33 {dimension_numbers = #tpu.dot_dimension_numbers<[1], [0], [0], [1], [0, 0, 1, 1], [], []>} : vector<8x256xbf16>, vector<256x768xbf16>, vector<8x768xf32> -> vector<8x768xf32>
    %152 = vector.extract_strided_slice %151 {offsets = [0, 0], sizes = [8, 384], strides = [1, 1]} : vector<8x768xf32> to vector<8x384xf32>
    %153 = vector.extract_strided_slice %151 {offsets = [0, 384], sizes = [8, 384], strides = [1, 1]} : vector<8x768xf32> to vector<8x384xf32>
    %c16 = arith.constant 16 : index
    %c0_34 = arith.constant 0 : index
    %154 = vector.load %arg6[%c16, %c0_34] : memref<64x384xf32, #tpu.memory_space<vmem>>, vector<8x384xf32>
    %155 = vector.extract_strided_slice %154 {offsets = [0, 0], sizes = [8, 128], strides = [1, 1]} : vector<8x384xf32> to vector<8x128xf32>
    %156 = vector.extract_strided_slice %152 {offsets = [0, 0], sizes = [8, 128], strides = [1, 1]} : vector<8x384xf32> to vector<8x128xf32>
    %157 = arith.addf %155, %156 : vector<8x128xf32>
    %158 = arith.negf %157 : vector<8x128xf32>
    %159 = math.exp %158 : vector<8x128xf32>
    %cst_35 = arith.constant 1.000000e+00 : f32
    %160 = vector.broadcast %cst_35 : f32 to vector<8x128xf32>
    %161 = arith.addf %160, %159 : vector<8x128xf32>
    %162 = arith.divf %160, %161 : vector<8x128xf32>
    %163 = vector.extract_strided_slice %154 {offsets = [0, 128], sizes = [8, 128], strides = [1, 1]} : vector<8x384xf32> to vector<8x128xf32>
    %164 = vector.extract_strided_slice %152 {offsets = [0, 128], sizes = [8, 128], strides = [1, 1]} : vector<8x384xf32> to vector<8x128xf32>
    %165 = arith.addf %163, %164 : vector<8x128xf32>
    %166 = arith.negf %165 : vector<8x128xf32>
    %167 = math.exp %166 : vector<8x128xf32>
    %cst_36 = arith.constant 1.000000e+00 : f32
    %168 = vector.broadcast %cst_36 : f32 to vector<8x128xf32>
    %169 = arith.addf %168, %167 : vector<8x128xf32>
    %170 = arith.divf %168, %169 : vector<8x128xf32>
    %171 = vector.extract_strided_slice %154 {offsets = [0, 256], sizes = [8, 128], strides = [1, 1]} : vector<8x384xf32> to vector<8x128xf32>
    %172 = vector.extract_strided_slice %152 {offsets = [0, 256], sizes = [8, 128], strides = [1, 1]} : vector<8x384xf32> to vector<8x128xf32>
    %173 = vector.broadcast %3 : vector<1x128xf32> to vector<8x128xf32>
    %174 = arith.addf %172, %173 : vector<8x128xf32>
    %175 = arith.mulf %162, %174 : vector<8x128xf32>
    %176 = arith.addf %171, %175 : vector<8x128xf32>
    %177 = math.tanh %176 : vector<8x128xf32>
    %cst_37 = arith.constant 1.000000e+00 : f32
    %178 = vector.broadcast %cst_37 : f32 to vector<8x128xf32>
    %179 = arith.subf %178, %170 : vector<8x128xf32>
    %180 = arith.mulf %179, %177 : vector<8x128xf32>
    %181 = arith.mulf %170, %116 : vector<8x128xf32>
    %182 = arith.addf %180, %181 : vector<8x128xf32>
    %183 = arith.truncf %182 : vector<8x128xf32> to vector<8x128xbf16>
    %cst_38 = arith.constant dense<0.000000e+00> : vector<8x384xf32>
    %184 = tpu.matmul %183, %7, %cst_38 {dimension_numbers = #tpu.dot_dimension_numbers<[1], [0], [0], [1], [0, 0, 1, 1], [], []>} : vector<8x128xbf16>, vector<128x384xbf16>, vector<8x384xf32> -> vector<8x384xf32>
    %185 = vector.broadcast %2 : vector<1x384xf32> to vector<8x384xf32>
    %186 = arith.addf %184, %185 : vector<8x384xf32>
    %187 = vector.extract_strided_slice %186 {offsets = [0, 0], sizes = [8, 128], strides = [1, 1]} : vector<8x384xf32> to vector<8x128xf32>
    %188 = vector.extract_strided_slice %153 {offsets = [0, 0], sizes = [8, 128], strides = [1, 1]} : vector<8x384xf32> to vector<8x128xf32>
    %189 = arith.addf %187, %188 : vector<8x128xf32>
    %190 = arith.negf %189 : vector<8x128xf32>
    %191 = math.exp %190 : vector<8x128xf32>
    %cst_39 = arith.constant 1.000000e+00 : f32
    %192 = vector.broadcast %cst_39 : f32 to vector<8x128xf32>
    %193 = arith.addf %192, %191 : vector<8x128xf32>
    %194 = arith.divf %192, %193 : vector<8x128xf32>
    %195 = vector.extract_strided_slice %186 {offsets = [0, 128], sizes = [8, 128], strides = [1, 1]} : vector<8x384xf32> to vector<8x128xf32>
    %196 = vector.extract_strided_slice %153 {offsets = [0, 128], sizes = [8, 128], strides = [1, 1]} : vector<8x384xf32> to vector<8x128xf32>
    %197 = arith.addf %195, %196 : vector<8x128xf32>
    %198 = arith.negf %197 : vector<8x128xf32>
    %199 = math.exp %198 : vector<8x128xf32>
    %cst_40 = arith.constant 1.000000e+00 : f32
    %200 = vector.broadcast %cst_40 : f32 to vector<8x128xf32>
    %201 = arith.addf %200, %199 : vector<8x128xf32>
    %202 = arith.divf %200, %201 : vector<8x128xf32>
    %203 = vector.extract_strided_slice %186 {offsets = [0, 256], sizes = [8, 128], strides = [1, 1]} : vector<8x384xf32> to vector<8x128xf32>
    %204 = vector.extract_strided_slice %153 {offsets = [0, 256], sizes = [8, 128], strides = [1, 1]} : vector<8x384xf32> to vector<8x128xf32>
    %205 = vector.broadcast %4 : vector<1x128xf32> to vector<8x128xf32>
    %206 = arith.addf %204, %205 : vector<8x128xf32>
    %207 = arith.mulf %194, %206 : vector<8x128xf32>
    %208 = arith.addf %203, %207 : vector<8x128xf32>
    %209 = math.tanh %208 : vector<8x128xf32>
    %cst_41 = arith.constant 1.000000e+00 : f32
    %210 = vector.broadcast %cst_41 : f32 to vector<8x128xf32>
    %211 = arith.subf %210, %202 : vector<8x128xf32>
    %212 = arith.mulf %211, %209 : vector<8x128xf32>
    %213 = arith.mulf %202, %148 : vector<8x128xf32>
    %214 = arith.addf %212, %213 : vector<8x128xf32>
    %215 = tpu.concatenate %182, %214 in 1 : vector<8x128xf32>, vector<8x128xf32> -> vector<8x256xf32>
    %216 = arith.truncf %215 : vector<8x256xf32> to vector<8x256xbf16>
    %cst_42 = arith.constant dense<0.000000e+00> : vector<8x768xf32>
    %217 = tpu.matmul %216, %6, %cst_42 {dimension_numbers = #tpu.dot_dimension_numbers<[1], [0], [0], [1], [0, 0, 1, 1], [], []>} : vector<8x256xbf16>, vector<256x768xbf16>, vector<8x768xf32> -> vector<8x768xf32>
    %218 = vector.extract_strided_slice %217 {offsets = [0, 0], sizes = [8, 384], strides = [1, 1]} : vector<8x768xf32> to vector<8x384xf32>
    %219 = vector.extract_strided_slice %217 {offsets = [0, 384], sizes = [8, 384], strides = [1, 1]} : vector<8x768xf32> to vector<8x384xf32>
    %c24 = arith.constant 24 : index
    %c0_43 = arith.constant 0 : index
    %220 = vector.load %arg6[%c24, %c0_43] : memref<64x384xf32, #tpu.memory_space<vmem>>, vector<8x384xf32>
    %221 = vector.extract_strided_slice %220 {offsets = [0, 0], sizes = [8, 128], strides = [1, 1]} : vector<8x384xf32> to vector<8x128xf32>
    %222 = vector.extract_strided_slice %218 {offsets = [0, 0], sizes = [8, 128], strides = [1, 1]} : vector<8x384xf32> to vector<8x128xf32>
    %223 = arith.addf %221, %222 : vector<8x128xf32>
    %224 = arith.negf %223 : vector<8x128xf32>
    %225 = math.exp %224 : vector<8x128xf32>
    %cst_44 = arith.constant 1.000000e+00 : f32
    %226 = vector.broadcast %cst_44 : f32 to vector<8x128xf32>
    %227 = arith.addf %226, %225 : vector<8x128xf32>
    %228 = arith.divf %226, %227 : vector<8x128xf32>
    %229 = vector.extract_strided_slice %220 {offsets = [0, 128], sizes = [8, 128], strides = [1, 1]} : vector<8x384xf32> to vector<8x128xf32>
    %230 = vector.extract_strided_slice %218 {offsets = [0, 128], sizes = [8, 128], strides = [1, 1]} : vector<8x384xf32> to vector<8x128xf32>
    %231 = arith.addf %229, %230 : vector<8x128xf32>
    %232 = arith.negf %231 : vector<8x128xf32>
    %233 = math.exp %232 : vector<8x128xf32>
    %cst_45 = arith.constant 1.000000e+00 : f32
    %234 = vector.broadcast %cst_45 : f32 to vector<8x128xf32>
    %235 = arith.addf %234, %233 : vector<8x128xf32>
    %236 = arith.divf %234, %235 : vector<8x128xf32>
    %237 = vector.extract_strided_slice %220 {offsets = [0, 256], sizes = [8, 128], strides = [1, 1]} : vector<8x384xf32> to vector<8x128xf32>
    %238 = vector.extract_strided_slice %218 {offsets = [0, 256], sizes = [8, 128], strides = [1, 1]} : vector<8x384xf32> to vector<8x128xf32>
    %239 = vector.broadcast %3 : vector<1x128xf32> to vector<8x128xf32>
    %240 = arith.addf %238, %239 : vector<8x128xf32>
    %241 = arith.mulf %228, %240 : vector<8x128xf32>
    %242 = arith.addf %237, %241 : vector<8x128xf32>
    %243 = math.tanh %242 : vector<8x128xf32>
    %cst_46 = arith.constant 1.000000e+00 : f32
    %244 = vector.broadcast %cst_46 : f32 to vector<8x128xf32>
    %245 = arith.subf %244, %236 : vector<8x128xf32>
    %246 = arith.mulf %245, %243 : vector<8x128xf32>
    %247 = arith.mulf %236, %182 : vector<8x128xf32>
    %248 = arith.addf %246, %247 : vector<8x128xf32>
    %249 = arith.truncf %248 : vector<8x128xf32> to vector<8x128xbf16>
    %cst_47 = arith.constant dense<0.000000e+00> : vector<8x384xf32>
    %250 = tpu.matmul %249, %7, %cst_47 {dimension_numbers = #tpu.dot_dimension_numbers<[1], [0], [0], [1], [0, 0, 1, 1], [], []>} : vector<8x128xbf16>, vector<128x384xbf16>, vector<8x384xf32> -> vector<8x384xf32>
    %251 = vector.broadcast %2 : vector<1x384xf32> to vector<8x384xf32>
    %252 = arith.addf %250, %251 : vector<8x384xf32>
    %253 = vector.extract_strided_slice %252 {offsets = [0, 0], sizes = [8, 128], strides = [1, 1]} : vector<8x384xf32> to vector<8x128xf32>
    %254 = vector.extract_strided_slice %219 {offsets = [0, 0], sizes = [8, 128], strides = [1, 1]} : vector<8x384xf32> to vector<8x128xf32>
    %255 = arith.addf %253, %254 : vector<8x128xf32>
    %256 = arith.negf %255 : vector<8x128xf32>
    %257 = math.exp %256 : vector<8x128xf32>
    %cst_48 = arith.constant 1.000000e+00 : f32
    %258 = vector.broadcast %cst_48 : f32 to vector<8x128xf32>
    %259 = arith.addf %258, %257 : vector<8x128xf32>
    %260 = arith.divf %258, %259 : vector<8x128xf32>
    %261 = vector.extract_strided_slice %252 {offsets = [0, 128], sizes = [8, 128], strides = [1, 1]} : vector<8x384xf32> to vector<8x128xf32>
    %262 = vector.extract_strided_slice %219 {offsets = [0, 128], sizes = [8, 128], strides = [1, 1]} : vector<8x384xf32> to vector<8x128xf32>
    %263 = arith.addf %261, %262 : vector<8x128xf32>
    %264 = arith.negf %263 : vector<8x128xf32>
    %265 = math.exp %264 : vector<8x128xf32>
    %cst_49 = arith.constant 1.000000e+00 : f32
    %266 = vector.broadcast %cst_49 : f32 to vector<8x128xf32>
    %267 = arith.addf %266, %265 : vector<8x128xf32>
    %268 = arith.divf %266, %267 : vector<8x128xf32>
    %269 = vector.extract_strided_slice %252 {offsets = [0, 256], sizes = [8, 128], strides = [1, 1]} : vector<8x384xf32> to vector<8x128xf32>
    %270 = vector.extract_strided_slice %219 {offsets = [0, 256], sizes = [8, 128], strides = [1, 1]} : vector<8x384xf32> to vector<8x128xf32>
    %271 = vector.broadcast %4 : vector<1x128xf32> to vector<8x128xf32>
    %272 = arith.addf %270, %271 : vector<8x128xf32>
    %273 = arith.mulf %260, %272 : vector<8x128xf32>
    %274 = arith.addf %269, %273 : vector<8x128xf32>
    %275 = math.tanh %274 : vector<8x128xf32>
    %cst_50 = arith.constant 1.000000e+00 : f32
    %276 = vector.broadcast %cst_50 : f32 to vector<8x128xf32>
    %277 = arith.subf %276, %268 : vector<8x128xf32>
    %278 = arith.mulf %277, %275 : vector<8x128xf32>
    %279 = arith.mulf %268, %214 : vector<8x128xf32>
    %280 = arith.addf %278, %279 : vector<8x128xf32>
    %281 = tpu.concatenate %248, %280 in 1 : vector<8x128xf32>, vector<8x128xf32> -> vector<8x256xf32>
    %282 = arith.truncf %281 : vector<8x256xf32> to vector<8x256xbf16>
    %cst_51 = arith.constant dense<0.000000e+00> : vector<8x768xf32>
    %283 = tpu.matmul %282, %6, %cst_51 {dimension_numbers = #tpu.dot_dimension_numbers<[1], [0], [0], [1], [0, 0, 1, 1], [], []>} : vector<8x256xbf16>, vector<256x768xbf16>, vector<8x768xf32> -> vector<8x768xf32>
    %284 = vector.extract_strided_slice %283 {offsets = [0, 0], sizes = [8, 384], strides = [1, 1]} : vector<8x768xf32> to vector<8x384xf32>
    %285 = vector.extract_strided_slice %283 {offsets = [0, 384], sizes = [8, 384], strides = [1, 1]} : vector<8x768xf32> to vector<8x384xf32>
    %c32 = arith.constant 32 : index
    %c0_52 = arith.constant 0 : index
    %286 = vector.load %arg6[%c32, %c0_52] : memref<64x384xf32, #tpu.memory_space<vmem>>, vector<8x384xf32>
    %287 = vector.extract_strided_slice %286 {offsets = [0, 0], sizes = [8, 128], strides = [1, 1]} : vector<8x384xf32> to vector<8x128xf32>
    %288 = vector.extract_strided_slice %284 {offsets = [0, 0], sizes = [8, 128], strides = [1, 1]} : vector<8x384xf32> to vector<8x128xf32>
    %289 = arith.addf %287, %288 : vector<8x128xf32>
    %290 = arith.negf %289 : vector<8x128xf32>
    %291 = math.exp %290 : vector<8x128xf32>
    %cst_53 = arith.constant 1.000000e+00 : f32
    %292 = vector.broadcast %cst_53 : f32 to vector<8x128xf32>
    %293 = arith.addf %292, %291 : vector<8x128xf32>
    %294 = arith.divf %292, %293 : vector<8x128xf32>
    %295 = vector.extract_strided_slice %286 {offsets = [0, 128], sizes = [8, 128], strides = [1, 1]} : vector<8x384xf32> to vector<8x128xf32>
    %296 = vector.extract_strided_slice %284 {offsets = [0, 128], sizes = [8, 128], strides = [1, 1]} : vector<8x384xf32> to vector<8x128xf32>
    %297 = arith.addf %295, %296 : vector<8x128xf32>
    %298 = arith.negf %297 : vector<8x128xf32>
    %299 = math.exp %298 : vector<8x128xf32>
    %cst_54 = arith.constant 1.000000e+00 : f32
    %300 = vector.broadcast %cst_54 : f32 to vector<8x128xf32>
    %301 = arith.addf %300, %299 : vector<8x128xf32>
    %302 = arith.divf %300, %301 : vector<8x128xf32>
    %303 = vector.extract_strided_slice %286 {offsets = [0, 256], sizes = [8, 128], strides = [1, 1]} : vector<8x384xf32> to vector<8x128xf32>
    %304 = vector.extract_strided_slice %284 {offsets = [0, 256], sizes = [8, 128], strides = [1, 1]} : vector<8x384xf32> to vector<8x128xf32>
    %305 = vector.broadcast %3 : vector<1x128xf32> to vector<8x128xf32>
    %306 = arith.addf %304, %305 : vector<8x128xf32>
    %307 = arith.mulf %294, %306 : vector<8x128xf32>
    %308 = arith.addf %303, %307 : vector<8x128xf32>
    %309 = math.tanh %308 : vector<8x128xf32>
    %cst_55 = arith.constant 1.000000e+00 : f32
    %310 = vector.broadcast %cst_55 : f32 to vector<8x128xf32>
    %311 = arith.subf %310, %302 : vector<8x128xf32>
    %312 = arith.mulf %311, %309 : vector<8x128xf32>
    %313 = arith.mulf %302, %248 : vector<8x128xf32>
    %314 = arith.addf %312, %313 : vector<8x128xf32>
    %315 = arith.truncf %314 : vector<8x128xf32> to vector<8x128xbf16>
    %cst_56 = arith.constant dense<0.000000e+00> : vector<8x384xf32>
    %316 = tpu.matmul %315, %7, %cst_56 {dimension_numbers = #tpu.dot_dimension_numbers<[1], [0], [0], [1], [0, 0, 1, 1], [], []>} : vector<8x128xbf16>, vector<128x384xbf16>, vector<8x384xf32> -> vector<8x384xf32>
    %317 = vector.broadcast %2 : vector<1x384xf32> to vector<8x384xf32>
    %318 = arith.addf %316, %317 : vector<8x384xf32>
    %319 = vector.extract_strided_slice %318 {offsets = [0, 0], sizes = [8, 128], strides = [1, 1]} : vector<8x384xf32> to vector<8x128xf32>
    %320 = vector.extract_strided_slice %285 {offsets = [0, 0], sizes = [8, 128], strides = [1, 1]} : vector<8x384xf32> to vector<8x128xf32>
    %321 = arith.addf %319, %320 : vector<8x128xf32>
    %322 = arith.negf %321 : vector<8x128xf32>
    %323 = math.exp %322 : vector<8x128xf32>
    %cst_57 = arith.constant 1.000000e+00 : f32
    %324 = vector.broadcast %cst_57 : f32 to vector<8x128xf32>
    %325 = arith.addf %324, %323 : vector<8x128xf32>
    %326 = arith.divf %324, %325 : vector<8x128xf32>
    %327 = vector.extract_strided_slice %318 {offsets = [0, 128], sizes = [8, 128], strides = [1, 1]} : vector<8x384xf32> to vector<8x128xf32>
    %328 = vector.extract_strided_slice %285 {offsets = [0, 128], sizes = [8, 128], strides = [1, 1]} : vector<8x384xf32> to vector<8x128xf32>
    %329 = arith.addf %327, %328 : vector<8x128xf32>
    %330 = arith.negf %329 : vector<8x128xf32>
    %331 = math.exp %330 : vector<8x128xf32>
    %cst_58 = arith.constant 1.000000e+00 : f32
    %332 = vector.broadcast %cst_58 : f32 to vector<8x128xf32>
    %333 = arith.addf %332, %331 : vector<8x128xf32>
    %334 = arith.divf %332, %333 : vector<8x128xf32>
    %335 = vector.extract_strided_slice %318 {offsets = [0, 256], sizes = [8, 128], strides = [1, 1]} : vector<8x384xf32> to vector<8x128xf32>
    %336 = vector.extract_strided_slice %285 {offsets = [0, 256], sizes = [8, 128], strides = [1, 1]} : vector<8x384xf32> to vector<8x128xf32>
    %337 = vector.broadcast %4 : vector<1x128xf32> to vector<8x128xf32>
    %338 = arith.addf %336, %337 : vector<8x128xf32>
    %339 = arith.mulf %326, %338 : vector<8x128xf32>
    %340 = arith.addf %335, %339 : vector<8x128xf32>
    %341 = math.tanh %340 : vector<8x128xf32>
    %cst_59 = arith.constant 1.000000e+00 : f32
    %342 = vector.broadcast %cst_59 : f32 to vector<8x128xf32>
    %343 = arith.subf %342, %334 : vector<8x128xf32>
    %344 = arith.mulf %343, %341 : vector<8x128xf32>
    %345 = arith.mulf %334, %280 : vector<8x128xf32>
    %346 = arith.addf %344, %345 : vector<8x128xf32>
    %347 = tpu.concatenate %314, %346 in 1 : vector<8x128xf32>, vector<8x128xf32> -> vector<8x256xf32>
    %348 = arith.truncf %347 : vector<8x256xf32> to vector<8x256xbf16>
    %cst_60 = arith.constant dense<0.000000e+00> : vector<8x768xf32>
    %349 = tpu.matmul %348, %6, %cst_60 {dimension_numbers = #tpu.dot_dimension_numbers<[1], [0], [0], [1], [0, 0, 1, 1], [], []>} : vector<8x256xbf16>, vector<256x768xbf16>, vector<8x768xf32> -> vector<8x768xf32>
    %350 = vector.extract_strided_slice %349 {offsets = [0, 0], sizes = [8, 384], strides = [1, 1]} : vector<8x768xf32> to vector<8x384xf32>
    %351 = vector.extract_strided_slice %349 {offsets = [0, 384], sizes = [8, 384], strides = [1, 1]} : vector<8x768xf32> to vector<8x384xf32>
    %c40 = arith.constant 40 : index
    %c0_61 = arith.constant 0 : index
    %352 = vector.load %arg6[%c40, %c0_61] : memref<64x384xf32, #tpu.memory_space<vmem>>, vector<8x384xf32>
    %353 = vector.extract_strided_slice %352 {offsets = [0, 0], sizes = [8, 128], strides = [1, 1]} : vector<8x384xf32> to vector<8x128xf32>
    %354 = vector.extract_strided_slice %350 {offsets = [0, 0], sizes = [8, 128], strides = [1, 1]} : vector<8x384xf32> to vector<8x128xf32>
    %355 = arith.addf %353, %354 : vector<8x128xf32>
    %356 = arith.negf %355 : vector<8x128xf32>
    %357 = math.exp %356 : vector<8x128xf32>
    %cst_62 = arith.constant 1.000000e+00 : f32
    %358 = vector.broadcast %cst_62 : f32 to vector<8x128xf32>
    %359 = arith.addf %358, %357 : vector<8x128xf32>
    %360 = arith.divf %358, %359 : vector<8x128xf32>
    %361 = vector.extract_strided_slice %352 {offsets = [0, 128], sizes = [8, 128], strides = [1, 1]} : vector<8x384xf32> to vector<8x128xf32>
    %362 = vector.extract_strided_slice %350 {offsets = [0, 128], sizes = [8, 128], strides = [1, 1]} : vector<8x384xf32> to vector<8x128xf32>
    %363 = arith.addf %361, %362 : vector<8x128xf32>
    %364 = arith.negf %363 : vector<8x128xf32>
    %365 = math.exp %364 : vector<8x128xf32>
    %cst_63 = arith.constant 1.000000e+00 : f32
    %366 = vector.broadcast %cst_63 : f32 to vector<8x128xf32>
    %367 = arith.addf %366, %365 : vector<8x128xf32>
    %368 = arith.divf %366, %367 : vector<8x128xf32>
    %369 = vector.extract_strided_slice %352 {offsets = [0, 256], sizes = [8, 128], strides = [1, 1]} : vector<8x384xf32> to vector<8x128xf32>
    %370 = vector.extract_strided_slice %350 {offsets = [0, 256], sizes = [8, 128], strides = [1, 1]} : vector<8x384xf32> to vector<8x128xf32>
    %371 = vector.broadcast %3 : vector<1x128xf32> to vector<8x128xf32>
    %372 = arith.addf %370, %371 : vector<8x128xf32>
    %373 = arith.mulf %360, %372 : vector<8x128xf32>
    %374 = arith.addf %369, %373 : vector<8x128xf32>
    %375 = math.tanh %374 : vector<8x128xf32>
    %cst_64 = arith.constant 1.000000e+00 : f32
    %376 = vector.broadcast %cst_64 : f32 to vector<8x128xf32>
    %377 = arith.subf %376, %368 : vector<8x128xf32>
    %378 = arith.mulf %377, %375 : vector<8x128xf32>
    %379 = arith.mulf %368, %314 : vector<8x128xf32>
    %380 = arith.addf %378, %379 : vector<8x128xf32>
    %381 = arith.truncf %380 : vector<8x128xf32> to vector<8x128xbf16>
    %cst_65 = arith.constant dense<0.000000e+00> : vector<8x384xf32>
    %382 = tpu.matmul %381, %7, %cst_65 {dimension_numbers = #tpu.dot_dimension_numbers<[1], [0], [0], [1], [0, 0, 1, 1], [], []>} : vector<8x128xbf16>, vector<128x384xbf16>, vector<8x384xf32> -> vector<8x384xf32>
    %383 = vector.broadcast %2 : vector<1x384xf32> to vector<8x384xf32>
    %384 = arith.addf %382, %383 : vector<8x384xf32>
    %385 = vector.extract_strided_slice %384 {offsets = [0, 0], sizes = [8, 128], strides = [1, 1]} : vector<8x384xf32> to vector<8x128xf32>
    %386 = vector.extract_strided_slice %351 {offsets = [0, 0], sizes = [8, 128], strides = [1, 1]} : vector<8x384xf32> to vector<8x128xf32>
    %387 = arith.addf %385, %386 : vector<8x128xf32>
    %388 = arith.negf %387 : vector<8x128xf32>
    %389 = math.exp %388 : vector<8x128xf32>
    %cst_66 = arith.constant 1.000000e+00 : f32
    %390 = vector.broadcast %cst_66 : f32 to vector<8x128xf32>
    %391 = arith.addf %390, %389 : vector<8x128xf32>
    %392 = arith.divf %390, %391 : vector<8x128xf32>
    %393 = vector.extract_strided_slice %384 {offsets = [0, 128], sizes = [8, 128], strides = [1, 1]} : vector<8x384xf32> to vector<8x128xf32>
    %394 = vector.extract_strided_slice %351 {offsets = [0, 128], sizes = [8, 128], strides = [1, 1]} : vector<8x384xf32> to vector<8x128xf32>
    %395 = arith.addf %393, %394 : vector<8x128xf32>
    %396 = arith.negf %395 : vector<8x128xf32>
    %397 = math.exp %396 : vector<8x128xf32>
    %cst_67 = arith.constant 1.000000e+00 : f32
    %398 = vector.broadcast %cst_67 : f32 to vector<8x128xf32>
    %399 = arith.addf %398, %397 : vector<8x128xf32>
    %400 = arith.divf %398, %399 : vector<8x128xf32>
    %401 = vector.extract_strided_slice %384 {offsets = [0, 256], sizes = [8, 128], strides = [1, 1]} : vector<8x384xf32> to vector<8x128xf32>
    %402 = vector.extract_strided_slice %351 {offsets = [0, 256], sizes = [8, 128], strides = [1, 1]} : vector<8x384xf32> to vector<8x128xf32>
    %403 = vector.broadcast %4 : vector<1x128xf32> to vector<8x128xf32>
    %404 = arith.addf %402, %403 : vector<8x128xf32>
    %405 = arith.mulf %392, %404 : vector<8x128xf32>
    %406 = arith.addf %401, %405 : vector<8x128xf32>
    %407 = math.tanh %406 : vector<8x128xf32>
    %cst_68 = arith.constant 1.000000e+00 : f32
    %408 = vector.broadcast %cst_68 : f32 to vector<8x128xf32>
    %409 = arith.subf %408, %400 : vector<8x128xf32>
    %410 = arith.mulf %409, %407 : vector<8x128xf32>
    %411 = arith.mulf %400, %346 : vector<8x128xf32>
    %412 = arith.addf %410, %411 : vector<8x128xf32>
    %413 = tpu.concatenate %380, %412 in 1 : vector<8x128xf32>, vector<8x128xf32> -> vector<8x256xf32>
    %414 = arith.truncf %413 : vector<8x256xf32> to vector<8x256xbf16>
    %cst_69 = arith.constant dense<0.000000e+00> : vector<8x768xf32>
    %415 = tpu.matmul %414, %6, %cst_69 {dimension_numbers = #tpu.dot_dimension_numbers<[1], [0], [0], [1], [0, 0, 1, 1], [], []>} : vector<8x256xbf16>, vector<256x768xbf16>, vector<8x768xf32> -> vector<8x768xf32>
    %416 = vector.extract_strided_slice %415 {offsets = [0, 0], sizes = [8, 384], strides = [1, 1]} : vector<8x768xf32> to vector<8x384xf32>
    %417 = vector.extract_strided_slice %415 {offsets = [0, 384], sizes = [8, 384], strides = [1, 1]} : vector<8x768xf32> to vector<8x384xf32>
    %c48 = arith.constant 48 : index
    %c0_70 = arith.constant 0 : index
    %418 = vector.load %arg6[%c48, %c0_70] : memref<64x384xf32, #tpu.memory_space<vmem>>, vector<8x384xf32>
    %419 = vector.extract_strided_slice %418 {offsets = [0, 0], sizes = [8, 128], strides = [1, 1]} : vector<8x384xf32> to vector<8x128xf32>
    %420 = vector.extract_strided_slice %416 {offsets = [0, 0], sizes = [8, 128], strides = [1, 1]} : vector<8x384xf32> to vector<8x128xf32>
    %421 = arith.addf %419, %420 : vector<8x128xf32>
    %422 = arith.negf %421 : vector<8x128xf32>
    %423 = math.exp %422 : vector<8x128xf32>
    %cst_71 = arith.constant 1.000000e+00 : f32
    %424 = vector.broadcast %cst_71 : f32 to vector<8x128xf32>
    %425 = arith.addf %424, %423 : vector<8x128xf32>
    %426 = arith.divf %424, %425 : vector<8x128xf32>
    %427 = vector.extract_strided_slice %418 {offsets = [0, 128], sizes = [8, 128], strides = [1, 1]} : vector<8x384xf32> to vector<8x128xf32>
    %428 = vector.extract_strided_slice %416 {offsets = [0, 128], sizes = [8, 128], strides = [1, 1]} : vector<8x384xf32> to vector<8x128xf32>
    %429 = arith.addf %427, %428 : vector<8x128xf32>
    %430 = arith.negf %429 : vector<8x128xf32>
    %431 = math.exp %430 : vector<8x128xf32>
    %cst_72 = arith.constant 1.000000e+00 : f32
    %432 = vector.broadcast %cst_72 : f32 to vector<8x128xf32>
    %433 = arith.addf %432, %431 : vector<8x128xf32>
    %434 = arith.divf %432, %433 : vector<8x128xf32>
    %435 = vector.extract_strided_slice %418 {offsets = [0, 256], sizes = [8, 128], strides = [1, 1]} : vector<8x384xf32> to vector<8x128xf32>
    %436 = vector.extract_strided_slice %416 {offsets = [0, 256], sizes = [8, 128], strides = [1, 1]} : vector<8x384xf32> to vector<8x128xf32>
    %437 = vector.broadcast %3 : vector<1x128xf32> to vector<8x128xf32>
    %438 = arith.addf %436, %437 : vector<8x128xf32>
    %439 = arith.mulf %426, %438 : vector<8x128xf32>
    %440 = arith.addf %435, %439 : vector<8x128xf32>
    %441 = math.tanh %440 : vector<8x128xf32>
    %cst_73 = arith.constant 1.000000e+00 : f32
    %442 = vector.broadcast %cst_73 : f32 to vector<8x128xf32>
    %443 = arith.subf %442, %434 : vector<8x128xf32>
    %444 = arith.mulf %443, %441 : vector<8x128xf32>
    %445 = arith.mulf %434, %380 : vector<8x128xf32>
    %446 = arith.addf %444, %445 : vector<8x128xf32>
    %447 = arith.truncf %446 : vector<8x128xf32> to vector<8x128xbf16>
    %cst_74 = arith.constant dense<0.000000e+00> : vector<8x384xf32>
    %448 = tpu.matmul %447, %7, %cst_74 {dimension_numbers = #tpu.dot_dimension_numbers<[1], [0], [0], [1], [0, 0, 1, 1], [], []>} : vector<8x128xbf16>, vector<128x384xbf16>, vector<8x384xf32> -> vector<8x384xf32>
    %449 = vector.broadcast %2 : vector<1x384xf32> to vector<8x384xf32>
    %450 = arith.addf %448, %449 : vector<8x384xf32>
    %451 = vector.extract_strided_slice %450 {offsets = [0, 0], sizes = [8, 128], strides = [1, 1]} : vector<8x384xf32> to vector<8x128xf32>
    %452 = vector.extract_strided_slice %417 {offsets = [0, 0], sizes = [8, 128], strides = [1, 1]} : vector<8x384xf32> to vector<8x128xf32>
    %453 = arith.addf %451, %452 : vector<8x128xf32>
    %454 = arith.negf %453 : vector<8x128xf32>
    %455 = math.exp %454 : vector<8x128xf32>
    %cst_75 = arith.constant 1.000000e+00 : f32
    %456 = vector.broadcast %cst_75 : f32 to vector<8x128xf32>
    %457 = arith.addf %456, %455 : vector<8x128xf32>
    %458 = arith.divf %456, %457 : vector<8x128xf32>
    %459 = vector.extract_strided_slice %450 {offsets = [0, 128], sizes = [8, 128], strides = [1, 1]} : vector<8x384xf32> to vector<8x128xf32>
    %460 = vector.extract_strided_slice %417 {offsets = [0, 128], sizes = [8, 128], strides = [1, 1]} : vector<8x384xf32> to vector<8x128xf32>
    %461 = arith.addf %459, %460 : vector<8x128xf32>
    %462 = arith.negf %461 : vector<8x128xf32>
    %463 = math.exp %462 : vector<8x128xf32>
    %cst_76 = arith.constant 1.000000e+00 : f32
    %464 = vector.broadcast %cst_76 : f32 to vector<8x128xf32>
    %465 = arith.addf %464, %463 : vector<8x128xf32>
    %466 = arith.divf %464, %465 : vector<8x128xf32>
    %467 = vector.extract_strided_slice %450 {offsets = [0, 256], sizes = [8, 128], strides = [1, 1]} : vector<8x384xf32> to vector<8x128xf32>
    %468 = vector.extract_strided_slice %417 {offsets = [0, 256], sizes = [8, 128], strides = [1, 1]} : vector<8x384xf32> to vector<8x128xf32>
    %469 = vector.broadcast %4 : vector<1x128xf32> to vector<8x128xf32>
    %470 = arith.addf %468, %469 : vector<8x128xf32>
    %471 = arith.mulf %458, %470 : vector<8x128xf32>
    %472 = arith.addf %467, %471 : vector<8x128xf32>
    %473 = math.tanh %472 : vector<8x128xf32>
    %cst_77 = arith.constant 1.000000e+00 : f32
    %474 = vector.broadcast %cst_77 : f32 to vector<8x128xf32>
    %475 = arith.subf %474, %466 : vector<8x128xf32>
    %476 = arith.mulf %475, %473 : vector<8x128xf32>
    %477 = arith.mulf %466, %412 : vector<8x128xf32>
    %478 = arith.addf %476, %477 : vector<8x128xf32>
    %479 = tpu.concatenate %446, %478 in 1 : vector<8x128xf32>, vector<8x128xf32> -> vector<8x256xf32>
    %480 = arith.truncf %479 : vector<8x256xf32> to vector<8x256xbf16>
    %cst_78 = arith.constant dense<0.000000e+00> : vector<8x768xf32>
    %481 = tpu.matmul %480, %6, %cst_78 {dimension_numbers = #tpu.dot_dimension_numbers<[1], [0], [0], [1], [0, 0, 1, 1], [], []>} : vector<8x256xbf16>, vector<256x768xbf16>, vector<8x768xf32> -> vector<8x768xf32>
    %482 = vector.extract_strided_slice %481 {offsets = [0, 0], sizes = [8, 384], strides = [1, 1]} : vector<8x768xf32> to vector<8x384xf32>
    %483 = vector.extract_strided_slice %481 {offsets = [0, 384], sizes = [8, 384], strides = [1, 1]} : vector<8x768xf32> to vector<8x384xf32>
    %c56 = arith.constant 56 : index
    %c0_79 = arith.constant 0 : index
    %484 = vector.load %arg6[%c56, %c0_79] : memref<64x384xf32, #tpu.memory_space<vmem>>, vector<8x384xf32>
    %485 = vector.extract_strided_slice %484 {offsets = [0, 0], sizes = [8, 128], strides = [1, 1]} : vector<8x384xf32> to vector<8x128xf32>
    %486 = vector.extract_strided_slice %482 {offsets = [0, 0], sizes = [8, 128], strides = [1, 1]} : vector<8x384xf32> to vector<8x128xf32>
    %487 = arith.addf %485, %486 : vector<8x128xf32>
    %488 = arith.negf %487 : vector<8x128xf32>
    %489 = math.exp %488 : vector<8x128xf32>
    %cst_80 = arith.constant 1.000000e+00 : f32
    %490 = vector.broadcast %cst_80 : f32 to vector<8x128xf32>
    %491 = arith.addf %490, %489 : vector<8x128xf32>
    %492 = arith.divf %490, %491 : vector<8x128xf32>
    %493 = vector.extract_strided_slice %484 {offsets = [0, 128], sizes = [8, 128], strides = [1, 1]} : vector<8x384xf32> to vector<8x128xf32>
    %494 = vector.extract_strided_slice %482 {offsets = [0, 128], sizes = [8, 128], strides = [1, 1]} : vector<8x384xf32> to vector<8x128xf32>
    %495 = arith.addf %493, %494 : vector<8x128xf32>
    %496 = arith.negf %495 : vector<8x128xf32>
    %497 = math.exp %496 : vector<8x128xf32>
    %cst_81 = arith.constant 1.000000e+00 : f32
    %498 = vector.broadcast %cst_81 : f32 to vector<8x128xf32>
    %499 = arith.addf %498, %497 : vector<8x128xf32>
    %500 = arith.divf %498, %499 : vector<8x128xf32>
    %501 = vector.extract_strided_slice %484 {offsets = [0, 256], sizes = [8, 128], strides = [1, 1]} : vector<8x384xf32> to vector<8x128xf32>
    %502 = vector.extract_strided_slice %482 {offsets = [0, 256], sizes = [8, 128], strides = [1, 1]} : vector<8x384xf32> to vector<8x128xf32>
    %503 = vector.broadcast %3 : vector<1x128xf32> to vector<8x128xf32>
    %504 = arith.addf %502, %503 : vector<8x128xf32>
    %505 = arith.mulf %492, %504 : vector<8x128xf32>
    %506 = arith.addf %501, %505 : vector<8x128xf32>
    %507 = math.tanh %506 : vector<8x128xf32>
    %cst_82 = arith.constant 1.000000e+00 : f32
    %508 = vector.broadcast %cst_82 : f32 to vector<8x128xf32>
    %509 = arith.subf %508, %500 : vector<8x128xf32>
    %510 = arith.mulf %509, %507 : vector<8x128xf32>
    %511 = arith.mulf %500, %446 : vector<8x128xf32>
    %512 = arith.addf %510, %511 : vector<8x128xf32>
    %513 = arith.truncf %512 : vector<8x128xf32> to vector<8x128xbf16>
    %cst_83 = arith.constant dense<0.000000e+00> : vector<8x384xf32>
    %514 = tpu.matmul %513, %7, %cst_83 {dimension_numbers = #tpu.dot_dimension_numbers<[1], [0], [0], [1], [0, 0, 1, 1], [], []>} : vector<8x128xbf16>, vector<128x384xbf16>, vector<8x384xf32> -> vector<8x384xf32>
    %515 = vector.broadcast %2 : vector<1x384xf32> to vector<8x384xf32>
    %516 = arith.addf %514, %515 : vector<8x384xf32>
    %517 = vector.extract_strided_slice %516 {offsets = [0, 0], sizes = [8, 128], strides = [1, 1]} : vector<8x384xf32> to vector<8x128xf32>
    %518 = vector.extract_strided_slice %483 {offsets = [0, 0], sizes = [8, 128], strides = [1, 1]} : vector<8x384xf32> to vector<8x128xf32>
    %519 = arith.addf %517, %518 : vector<8x128xf32>
    %520 = arith.negf %519 : vector<8x128xf32>
    %521 = math.exp %520 : vector<8x128xf32>
    %cst_84 = arith.constant 1.000000e+00 : f32
    %522 = vector.broadcast %cst_84 : f32 to vector<8x128xf32>
    %523 = arith.addf %522, %521 : vector<8x128xf32>
    %524 = arith.divf %522, %523 : vector<8x128xf32>
    %525 = vector.extract_strided_slice %516 {offsets = [0, 128], sizes = [8, 128], strides = [1, 1]} : vector<8x384xf32> to vector<8x128xf32>
    %526 = vector.extract_strided_slice %483 {offsets = [0, 128], sizes = [8, 128], strides = [1, 1]} : vector<8x384xf32> to vector<8x128xf32>
    %527 = arith.addf %525, %526 : vector<8x128xf32>
    %528 = arith.negf %527 : vector<8x128xf32>
    %529 = math.exp %528 : vector<8x128xf32>
    %cst_85 = arith.constant 1.000000e+00 : f32
    %530 = vector.broadcast %cst_85 : f32 to vector<8x128xf32>
    %531 = arith.addf %530, %529 : vector<8x128xf32>
    %532 = arith.divf %530, %531 : vector<8x128xf32>
    %533 = vector.extract_strided_slice %516 {offsets = [0, 256], sizes = [8, 128], strides = [1, 1]} : vector<8x384xf32> to vector<8x128xf32>
    %534 = vector.extract_strided_slice %483 {offsets = [0, 256], sizes = [8, 128], strides = [1, 1]} : vector<8x384xf32> to vector<8x128xf32>
    %535 = vector.broadcast %4 : vector<1x128xf32> to vector<8x128xf32>
    %536 = arith.addf %534, %535 : vector<8x128xf32>
    %537 = arith.mulf %524, %536 : vector<8x128xf32>
    %538 = arith.addf %533, %537 : vector<8x128xf32>
    %539 = math.tanh %538 : vector<8x128xf32>
    %cst_86 = arith.constant 1.000000e+00 : f32
    %540 = vector.broadcast %cst_86 : f32 to vector<8x128xf32>
    %541 = arith.subf %540, %532 : vector<8x128xf32>
    %542 = arith.mulf %541, %539 : vector<8x128xf32>
    %543 = arith.mulf %532, %478 : vector<8x128xf32>
    %544 = arith.addf %542, %543 : vector<8x128xf32>
    %545 = arith.truncf %544 : vector<8x128xf32> to vector<8x128xbf16>
    %cst_87 = arith.constant dense<0.000000e+00> : vector<8x128xf32>
    %546 = tpu.matmul %545, %8, %cst_87 {dimension_numbers = #tpu.dot_dimension_numbers<[1], [0], [0], [1], [0, 0, 1, 1], [], []>} : vector<8x128xbf16>, vector<128x128xbf16>, vector<8x128xf32> -> vector<8x128xf32>
    %547 = vector.broadcast %5 : vector<1x128xf32> to vector<8x128xf32>
    %548 = arith.addf %546, %547 : vector<8x128xf32>
    %c0_88 = arith.constant 0 : index
    %c0_89 = arith.constant 0 : index
    %549 = vector.load %arg5[%c0_88, %c0_89] : memref<8x128xf32, #tpu.memory_space<vmem>>, vector<8x128xf32>
    tpu.vector_store %arg5[%c0_88, %c0_89], %548 {strides = array<i32>} : memref<8x128xf32, #tpu.memory_space<vmem>>, vector<8x128xf32>,
    return
  }
}

</mosaic_0001>

<bundles_post_ra>
// kernel: tpu_custom_call.1
= control target key start
LH: loop header
LB: loop body
LE: loop exit
PB: predicated region body
PF: predicated region fallthrough
CT: control target
= control target key end

     0   :  { %10 = vsyncpa [#allocation4], 0  ;;  %s6876_s0 = inlined_call_operand.hbm [shape: bf16[64,128], index: 0, kind: input, shape index: {}]   ;;  %s6877_s1 = inlined_call_operand.hbm [shape: bf16[128,384], index: 1, kind: input, shape index: {}]   ;;  %s6878_s2 = inlined_call_operand.hbm [shape: bf16[256,768], index: 2, kind: input, shape index: {}]   ;;  %s6879_s3 = inlined_call_operand.hbm [shape: bf16[128,512], index: 3, kind: input, shape index: {}]   ;;  %s6880_s4 = inlined_call_operand.hbm [shape: f32[8,384], index: 4, kind: input, shape index: {}]   ;;  %s6881_s5 = inlined_call_operand.hbm [shape: f32[8,128], index: 5, kind: output, shape index: {}]  }
   0x1   :  { %11 = vsyncpa [#allocation7], 0 }
   0x2   :  { %12 = vsyncpa [#allocation10], 0 }
   0x3   :  { %13 = vsyncpa [#allocation5], 0  ;;  %s4629_s18 = smov [#allocation6]   ;;  %s4489_s22 = scalar_lea.hbm %s6877_s1, 3072 }
   0x4   :  { %s31_s19 = sshll.u32 %s4629_s18, 4  ;;  %p4490_p0 = scmp.ne.s32.totalorder %s6877_s1, %s4489_s22  ;;  %s32_s19 = int_to_ptr.vmem [resolvable:$true] %s31_s19 }
   0x5   :  { %p4493_p1 = scmp.lt.u32.totalorder %s4489_s22, %s6877_s1 }
   0x7   :  { %p4495_p2 = pnand %p4493_p1, %p4490_p0 }
   0x9   :  { %4498 = shalt.err (!%p4495_p2)
}
   0xa   :  { %s4499_s27 = scalar_lea.vmem %s32_s19, 3072  ;;  %p4504_p4 = scmp.lt.s32.totalorder %s32_s19, %s32_s19 }
   0xb   :  { %p4500_p3 = scmp.ne.s32.totalorder %s32_s19, %s4499_s27  ;;  %p4505_p5 = scmp.lt.s32.totalorder %s4499_s27, %s4499_s27 }
   0xd   :  { %p4506_p6 = por %p4505_p5, %p4504_p4 }
   0xf   :  { %p4507_p7 = pnand %p4506_p6, %p4500_p3 }
  0x11   :  { %4510 = shalt.err (!%p4507_p7)
}
  0x12   :  { %s4630_s28 = smov 192   ;;  %s4631_s29 = smov 12  }
  0x13   :  { %37 = dma.hbm_to_vmem [thread:$0]  %s6877_s1, 3072, %s32_s19, [#allocation7], %s4630_s28, %s4630_s28, %s4631_s29  }
  0x14   :  { %s4632_s7 = smov [#allocation9]   ;;  %s4511_s11 = scalar_lea.hbm %s6879_s3, 4096 }
  0x15   :  { %s55_s8 = sshll.u32 %s4632_s7, 4  ;;  %p4512_p8 = scmp.ne.s32.totalorder %s6879_s3, %s4511_s11  ;;  %s56_s8 = int_to_ptr.vmem [resolvable:$true] %s55_s8 }
  0x16   :  { %p4515_p9 = scmp.lt.u32.totalorder %s4511_s11, %s6879_s3 }
  0x18   :  { %p4517_p10 = pnand %p4515_p9, %p4512_p8 }
  0x1a   :  { %4520 = shalt.err (!%p4517_p10)
}
  0x1b   :  { %s4521_s16 = scalar_lea.vmem %s56_s8, 4096  ;;  %p4526_p12 = scmp.lt.s32.totalorder %s56_s8, %s56_s8 }
  0x1c   :  { %p4522_p11 = scmp.ne.s32.totalorder %s56_s8, %s4521_s16  ;;  %p4527_p13 = scmp.lt.s32.totalorder %s4521_s16, %s4521_s16 }
  0x1e   :  { %p4528_p0 = por %p4527_p13, %p4526_p12 }
  0x20   :  { %p4529_p1 = pnand %p4528_p0, %p4522_p11 }
  0x22   :  { %4532 = shalt.err (!%p4529_p1)
}
  0x23   :  { %s4633_s1 = smov 256   ;;  %s4634_s17 = smov 16  }
  0x24   :  { %61 = dma.hbm_to_vmem [thread:$0]  %s6879_s3, 4096, %s56_s8, [#allocation10], %s4633_s1, %s4633_s1, %s4634_s17  }
  0x25   :  { %s4635_s20 = smov [#allocation3]   ;;  %s4533_s24 = scalar_lea.hbm %s6876_s0, 512 }
  0x26   :  { %s19_s21 = sshll.u32 %s4635_s20, 4  ;;  %p4534_p2 = scmp.ne.s32.totalorder %s6876_s0, %s4533_s24  ;;  %s20_s21 = int_to_ptr.vmem [resolvable:$true] %s19_s21 }
  0x27   :  { %p4537_p3 = scmp.lt.u32.totalorder %s4533_s24, %s6876_s0 }
  0x29   :  { %p4539_p4 = pnand %p4537_p3, %p4534_p2 }
  0x2b   :  { %4542 = shalt.err (!%p4539_p4)
}
  0x2c   :  { %s4543_s29 = scalar_lea.vmem %s20_s21, 512  ;;  %p4548_p6 = scmp.lt.s32.totalorder %s20_s21, %s20_s21 }
  0x2d   :  { %p4544_p5 = scmp.ne.s32.totalorder %s20_s21, %s4543_s29  ;;  %p4549_p7 = scmp.lt.s32.totalorder %s4543_s29, %s4543_s29 }
  0x2f   :  { %p4550_p8 = por %p4549_p7, %p4548_p6 }
  0x31   :  { %p4551_p9 = pnand %p4550_p8, %p4544_p5 }
  0x33   :  { %4554 = shalt.err (!%p4551_p9)
}
  0x34   :  { %s4636_s3 = smov 64   ;;  %s4637_s30 = smov 4  }
  0x35   :  { %25 = dma.hbm_to_vmem [thread:$0]  %s6876_s0, 512, %s20_s21, [#allocation4], %s4636_s3, %s4636_s3, %s4637_s30  }
  0x36   :  { %s4638_s8 = smov [#allocation8]   ;;  %s4555_s12 = scalar_lea.hbm %s6878_s2, 12288 }
  0x37   :  { %s43_s9 = sshll.u32 %s4638_s8, 4  ;;  %p4556_p10 = scmp.ne.s32.totalorder %s6878_s2, %s4555_s12  ;;  %s44_s9 = int_to_ptr.vmem [resolvable:$true] %s43_s9 }
  0x38   :  { %p4559_p11 = scmp.lt.u32.totalorder %s4555_s12, %s6878_s2 }
  0x3a   :  { %p4561_p12 = pnand %p4559_p11, %p4556_p10 }
  0x3c   :  { %4564 = shalt.err (!%p4561_p12)
}
  0x3d   :  { %s4565_s1 = scalar_lea.vmem %s44_s9, 12288  ;;  %p4570_p0 = scmp.lt.s32.totalorder %s44_s9, %s44_s9 }
  0x3e   :  { %p4566_p13 = scmp.ne.s32.totalorder %s44_s9, %s4565_s1  ;;  %p4571_p1 = scmp.lt.s32.totalorder %s4565_s1, %s4565_s1 }
  0x40   :  { %p4572_p2 = por %p4571_p1, %p4570_p0 }
  0x42   :  { %p4573_p3 = pnand %p4572_p2, %p4566_p13 }
  0x44   :  { %4576 = shalt.err (!%p4573_p3)
}
  0x45   :  { %s4639_s0 = smov 384   ;;  %s4640_s17 = smov 24  }
  0x46   :  { %49 = dma.hbm_to_vmem [thread:$0]  %s6878_s2, 12288, %s44_s9, [#allocation7], %s4639_s0, %s4639_s0, %s4640_s17  }
  0x47   :  { %s4641_s20 = smov [#allocation11]   ;;  %s4577_s24 = scalar_lea.hbm %s6880_s4, 384 }
  0x48   :  { %s68_s21 = sshll.u32 %s4641_s20, 4  ;;  %p4578_p4 = scmp.ne.s32.totalorder %s6880_s4, %s4577_s24  ;;  %s69_s21 = int_to_ptr.vmem [resolvable:$true] %s68_s21 }
  0x49   :  { %p4581_p5 = scmp.lt.u32.totalorder %s4577_s24, %s6880_s4 }
  0x4b   :  { %p4583_p6 = pnand %p4581_p5, %p4578_p4 }
  0x4d   :  { %4586 = shalt.err (!%p4583_p6)
}
  0x4e   :  { %s4587_s29 = scalar_lea.vmem %s69_s21, 384  ;;  %p4592_p8 = scmp.lt.s32.totalorder %s69_s21, %s69_s21 }
  0x4f   :  { %p4588_p7 = scmp.ne.s32.totalorder %s69_s21, %s4587_s29  ;;  %p4593_p9 = scmp.lt.s32.totalorder %s4587_s29, %s4587_s29 }
  0x51   :  { %p4594_p10 = por %p4593_p9, %p4592_p8 }
  0x53   :  { %p4595_p11 = pnand %p4594_p10, %p4588_p7 }
  0x55   :  { %4598 = shalt.err (!%p4595_p11)
}
  0x56   :  { %71 = dma.hbm_to_vmem [thread:$0]  %s6880_s4, 384, %s69_s21, [#allocation10]  }
  0x57   :  { %4621 = dma.done.wait [#allocation4], 512  }
  0x58   :  { %4622 = vsyncadd [#allocation4], 4294966784 }
  0x59   :  { %4623 = dma.done.wait [#allocation7], 15360  }
  0x5a   :  { %4624 = vsyncadd [#allocation7], 4294951936 }
  0x5b   :  { %4625 = dma.done.wait [#allocation10], 4480  }
  0x5c   :  { %4626 = vsyncadd [#allocation10], 4294962816  ;;  %v6882_v0 = vmov 0   ;;  %v3867_v1 = vld [vmem:[#allocation6 + $0x4] ss:$12 sps:$4 sm:$0xff]   ;;  %v3920_v34 = vld [vmem:[#allocation3 + $0x8] sm:$0xff]  }
  0x5d   :  { %471 = vmatprep.mubr.bf16.mxu0 %v6882_v0  ;;  %v3869_v2 = vld [vmem:[#allocation6] ss:$12 sps:$4 sm:$0xff]   ;;  %439 = vmatprep.subr.bf16.mxu0 %v3867_v1  ;;  %v3870_v3 = vld [vmem:[#allocation6 + $0x1c] ss:$12 sps:$4 sm:$0xff]   ;;  %v3872_v4 = vld [vmem:[#allocation6 + $0x18] ss:$12 sps:$4 sm:$0xff]  }
  0x5e   :  { %440 = vmatpush1.bf16.msra.mxu0 %v3869_v2  ;;  %v3873_v5 = vld [vmem:[#allocation6 + $0x34] ss:$12 sps:$4 sm:$0xff]   ;;  %v3875_v6 = vld [vmem:[#allocation6 + $0x30] ss:$12 sps:$4 sm:$0xff]   ;;  %v3876_v7 = vld [vmem:[#allocation6 + $0x4c] ss:$12 sps:$4 sm:$0xff]  }
  0x5f   :  { %441 = vmatprep.subr.bf16.mxu0 %v3870_v3  ;;  %v3885_v8 = vld [vmem:[#allocation6 + $0x8] ss:$12 sps:$4 sm:$0xff]   ;;  %v3889_v10 = vld [vmem:[#allocation6 + $0x20] ss:$12 sps:$4 sm:$0xff]   ;;  %v3879_v11 = vld [vmem:[#allocation6 + $0x64] ss:$12 sps:$4 sm:$0xff]  }
  0x60   :  { %v3878_v9 = vld [vmem:[#allocation6 + $0x48] ss:$12 sps:$4 sm:$0xff]   ;;  %3645 = vmatprep.subr.bf16.mxu1 %v3885_v8  ;;  %v3893_v12 = vld [vmem:[#allocation6 + $0x38] ss:$12 sps:$4 sm:$0xff]   ;;  %v3881_v13 = vld [vmem:[#allocation6 + $0x60] ss:$12 sps:$4 sm:$0xff]  }
  0x61   :  { %3646 = vmatpush3.bf16.msra.mxu1 %v3885_v8  ;;  %v3882_v14 = vld [vmem:[#allocation6 + $0x7c] ss:$12 sps:$4 sm:$0xff]   ;;  %v3894_v15 = vld [vmem:[#allocation3] sm:$0xff]   ;;  %v3890_v21 = vld [vmem:[#allocation6 + $0xac] ss:$12 sps:$4 sm:$0xff]   ;;  %v6892_v52 = vmov 0.0|0.0  }
  0x62   :  { %442 = vmatpush1.bf16.msra.mxu0 %v3872_v4  ;;  %3647 = vmatprep.subr.bf16.mxu1 %v3889_v10  ;;  %v3898_v16 = vld [vmem:[#allocation6 + $0x50] ss:$12 sps:$4 sm:$0xff]   ;;  %v3884_v17 = vld [vmem:[#allocation6 + $0x78] ss:$12 sps:$4 sm:$0xff]   ;;  %v3886_v18 = vld [vmem:[#allocation6 + $0x94] ss:$12 sps:$4 sm:$0xff]  }
  0x63   :  { %443 = vmatprep.subr.bf16.mxu0 %v3873_v5  ;;  %3661 = vmatprep.mubr.bf16.mxu1 %v3894_v15  ;;  %v3902_v19 = vld [vmem:[#allocation6 + $0x68] ss:$12 sps:$4 sm:$0xff]   ;;  %v3888_v20 = vld [vmem:[#allocation6 + $0x90] ss:$12 sps:$4 sm:$0xff]   ;;  %v3906_v22 = vld [vmem:[#allocation6 + $0x80] ss:$12 sps:$4 sm:$0xff]  }
  0x64   :  { %v3892_v23 = vld [vmem:[#allocation6 + $0xa8] ss:$12 sps:$4 sm:$0xff]   ;;  %v4738_v24 = vld [vmem:[#allocation8 + $0x4] ss:$24 sps:$4 sm:$0xff]   ;;  %v4740_v26 = vld [vmem:[#allocation8] ss:$24 sps:$4 sm:$0xff]  }
  0x65   :  { %3648 = vmatpush3.bf16.msra.mxu1 %v3889_v10  ;;  %v3910_v25 = vld [vmem:[#allocation6 + $0x98] ss:$12 sps:$4 sm:$0xff]   ;;  %v4742_v27 = vld [vmem:[#allocation8 + $0x34] ss:$24 sps:$4 sm:$0xff]   ;;  %v3914_v28 = vld [vmem:[#allocation6 + $0xb0] ss:$12 sps:$4 sm:$0xff]  }
  0x66   :  { %444 = vmatpush1.bf16.msra.mxu0 %v3875_v6  ;;  %3649 = vmatprep.subr.bf16.mxu1 %v3893_v12  ;;  %v4746_v29 = vld [vmem:[#allocation8 + $0x30] ss:$24 sps:$4 sm:$0xff]   ;;  %v4749_v30 = vld [vmem:[#allocation8 + $0x64] ss:$24 sps:$4 sm:$0xff]   ;;  %v4751_v32 = vld [vmem:[#allocation8 + $0x60] ss:$24 sps:$4 sm:$0xff]  }
  0x67   :  { %445 = vmatprep.subr.bf16.mxu0 %v3876_v7  ;;  %v3918_v31 = vld [vmem:[#allocation8 + $0xc] ss:$24 sps:$4 sm:$0xff]   ;;  %v4757_v35 = vld [vmem:[#allocation8 + $0x8] ss:$24 sps:$4 sm:$0xff]   ;;  %v4760_v36 = vld [vmem:[#allocation8 + $0x3c] ss:$24 sps:$4 sm:$0xff]  }
  0x68   :  { %v4754_v33 = vld [vmem:[#allocation8 + $0x94] ss:$24 sps:$4 sm:$0xff]   ;;  %v4762_v37 = vld [vmem:[#allocation8 + $0x90] ss:$24 sps:$4 sm:$0xff]   ;;  %v4764_v38 = vld [vmem:[#allocation8 + $0xc4] ss:$24 sps:$4 sm:$0xff]  }
  0x69   :  { %3650 = vmatpush3.bf16.msra.mxu1 %v3893_v12  ;;  %v4768_v39 = vld [vmem:[#allocation8 + $0x38] ss:$24 sps:$4 sm:$0xff]   ;;  %v4772_v40 = vld [vmem:[#allocation8 + $0x6c] ss:$24 sps:$4 sm:$0xff]   ;;  %v4781_v44 = vld [vmem:[#allocation8 + $0x68] ss:$24 sps:$4 sm:$0xff]  }
  0x6a   :  { %446 = vmatpush1.bf16.msra.mxu0 %v3878_v9  ;;  %3651 = vmatprep.subr.bf16.mxu1 %v3898_v16  ;;  %v4774_v41 = vld [vmem:[#allocation8 + $0xc0] ss:$24 sps:$4 sm:$0xff]   ;;  %v3954_v42 = vld [vmem:[#allocation3 + $0x10] sm:$0xff]   ;;  %v4789_v47 = vld [vmem:[#allocation8 + $0x124] ss:$24 sps:$4 sm:$0xff]   ;;  %vm4645_vm0 = vmmov 0  }
  0x6b   :  { %447 = vmatprep.subr.bf16.mxu0 %v3879_v11  ;;  %v4778_v43 = vld [vmem:[#allocation8 + $0xf4] ss:$24 sps:$4 sm:$0xff]   ;;  %v4787_v46 = vld [vmem:[#allocation8 + $0xf0] ss:$24 sps:$4 sm:$0xff]   ;;  %v3967_v49 = vld [vmem:[#allocation3 + $0x18] sm:$0xff]   ;;  %s4646_s4 = smov [#allocation12]  }
  0x6c   :  { %v4785_v45 = vld [vmem:[#allocation8 + $0x9c] ss:$24 sps:$4 sm:$0xff]   ;;  %v4793_v48 = vld [vmem:[#allocation8 + $0x98] ss:$24 sps:$4 sm:$0xff]   ;;  %v4797_v50 = vld [vmem:[#allocation8 + $0xcc] ss:$24 sps:$4 sm:$0xff]  }
  0x6d   :  { %3652 = vmatpush3.bf16.msra.mxu1 %v3898_v16  ;;  %v4800_v51 = vld [vmem:[#allocation8 + $0x120] ss:$24 sps:$4 sm:$0xff]   ;;  %v4808_v54 = vld [vmem:[#allocation8 + $0x154] ss:$24 sps:$4 sm:$0xff]   ;;  %v4813_v56 = vld [vmem:[#allocation8 + $0x150] ss:$24 sps:$4 sm:$0xff]  }
  0x6e   :  { %448 = vmatpush1.bf16.msra.mxu0 %v3881_v13  ;;  %3653 = vmatprep.subr.bf16.mxu1 %v3902_v19  ;;  %v4805_v53 = vld [vmem:[#allocation8 + $0xc8] ss:$24 sps:$4 sm:$0xff]   ;;  %v4811_v55 = vld [vmem:[#allocation8 + $0xfc] ss:$24 sps:$4 sm:$0xff]   ;;  %v4819_v58 = vld [vmem:[#allocation8 + $0xf8] ss:$24 sps:$4 sm:$0xff]  }
  0x6f   :  { %449 = vmatprep.subr.bf16.mxu0 %v3882_v14  ;;  %v4816_v57 = vld [vmem:[#allocation8 + $0x184] ss:$24 sps:$4 sm:$0xff]   ;;  %v4826_v60 = vld [vmem:[#allocation8 + $0x180] ss:$24 sps:$4 sm:$0xff]   ;;  %v4829_v61 = vld [vmem:[#allocation8 + $0x1b4] ss:$24 sps:$4 sm:$0xff]  }
  0x70   :  { %v4823_v59 = vld [vmem:[#allocation8 + $0x12c] ss:$24 sps:$4 sm:$0xff]   ;;  %v4832_v62 = vld [vmem:[#allocation8 + $0x128] ss:$24 sps:$4 sm:$0xff]   ;;  %v4836_v63 = vld [vmem:[#allocation8 + $0x15c] ss:$24 sps:$4 sm:$0xff]  }
  0x71   :  { %3654 = vmatpush3.bf16.msra.mxu1 %v3902_v19  ;;  %v4838_v1 = vld [vmem:[#allocation8 + $0x1b0] ss:$24 sps:$4 sm:$0xff]   ;;  %v4842_v3 = vld [vmem:[#allocation8 + $0x1e4] ss:$24 sps:$4 sm:$0xff]   ;;  %v4850_v5 = vld [vmem:[#allocation8 + $0x1e0] ss:$24 sps:$4 sm:$0xff]  }
  0x72   :  { %450 = vmatpush1.bf16.msra.mxu0 %v3884_v17  ;;  %3655 = vmatprep.subr.bf16.mxu1 %v3906_v22  ;;  %v4840_v2 = vld [vmem:[#allocation8 + $0x158] ss:$24 sps:$4 sm:$0xff]   ;;  %v4844_v4 = vld [vmem:[#allocation8 + $0x18c] ss:$24 sps:$4 sm:$0xff]   ;;  %v4852_v6 = vld [vmem:[#allocation8 + $0x188] ss:$24 sps:$4 sm:$0xff]  }
  0x73   :  { %451 = vmatprep.subr.bf16.mxu0 %v3886_v18  ;;  %v4854_v7 = vld [vmem:[#allocation8 + $0x214] ss:$24 sps:$4 sm:$0xff]   ;;  %v4862_v9 = vld [vmem:[#allocation8 + $0x210] ss:$24 sps:$4 sm:$0xff]   ;;  %v4866_v11 = vld [vmem:[#allocation8 + $0x244] ss:$24 sps:$4 sm:$0xff]  }
  0x74   :  { %v4856_v8 = vld [vmem:[#allocation8 + $0x1bc] ss:$24 sps:$4 sm:$0xff]   ;;  %v4864_v10 = vld [vmem:[#allocation8 + $0x1b8] ss:$24 sps:$4 sm:$0xff]   ;;  %v4868_v12 = vld [vmem:[#allocation8 + $0x1ec] ss:$24 sps:$4 sm:$0xff]  }
  0x75   :  { %3656 = vmatpush3.bf16.msra.mxu1 %v3906_v22  ;;  %v4874_v13 = vld [vmem:[#allocation8 + $0x240] ss:$24 sps:$4 sm:$0xff]   ;;  %v4880_v16 = vld [vmem:[#allocation8 + $0x21c] ss:$24 sps:$4 sm:$0xff]   ;;  %v4886_v17 = vld [vmem:[#allocation8 + $0x270] ss:$24 sps:$4 sm:$0xff]  }
  0x76   :  { %452 = vmatpush1.bf16.msra.mxu0 %v3888_v20  ;;  %3657 = vmatprep.subr.bf16.mxu1 %v3910_v25  ;;  %v4876_v14 = vld [vmem:[#allocation8 + $0x1e8] ss:$24 sps:$4 sm:$0xff]   ;;  %v4888_v18 = vld [vmem:[#allocation8 + $0x218] ss:$24 sps:$4 sm:$0xff]   ;;  %v4890_v19 = vld [vmem:[#allocation8 + $0x2a4] ss:$24 sps:$4 sm:$0xff]  }
  0x77   :  { %453 = vmatprep.subr.bf16.mxu0 %v3890_v21  ;;  %7263 = vst [vmem:[#allocation17_spill] sm:$0xff] %v4888_v18  ;;  %v4892_v20 = vld [vmem:[#allocation8 + $0x24c] ss:$24 sps:$4 sm:$0xff]   ;;  %v4898_v21 = vld [vmem:[#allocation8 + $0x2a0] ss:$24 sps:$4 sm:$0xff]   ;;  %s3353_s30 = sshll.u32 %s4646_s4, 4  ;;  %s3354_s30 = int_to_ptr.vmem [resolvable:$true] %s3353_s30 }
  0x78   :  { %7264 = vst [vmem:[#allocation18_spill] sm:$0xff] %v4892_v20  ;;  %v4900_v22 = vld [vmem:[#allocation8 + $0x248] ss:$24 sps:$4 sm:$0xff]   ;;  %s4599_s6 = scalar_lea.vmem %s3354_s30, 128  ;;  %p4604_p13 = scmp.lt.s32.totalorder %s3354_s30, %s3354_s30 }
  0x79   :  { %3658 = vmatpush3.bf16.msra.mxu1 %v3910_v25  ;;  %7265 = vst [vmem:[#allocation19_spill] sm:$0xff] %v4900_v22  ;;  %v4904_v25 = vld [vmem:[#allocation8 + $0x27c] ss:$24 sps:$4 sm:$0xff]   ;;  %p4600_p12 = scmp.ne.s32.totalorder %s3354_s30, %s4599_s6  ;;  %p4605_p0 = scmp.lt.s32.totalorder %s4599_s6, %s4599_s6 }
  0x7a   :  { %454 = vmatpush1.bf16.msra.mxu0 %v3892_v23  ;;  %3659 = vmatprep.subr.bf16.mxu1 %v3914_v28  ;;  %v4902_v23 = vld [vmem:[#allocation8 + $0x2d4] ss:$24 sps:$4 sm:$0xff]   ;;  %7266 = vst [vmem:[#allocation20_spill] sm:$0xff] %v4904_v25 }
  0x7b   :  { %1082 = vmatprep.subr.bf16.mxu0 %v4738_v24  ;;  %p4606_p1 = por %p4605_p0, %p4604_p13 }
  0x7d   :  { %472 = vmatmul.mubr.bf16.vlgmr.msra.gmra.mrb[0].mxu0 %v3894_v15  ;;  %3660 = vmatpush3.bf16.msra.mxu1 %v3914_v28  ;;  %v4878_v15 = vld [vmem:[#allocation8 + $0x274] ss:$24 sps:$4 sm:$0xff]   ;;  %v4910_v28 = vld [vmem:[#allocation8 + $0x2d0] ss:$24 sps:$4 sm:$0xff]   ;;  %p4607_p2 = pnand %p4606_p1, %p4600_p12 }
  0x7e   :  { %1083 = vmatpush1.bf16.msra.mxu0 %v4740_v26  ;;  %481 = vmatprep.mubr.bf16.mxu0 %v6882_v0 }
  0x7f   :  { %1084 = vmatprep.subr.bf16.mxu0 %v4742_v27  ;;  %1123 = vmatprep.subr.bf16.mxu1 %v3918_v31  ;;  %v4912_v31 = vld [vmem:[#allocation8 + $0x278] ss:$24 sps:$4 sm:$0xff]  }
  0x80   :  { %3662 = vmatmul.mubr.bf16.vlgmr.msra.gmra.mrb[0].mxu1 %v3920_v34  ;;  %7267 = vst [vmem:[#allocation21_spill] sm:$0xff] %v4912_v31 }
  0x81   :  { %1124 = vmatpush1.bf16.msra.mxu1 %v4757_v35  ;;  %3665 = vmatprep.mubr.bf16.mxu1 %v3954_v42 }
  0x82   :  { %1085 = vmatpush1.bf16.msra.mxu0 %v4746_v29  ;;  %1125 = vmatprep.subr.bf16.mxu1 %v4760_v36 }
  0x83   :  { %1086 = vmatprep.subr.bf16.mxu0 %v4749_v30 }
  0x85   :  { %482 = vmatmul.mubr.bf16.gmra.mrb[4].mxu0 %v3920_v34  ;;  %1126 = vmatpush1.bf16.msra.mxu1 %v4768_v39  ;;  %v4918_v34 = vld [vmem:[#allocation8 + $0x2ac] ss:$24 sps:$4 sm:$0xff]  }
  0x86   :  { %1087 = vmatpush1.bf16.msra.mxu0 %v4751_v32  ;;  %491 = vmatprep.mubr.bf16.mxu0 %v6882_v0  ;;  %7268 = vst [vmem:[#allocation22_spill] sm:$0xff] %v4918_v34 }
  0x87   :  { %1088 = vmatprep.subr.bf16.mxu0 %v4754_v33  ;;  %1127 = vmatprep.subr.bf16.mxu1 %v4772_v40 }
  0x88   :  { %3666 = vmatmul.mubr.bf16.gmra.mrb[4].mxu1 %v3967_v49 }
  0x89   :  { %1128 = vmatpush1.bf16.msra.mxu1 %v4781_v44  ;;  %1155 = vmatprep.mubr.bf16.mxu1 %v6892_v52 }
  0x8a   :  { %1089 = vmatpush1.bf16.msra.mxu0 %v4762_v37  ;;  %1129 = vmatprep.subr.bf16.mxu1 %v4785_v45 }
  0x8b   :  { %1090 = vmatprep.subr.bf16.mxu0 %v4764_v38 }
  0x8d   :  { %492 = vmatmul.mubr.bf16.gmra.mrb[8].mxu0 %v3954_v42  ;;  %1130 = vmatpush1.bf16.msra.mxu1 %v4793_v48  ;;  %v4922_v42 = vld [vmem:[#allocation8 + $0x2a8] ss:$24 sps:$4 sm:$0xff]  }
  0x8e   :  { %1091 = vmatpush1.bf16.msra.mxu0 %v4774_v41  ;;  %501 = vmatprep.mubr.bf16.mxu0 %v6882_v0  ;;  %7269 = vst [vmem:[#allocation23_spill] sm:$0xff] %v4922_v42  ;;  %v4929_v0 = vld [vmem:[#allocation8 + $0x2d8] ss:$24 sps:$4 sm:$0xff]  }
  0x8f   :  { %1092 = vmatprep.subr.bf16.mxu0 %v4778_v43  ;;  %1131 = vmatprep.subr.bf16.mxu1 %v4797_v50  ;;  %7271 = vst [vmem:[#allocation25_spill] sm:$0xff] %v4929_v0 }
  0x91   :  { %1132 = vmatpush1.bf16.msra.mxu1 %v4805_v53 }
  0x92   :  { %1093 = vmatpush1.bf16.msra.mxu0 %v4787_v46  ;;  %1133 = vmatprep.subr.bf16.mxu1 %v4811_v55 }
  0x93   :  { %1094 = vmatprep.subr.bf16.mxu0 %v4789_v47 }
  0x95   :  { %502 = vmatmul.mubr.bf16.gmra.mrb[12].mxu0 %v3967_v49  ;;  %1134 = vmatpush1.bf16.msra.mxu1 %v4819_v58  ;;  %v4925_v49 = vld [vmem:[#allocation8 + $0x2dc] ss:$24 sps:$4 sm:$0xff]  }
  0x96   :  { %1095 = vmatpush1.bf16.msra.mxu0 %v4800_v51  ;;  %1114 = vmatprep.mubr.bf16.mxu0 %v6892_v52  ;;  %7270 = vst [vmem:[#allocation24_spill] sm:$0xff] %v4925_v49 }
  0x97   :  { %1096 = vmatprep.subr.bf16.mxu0 %v4808_v54  ;;  %1135 = vmatprep.subr.bf16.mxu1 %v4823_v59 }
  0x99   :  { %1136 = vmatpush1.bf16.msra.mxu1 %v4832_v62 }
  0x9a   :  { %1097 = vmatpush1.bf16.msra.mxu0 %v4813_v56  ;;  %1137 = vmatprep.subr.bf16.mxu1 %v4836_v63 }
  0x9b   :  { %1098 = vmatprep.subr.bf16.mxu0 %v4816_v57 }
  0x9d   :  { %1138 = vmatpush1.bf16.msra.mxu1 %v4840_v2 }
  0x9e   :  { %1099 = vmatpush1.bf16.msra.mxu0 %v4826_v60  ;;  %1139 = vmatprep.subr.bf16.mxu1 %v4844_v4 }
  0x9f   :  { %1100 = vmatprep.subr.bf16.mxu0 %v4829_v61 }
  0xa1   :  { %1140 = vmatpush1.bf16.msra.mxu1 %v4852_v6 }
  0xa2   :  { %1101 = vmatpush1.bf16.msra.mxu0 %v4838_v1  ;;  %1141 = vmatprep.subr.bf16.mxu1 %v4856_v8 }
  0xa3   :  { %1102 = vmatprep.subr.bf16.mxu0 %v4842_v3 }
  0xa5   :  { %1142 = vmatpush1.bf16.msra.mxu1 %v4864_v10 }
  0xa6   :  { %1103 = vmatpush1.bf16.msra.mxu0 %v4850_v5  ;;  %1143 = vmatprep.subr.bf16.mxu1 %v4868_v12 }
  0xa7   :  { %1104 = vmatprep.subr.bf16.mxu0 %v4854_v7 }
  0xa9   :  { %1144 = vmatpush1.bf16.msra.mxu1 %v4876_v14 }
  0xaa   :  { %1105 = vmatpush1.bf16.msra.mxu0 %v4862_v9  ;;  %1145 = vmatprep.subr.bf16.mxu1 %v4880_v16 }
  0xab   :  { %1106 = vmatprep.subr.bf16.mxu0 %v4866_v11 }
  0xad   :  { %1146 = vmatpush1.bf16.msra.mxu1 %v4888_v18  ;;  %v5036_v18 = vld [vmem:[#allocation8 + $0x254] ss:$24 sps:$4 sm:$0xff]  }
  0xae   :  { %1107 = vmatpush1.bf16.msra.mxu0 %v4874_v13  ;;  %1147 = vmatprep.subr.bf16.mxu1 %v4892_v20  ;;  %v4946_v20 = vld [vmem:[#allocation8 + $0x74] ss:$24 sps:$4 sm:$0xff]   ;;  %7306 = vst [vmem:[#allocation59_spill] sm:$0xff] %v5036_v18 }
  0xaf   :  { %1108 = vmatprep.subr.bf16.mxu0 %v4878_v15  ;;  %7276 = vst [vmem:[#allocation29_spill] sm:$0xff] %v4946_v20 }
  0xb1   :  { %1148 = vmatpush1.bf16.msra.mxu1 %v4900_v22  ;;  %v4944_v22 = vld [vmem:[#allocation8 + $0x40] ss:$24 sps:$4 sm:$0xff]  }
  0xb2   :  { %1109 = vmatpush1.bf16.msra.mxu0 %v4886_v17  ;;  %1149 = vmatprep.subr.bf16.mxu1 %v4904_v25  ;;  %v4936_v25 = vld [vmem:[#allocation8 + $0x14] ss:$24 sps:$4 sm:$0xff]   ;;  %7275 = vst [vmem:[#allocation28_spill] sm:$0xff] %v4944_v22 }
  0xb3   :  { %1110 = vmatprep.subr.bf16.mxu0 %v4890_v19 }
  0xb5   :  { %1150 = vmatpush1.bf16.msra.mxu1 %v4912_v31  ;;  %v7272_v31 = vmov 0  }
  0xb6   :  { %1111 = vmatpush1.bf16.msra.mxu0 %v4898_v21  ;;  %1151 = vmatprep.subr.bf16.mxu1 %v4918_v34  ;;  %v4938_v34 = vld [vmem:[#allocation8 + $0x10] ss:$24 sps:$4 sm:$0xff]  }
  0xb7   :  { %1112 = vmatprep.subr.bf16.mxu0 %v4902_v23  ;;  %7273 = vst [vmem:[#allocation26_spill] sm:$0xff] %v4938_v34 }
  0xb9   :  { %1152 = vmatpush1.bf16.msra.mxu1 %v4922_v42  ;;  %v4942_v42 = vld [vmem:[#allocation8 + $0x44] ss:$24 sps:$4 sm:$0xff]  }
  0xba   :  { %1113 = vmatpush1.bf16.msra.mxu0 %v4910_v28  ;;  %1153 = vmatprep.subr.bf16.mxu1 %v4925_v49  ;;  %7274 = vst [vmem:[#allocation27_spill] sm:$0xff] %v4942_v42  ;;  %v4962_v49 = vld [vmem:[#allocation8 + $0xd0] ss:$24 sps:$4 sm:$0xff]  }
  0xbb   :  { %1164 = vmatprep.subr.bf16.mxu0 %v4936_v25  ;;  %7281 = vst [vmem:[#allocation34_spill] sm:$0xff] %v4962_v49 }
  0xbd   :  { %1115 = vmatmul.mubr.bf16.vlgmr.msra.gmra.mrb[16].mxu0 %v6892_v52  ;;  %1154 = vmatpush1.bf16.msra.mxu1 %v4929_v0  ;;  %v4956_v0 = vld [vmem:[#allocation8 + $0xa0] ss:$24 sps:$4 sm:$0xff]  }
  0xbe   :  { %1196 = vmatprep.mubr.bf16.mxu0 %v6892_v52  ;;  %1165 = vmatpush1.bf16.msra.mxu0 %v4938_v34  ;;  %7279 = vst [vmem:[#allocation32_spill] sm:$0xff] %v4956_v0  ;;  %v4960_v34 = vld [vmem:[#allocation8 + $0xd4] ss:$24 sps:$4 sm:$0xff]  }
  0xbf   :  { %1166 = vmatprep.subr.bf16.mxu0 %v4942_v42  ;;  %7280 = vst [vmem:[#allocation33_spill] sm:$0xff] %v4960_v34  ;;  %v4984_v42 = vld [vmem:[#allocation9] ss:$16 sps:$4 sm:$0xff]  }
  0xc0   :  { %1156 = vmatmul.mubr.bf16.vlgmr.msra.gmra.mrb[8].mxu1 %v6892_v52  ;;  %v4950_v52 = vld [vmem:[#allocation8 + $0x70] ss:$24 sps:$4 sm:$0xff]   ;;  %7289 = vst [vmem:[#allocation42_spill] sm:$0xff] %v4984_v42 }
  0xc1   :  { %1407 = vmatprep.mubr.bf16.mxu1 %v7272_v31  ;;  %7277 = vst [vmem:[#allocation30_spill] sm:$0xff] %v4950_v52  ;;  %v4954_v31 = vld [vmem:[#allocation8 + $0xa4] ss:$24 sps:$4 sm:$0xff]  }
  0xc2   :  { %1167 = vmatpush1.bf16.msra.mxu0 %v4944_v22  ;;  %7278 = vst [vmem:[#allocation31_spill] sm:$0xff] %v4954_v31  ;;  %v4966_v22 = vld [vmem:[#allocation8 + $0x104] ss:$24 sps:$4 sm:$0xff]  }
  0xc3   :  { %1168 = vmatprep.subr.bf16.mxu0 %v4946_v20  ;;  %7282 = vst [vmem:[#allocation35_spill] sm:$0xff] %v4966_v22  ;;  %v4968_v20 = vld [vmem:[#allocation8 + $0x100] ss:$24 sps:$4 sm:$0xff]  }
  0xc4   :  { %7283 = vst [vmem:[#allocation36_spill] sm:$0xff] %v4968_v20 }
  0xc6   :  { %1169 = vmatpush1.bf16.msra.mxu0 %v4950_v52  ;;  %v4972_v52 = vld [vmem:[#allocation8 + $0x134] ss:$24 sps:$4 sm:$0xff]  }
  0xc7   :  { %1170 = vmatprep.subr.bf16.mxu0 %v4954_v31  ;;  %7284 = vst [vmem:[#allocation37_spill] sm:$0xff] %v4972_v52  ;;  %v4974_v31 = vld [vmem:[#allocation8 + $0x130] ss:$24 sps:$4 sm:$0xff]  }
  0xc8   :  { %7285 = vst [vmem:[#allocation38_spill] sm:$0xff] %v4974_v31 }
  0xca   :  { %1171 = vmatpush1.bf16.msra.mxu0 %v4956_v0  ;;  %v4978_v0 = vld [vmem:[#allocation8 + $0x164] ss:$24 sps:$4 sm:$0xff]  }
  0xcb   :  { %1172 = vmatprep.subr.bf16.mxu0 %v4960_v34  ;;  %7286 = vst [vmem:[#allocation39_spill] sm:$0xff] %v4978_v0  ;;  %v4980_v34 = vld [vmem:[#allocation9 + $0x4] ss:$16 sps:$4 sm:$0xff]  }
  0xcc   :  { %7287 = vst [vmem:[#allocation40_spill] sm:$0xff] %v4980_v34  ;;  %1375 = vmatprep.subr.bf16.mxu1 %v4980_v34  ;;  %v5008_v34 = vld [vmem:[#allocation9 + $0x40] ss:$16 sps:$4 sm:$0xff]  }
  0xcd   :  { %1376 = vmatpush1.bf16.msra.mxu1 %v4984_v42  ;;  %v5006_v42 = vld [vmem:[#allocation8 + $0x1c0] ss:$24 sps:$4 sm:$0xff]   ;;  %7297 = vst [vmem:[#allocation50_spill] sm:$0xff] %v5008_v34 }
  0xce   :  { %1173 = vmatpush1.bf16.msra.mxu0 %v4962_v49  ;;  %v4982_v49 = vld [vmem:[#allocation8 + $0x160] ss:$24 sps:$4 sm:$0xff]   ;;  %7296 = vst [vmem:[#allocation49_spill] sm:$0xff] %v5006_v42 }
  0xcf   :  { %1174 = vmatprep.subr.bf16.mxu0 %v4966_v22  ;;  %7288 = vst [vmem:[#allocation41_spill] sm:$0xff] %v4982_v49  ;;  %v4996_v22 = vld [vmem:[#allocation9 + $0x20] ss:$16 sps:$4 sm:$0xff]  }
  0xd0   :  { %7293 = vst [vmem:[#allocation46_spill] sm:$0xff] %v4996_v22 }
  0xd2   :  { %1175 = vmatpush1.bf16.msra.mxu0 %v4968_v20  ;;  %v4990_v20 = vld [vmem:[#allocation8 + $0x194] ss:$24 sps:$4 sm:$0xff]  }
  0xd3   :  { %1176 = vmatprep.subr.bf16.mxu0 %v4972_v52  ;;  %7290 = vst [vmem:[#allocation43_spill] sm:$0xff] %v4990_v20  ;;  %v4992_v52 = vld [vmem:[#allocation9 + $0x24] ss:$16 sps:$4 sm:$0xff]  }
  0xd4   :  { %7291 = vst [vmem:[#allocation44_spill] sm:$0xff] %v4992_v52  ;;  %1377 = vmatprep.subr.bf16.mxu1 %v4992_v52  ;;  %v5020_v52 = vld [vmem:[#allocation9 + $0x60] ss:$16 sps:$4 sm:$0xff]  }
  0xd5   :  { %1378 = vmatpush1.bf16.msra.mxu1 %v4996_v22  ;;  %v5018_v22 = vld [vmem:[#allocation8 + $0x1f0] ss:$24 sps:$4 sm:$0xff]   ;;  %7301 = vst [vmem:[#allocation54_spill] sm:$0xff] %v5020_v52 }
  0xd6   :  { %1177 = vmatpush1.bf16.msra.mxu0 %v4974_v31  ;;  %v4994_v31 = vld [vmem:[#allocation8 + $0x190] ss:$24 sps:$4 sm:$0xff]   ;;  %7300 = vst [vmem:[#allocation53_spill] sm:$0xff] %v5018_v22 }
  0xd7   :  { %1178 = vmatprep.subr.bf16.mxu0 %v4978_v0  ;;  %7292 = vst [vmem:[#allocation45_spill] sm:$0xff] %v4994_v31  ;;  %v5002_v0 = vld [vmem:[#allocation8 + $0x1c4] ss:$24 sps:$4 sm:$0xff]  }
  0xd8   :  { %7294 = vst [vmem:[#allocation47_spill] sm:$0xff] %v5002_v0 }
  0xda   :  { %1179 = vmatpush1.bf16.msra.mxu0 %v4982_v49  ;;  %v5004_v49 = vld [vmem:[#allocation9 + $0x44] ss:$16 sps:$4 sm:$0xff]  }
  0xdb   :  { %1180 = vmatprep.subr.bf16.mxu0 %v4990_v20  ;;  %7295 = vst [vmem:[#allocation48_spill] sm:$0xff] %v5004_v49  ;;  %1379 = vmatprep.subr.bf16.mxu1 %v5004_v49  ;;  %v5014_v20 = vld [vmem:[#allocation8 + $0x1f4] ss:$24 sps:$4 sm:$0xff]   ;;  %v5032_v49 = vld [vmem:[#allocation9 + $0x80] ss:$16 sps:$4 sm:$0xff]  }
  0xdc   :  { %1380 = vmatpush1.bf16.msra.mxu1 %v5008_v34  ;;  %7298 = vst [vmem:[#allocation51_spill] sm:$0xff] %v5014_v20  ;;  %v5030_v34 = vld [vmem:[#allocation8 + $0x220] ss:$24 sps:$4 sm:$0xff]   ;;  %7305 = vst [vmem:[#allocation58_spill] sm:$0xff] %v5032_v49 }
  0xdd   :  { %7304 = vst [vmem:[#allocation57_spill] sm:$0xff] %v5030_v34 }
  0xde   :  { %1181 = vmatpush1.bf16.msra.mxu0 %v4994_v31  ;;  %v5016_v31 = vld [vmem:[#allocation9 + $0x64] ss:$16 sps:$4 sm:$0xff]  }
  0xdf   :  { %1182 = vmatprep.subr.bf16.mxu0 %v5002_v0  ;;  %7299 = vst [vmem:[#allocation52_spill] sm:$0xff] %v5016_v31  ;;  %1381 = vmatprep.subr.bf16.mxu1 %v5016_v31  ;;  %v5026_v0 = vld [vmem:[#allocation8 + $0x224] ss:$24 sps:$4 sm:$0xff]  }
  0xe0   :  { %1382 = vmatpush1.bf16.msra.mxu1 %v5020_v52  ;;  %7302 = vst [vmem:[#allocation55_spill] sm:$0xff] %v5026_v0  ;;  %v5044_v52 = vld [vmem:[#allocation9 + $0xa0] ss:$16 sps:$4 sm:$0xff]   ;;  %v5048_v31 = vld [vmem:[#allocation8 + $0x284] ss:$24 sps:$4 sm:$0xff]  }
  0xe1   :  { %7309 = vst [vmem:[#allocation62_spill] sm:$0xff] %v5044_v52  ;;  %7310 = vst [vmem:[#allocation63_spill] sm:$0xff] %v5048_v31 }
  0xe2   :  { %1183 = vmatpush1.bf16.msra.mxu0 %v5006_v42  ;;  %v5028_v42 = vld [vmem:[#allocation9 + $0x84] ss:$16 sps:$4 sm:$0xff]  }
  0xe3   :  { %1184 = vmatprep.subr.bf16.mxu0 %v5014_v20  ;;  %7303 = vst [vmem:[#allocation56_spill] sm:$0xff] %v5028_v42  ;;  %1383 = vmatprep.subr.bf16.mxu1 %v5028_v42  ;;  %v5038_v20 = vld [vmem:[#allocation9 + $0xa4] ss:$16 sps:$4 sm:$0xff]   ;;  %v5054_v42 = vld [vmem:[#allocation8 + $0x280] ss:$24 sps:$4 sm:$0xff]  }
  0xe4   :  { %7307 = vst [vmem:[#allocation60_spill] sm:$0xff] %v5038_v20  ;;  %1384 = vmatpush1.bf16.msra.mxu1 %v5032_v49  ;;  %7312 = vst [vmem:[#allocation65_spill] sm:$0xff] %v5054_v42  ;;  %v5060_v49 = vld [vmem:[#allocation8 + $0x2b4] ss:$24 sps:$4 sm:$0xff]  }
  0xe5   :  { %1385 = vmatprep.subr.bf16.mxu1 %v5038_v20  ;;  %7314 = vst [vmem:[#allocation67_spill] sm:$0xff] %v5060_v49  ;;  %v5066_v20 = vld [vmem:[#allocation8 + $0x2b0] ss:$24 sps:$4 sm:$0xff]  }
  0xe6   :  { %1185 = vmatpush1.bf16.msra.mxu0 %v5018_v22  ;;  %v5042_v22 = vld [vmem:[#allocation8 + $0x250] ss:$24 sps:$4 sm:$0xff]   ;;  %7316 = vst [vmem:[#allocation69_spill] sm:$0xff] %v5066_v20 }
  0xe7   :  { %1186 = vmatprep.subr.bf16.mxu0 %v5026_v0  ;;  %7308 = vst [vmem:[#allocation61_spill] sm:$0xff] %v5042_v22  ;;  %v5050_v0 = vld [vmem:[#allocation9 + $0xc4] ss:$16 sps:$4 sm:$0xff]  }
  0xe8   :  { %7311 = vst [vmem:[#allocation64_spill] sm:$0xff] %v5050_v0  ;;  %1386 = vmatpush1.bf16.msra.mxu1 %v5044_v52  ;;  %v5072_v52 = vld [vmem:[#allocation8 + $0x2e4] ss:$24 sps:$4 sm:$0xff]  }
  0xe9   :  { %1387 = vmatprep.subr.bf16.mxu1 %v5050_v0  ;;  %7318 = vst [vmem:[#allocation71_spill] sm:$0xff] %v5072_v52 }
  0xea   :  { %1187 = vmatpush1.bf16.msra.mxu0 %v5030_v34  ;;  %v5056_v34 = vld [vmem:[#allocation9 + $0xc0] ss:$16 sps:$4 sm:$0xff]  }
  0xeb   :  { %1188 = vmatprep.subr.bf16.mxu0 %v5036_v18  ;;  %7313 = vst [vmem:[#allocation66_spill] sm:$0xff] %v5056_v34  ;;  %v5062_v18 = vld [vmem:[#allocation9 + $0xe4] ss:$16 sps:$4 sm:$0xff]  }
  0xec   :  { %7315 = vst [vmem:[#allocation68_spill] sm:$0xff] %v5062_v18  ;;  %1388 = vmatpush1.bf16.msra.mxu1 %v5056_v34  ;;  %v275_v34 = vlaneseq }
  0xed   :  { %1389 = vmatprep.subr.bf16.mxu1 %v5062_v18 }
  0xee   :  { %1189 = vmatpush1.bf16.msra.mxu0 %v5042_v22  ;;  %v5068_v22 = vld [vmem:[#allocation9 + $0xe0] ss:$16 sps:$4 sm:$0xff]   ;;  %v5084_v18 = vshrl.u32 %v275_v34, 7 }
  0xef   :  { %1190 = vmatprep.subr.bf16.mxu0 %v5048_v31  ;;  %7317 = vst [vmem:[#allocation70_spill] sm:$0xff] %v5068_v22  ;;  %v5076_v31 = vld [vmem:[#allocation8 + $0x2e0] ss:$24 sps:$4 sm:$0xff]  }
  0xf0   :  { %1390 = vmatpush1.bf16.msra.mxu1 %v5068_v22  ;;  %7319 = vst [vmem:[#allocation72_spill] sm:$0xff] %v5076_v31 }
  0xf2   :  { %1191 = vmatpush1.bf16.msra.mxu0 %v5054_v42  ;;  %v6958_v42 = vmov 0.0  }
  0xf3   :  { %1192 = vmatprep.subr.bf16.mxu0 %v5060_v49  ;;  %3669 = vmatprep.subr.bf16.mxu1 %v6958_v42  ;;  %v7320_v49 = vmov 0.0|0.0   ;;  %v5090_v42 = vld [vmem:[#allocation11] sm:$0xff] }
  0xf6   :  { %1193 = vmatpush1.bf16.msra.mxu0 %v5066_v20 }
  0xf7   :  { %1194 = vmatprep.subr.bf16.mxu0 %v5072_v52  ;;  %v277_v52 = vsub.s32 0, %v5084_v18 }
  0xfa   :  { %1195 = vmatpush1.bf16.msra.mxu0 %v5076_v31 }
  0xfb   :  { %1483 = vmatprep.subr.bf16.mxu0 %v4738_v24  ;;  %v5094_v24 = vrot.slane %v5090_v42, %v277_v52 }
  0xfd   :  { %1197 = vmatmul.mubr.bf16.vlgmr.msra.gmra.mrb[20].mxu0 %v7320_v49  ;;  %v5096_v49 = vld [vmem:[#allocation11 + $0x8] sm:$0xff] }
  0xfe   :  { %1484 = vmatpush1.bf16.msra.mxu0 %v4740_v26 }
  0xff   :  { %1485 = vmatprep.subr.bf16.mxu0 %v4742_v27 }
 0x102   :  { %1486 = vmatpush1.bf16.msra.mxu0 %v4746_v29  ;;  %v5104_v29 = vrot.slane %v5096_v49, %v277_v52 }
 0x103   :  { %1487 = vmatprep.subr.bf16.mxu0 %v4749_v30  ;;  %v5106_v30 = vld [vmem:[#allocation11 + $0x10] sm:$0xff] }
 0x104   :  { %v5117_v20 = vrot.slane %v5106_v30, %v277_v52 }
 0x106   :  { %1488 = vmatpush1.bf16.msra.mxu0 %v4751_v32 }
 0x107   :  { %1489 = vmatprep.subr.bf16.mxu0 %v4754_v33 }
 0x10a   :  { %1490 = vmatpush1.bf16.msra.mxu0 %v4762_v37 }
 0x10b   :  { %1491 = vmatprep.subr.bf16.mxu0 %v4764_v38 }
 0x10e   :  { %1492 = vmatpush1.bf16.msra.mxu0 %v4774_v41 }
 0x10f   :  { %1493 = vmatprep.subr.bf16.mxu0 %v4778_v43 }
 0x112   :  { %1494 = vmatpush1.bf16.msra.mxu0 %v4787_v46 }
 0x113   :  { %1495 = vmatprep.subr.bf16.mxu0 %v4789_v47 }
 0x116   :  { %1496 = vmatpush1.bf16.msra.mxu0 %v4800_v51 }
 0x117   :  { %1497 = vmatprep.subr.bf16.mxu0 %v4808_v54 }
 0x11a   :  { %1498 = vmatpush1.bf16.msra.mxu0 %v4813_v56 }
 0x11b   :  { %1499 = vmatprep.subr.bf16.mxu0 %v4816_v57 }
 0x11e   :  { %1500 = vmatpush1.bf16.msra.mxu0 %v4826_v60 }
 0x11f   :  { %1501 = vmatprep.subr.bf16.mxu0 %v4829_v61 }
 0x122   :  { %1502 = vmatpush1.bf16.msra.mxu0 %v4838_v1 }
 0x123   :  { %1503 = vmatprep.subr.bf16.mxu0 %v4842_v3 }
 0x126   :  { %1504 = vmatpush1.bf16.msra.mxu0 %v4850_v5 }
 0x127   :  { %1505 = vmatprep.subr.bf16.mxu0 %v4854_v7 }
 0x12a   :  { %1506 = vmatpush1.bf16.msra.mxu0 %v4862_v9 }
 0x12b   :  { %1507 = vmatprep.subr.bf16.mxu0 %v4866_v11 }
 0x12e   :  { %1508 = vmatpush1.bf16.msra.mxu0 %v4874_v13 }
 0x12f   :  { %1509 = vmatprep.subr.bf16.mxu0 %v4878_v15 }
 0x132   :  { %1510 = vmatpush1.bf16.msra.mxu0 %v4886_v17 }
 0x133   :  { %1511 = vmatprep.subr.bf16.mxu0 %v4890_v19 }
 0x136   :  { %1512 = vmatpush1.bf16.msra.mxu0 %v4898_v21 }
 0x137   :  { %1513 = vmatprep.subr.bf16.mxu0 %v4902_v23 }
 0x13a   :  { %1514 = vmatpush1.bf16.msra.mxu0 %v4910_v28 }
 0x13b   :  { %1565 = vmatprep.subr.bf16.mxu0 %v4936_v25 }
 0x150   :  { %v5099_v26 = vpop.f32.mrb[0].mxu0 }
 0x151   :  { %v5101_v27 = vpop.f32.mrb[1].mxu0  ;;  %v474_v61 = vadd.f32 %v5099_v26, %v5094_v24  ;;  %v5209_v26 = vsub.s32 2, %v5084_v18 }
 0x152   :  { %v477_v34 = vpop.f32.mrb[2].mxu0  ;;  %v476_v1 = vadd.f32 %v5101_v27, %v5104_v29 }
 0x153   :  { %v5110_v32 = vadd.f32 %v477_v34, %v5094_v24  ;;  %v479_v31 = vpop.f32.mrb[3].mxu0  ;;  %v3663_v22 = vpop.f32.mrb[0].mxu1  ;;  %7341 = vst [vmem:[#allocation93_spill] sm:$0xff] %v5209_v26  ;;  %v5213_v27 = vrot.slane %v5090_v42, %v5209_v26 }
 0x154   :  { %v5114_v33 = vadd.f32 %v479_v31, %v5104_v29  ;;  %v5122_v37 = vadd.f32 %v3663_v22, %v5117_v20  ;;  %v5124_v34 = vpop.f32.mrb[1].mxu1 }
 0x155   :  { %7321 = vst [vmem:[#allocation73_spill] sm:$0xff] %v5110_v32  ;;  %v3664_v31 = vpop.f32.mrb[2].mxu1 }
 0x156   :  { %7322 = vst [vmem:[#allocation74_spill] sm:$0xff] %v5114_v33  ;;  %7323 = vst [vmem:[#allocation75_spill] sm:$0xff] %v5122_v37  ;;  %v5134_v41 = vadd.f32 %v3664_v31, %v5117_v20  ;;  %v549_v43 = vpop.f32.mrb[3].mxu1 }
 0x158   :  { %v483_v0 = vpop.f32.mrb[4].mxu0  ;;  %7326 = vst [vmem:[#allocation78_spill] sm:$0xff] %v5134_v41 }
 0x159   :  { %v5127_v32 = vadd.f32 %v483_v0, %v5094_v24  ;;  %v485_v38 = vpop.f32.mrb[5].mxu0  ;;  %v5141_v0 = vadd.f32 %v549_v43, %v5117_v20 }
 0x15a   :  { %v5130_v33 = vadd.f32 %v485_v38, %v5104_v29  ;;  %v487_v52 = vpop.f32.mrb[6].mxu0 }
 0x15b   :  { %7324 = vst [vmem:[#allocation76_spill] sm:$0xff] %v5127_v32  ;;  %v5137_v22 = vadd.f32 %v487_v52, %v5094_v24  ;;  %v489_v37 = vpop.f32.mrb[7].mxu0  ;;  %v3667_v43 = vpop.f32.mrb[4].mxu1 }
 0x15c   :  { %7325 = vst [vmem:[#allocation77_spill] sm:$0xff] %v5130_v33  ;;  %v5144_v32 = vadd.f32 %v489_v37, %v5104_v29  ;;  %v5163_v54 = vadd.f32 %v3667_v43, %v5117_v20  ;;  %v5398_v33 = vld [vmem:[#allocation8 + $0xf4] ss:$24 sps:$4 sm:$0xff]  }
 0x15d   :  { %7327 = vst [vmem:[#allocation79_spill] sm:$0xff] %v5137_v22  ;;  %v5395_v22 = vld [vmem:[#allocation8 + $0xc0] ss:$24 sps:$4 sm:$0xff]  }
 0x15e   :  { %7328 = vst [vmem:[#allocation80_spill] sm:$0xff] %v5144_v32  ;;  %7333 = vst [vmem:[#allocation85_spill] sm:$0xff] %v5163_v54  ;;  %v5392_v32 = vld [vmem:[#allocation8 + $0xc4] ss:$24 sps:$4 sm:$0xff]  }
 0x160   :  { %v493_v46 = vpop.f32.mrb[8].mxu0 }
 0x161   :  { %v5149_v38 = vadd.f32 %v493_v46, %v5094_v24  ;;  %v495_v31 = vpop.f32.mrb[9].mxu0  ;;  %v562_v46 = vpop.f32.mrb[5].mxu1 }
 0x162   :  { %v5152_v52 = vadd.f32 %v495_v31, %v5104_v29  ;;  %v497_v41 = vpop.f32.mrb[10].mxu0  ;;  %v5166_v31 = vadd.f32 %v562_v46, %v5117_v20 }
 0x163   :  { %7329 = vst [vmem:[#allocation81_spill] sm:$0xff] %v5149_v38  ;;  %v5156_v47 = vadd.f32 %v497_v41, %v5094_v24  ;;  %v499_v37 = vpop.f32.mrb[11].mxu0  ;;  %v5389_v38 = vld [vmem:[#allocation8 + $0x90] ss:$24 sps:$4 sm:$0xff]  }
 0x164   :  { %7330 = vst [vmem:[#allocation82_spill] sm:$0xff] %v5152_v52  ;;  %v5160_v51 = vadd.f32 %v499_v37, %v5104_v29  ;;  %7334 = vst [vmem:[#allocation86_spill] sm:$0xff] %v5166_v31  ;;  %v3668_v52 = vpop.f32.mrb[6].mxu1  ;;  %v5383_v31 = vld [vmem:[#allocation8 + $0x60] ss:$24 sps:$4 sm:$0xff]  }
 0x165   :  { %7331 = vst [vmem:[#allocation83_spill] sm:$0xff] %v5156_v47  ;;  %v5169_v56 = vadd.f32 %v3668_v52, %v5117_v20  ;;  %v565_v41 = vpop.f32.mrb[7].mxu1 }
 0x166   :  { %7332 = vst [vmem:[#allocation84_spill] sm:$0xff] %v5160_v51  ;;  %v5173_v47 = vadd.f32 %v565_v41, %v5117_v20  ;;  %v7396_v51 = vld [vmem:[#allocation65_spill] sm:$0xff] }
 0x167   :  { %7335 = vst [vmem:[#allocation87_spill] sm:$0xff] %v5169_v56 }
 0x168   :  { %7336 = vst [vmem:[#allocation88_spill] sm:$0xff] %v5173_v47  ;;  %v503_v57 = vpop.f32.mrb[12].mxu0  ;;  %v7395_v47 = vld [vmem:[#allocation63_spill] sm:$0xff] }
 0x169   :  { %v5177_v37 = vadd.f32 %v503_v57, %v5094_v24  ;;  %v505_v43 = vpop.f32.mrb[13].mxu0 }
 0x16a   :  { %v5180_v46 = vadd.f32 %v505_v43, %v5104_v29  ;;  %v507_v54 = vpop.f32.mrb[14].mxu0 }
 0x16b   :  { %7337 = vst [vmem:[#allocation89_spill] sm:$0xff] %v5177_v37  ;;  %v5184_v52 = vadd.f32 %v507_v54, %v5094_v24  ;;  %v509_v60 = vpop.f32.mrb[15].mxu0 }
 0x16c   :  { %7338 = vst [vmem:[#allocation90_spill] sm:$0xff] %v5180_v46  ;;  %v5188_v41 = vadd.f32 %v509_v60, %v5104_v29 }
 0x16d   :  { %7339 = vst [vmem:[#allocation91_spill] sm:$0xff] %v5184_v52 }
 0x16e   :  { %7340 = vst [vmem:[#allocation92_spill] sm:$0xff] %v5188_v41 }
 0x190   :  { %v1116_v3 = vpop.f32.mrb[16].mxu0 }
 0x191   :  { %v1208_v5 = vadd.f32 %v1116_v3, %v474_v61  ;;  %v1118_v7 = vpop.f32.mrb[17].mxu0 }
 0x192   :  { %v1215_v9 = vadd.f32 %v1118_v7, %v476_v1  ;;  %v1120_v54 = vpop.f32.mrb[18].mxu0 }
 0x193   :  { %v3488_v57 = vmul.f32 -1.442695, %v1208_v5  ;;  %v1121_v43 = vpop.f32.mrb[19].mxu0  ;;  %v1157_v56 = vpop.f32.mrb[8].mxu1 }
 0x194   :  { %v3489_v60 = vmul.f32 -1.442695, %v1215_v9  ;;  %v5206_v41 = vpop.f32.mrb[9].mxu1  ;;  %v1226_v1 = vadd.f32 %v5213_v27, %v1157_v56 }
 0x195   :  { %4087 = vpow2.f32 %v3488_v57  ;;  %v1161_v52 = vpop.f32.mrb[10].mxu1 }
 0x196   :  { %v1162_v46 = vpop.f32.mrb[11].mxu1  ;;  %4089 = vpow2.f32 %v3489_v60  ;;  %v547_v52 = vadd.f32 %v5124_v34, %v5117_v20  ;;  %v5220_v60 = vld [vmem:[#allocation9 + $0x8] ss:$16 sps:$4 sm:$0xff]   ;;  %v7342_v34 = vmov 0.0  }
 0x197   :  { %v5228_v20 = vld [vmem:[#allocation9 + $0x28] ss:$16 sps:$4 sm:$0xff]  }
 0x19f   :  { %v4088_v37 = vpop.eup %4087 }
 0x1a0   :  { %v1212_v24 = vadd.f32 1.0, %v4088_v37  ;;  %v4090_v29 = vpop.eup %4089 }
 0x1a1   :  { %v1219_v61 = vadd.f32 1.0, %v4090_v29  ;;  %v5238_v29 = vld [vmem:[#allocation9 + $0x68] ss:$16 sps:$4 sm:$0xff]  }
 0x1a2   :  { %4091 = vrcp.f32 %v1212_v24  ;;  %v5234_v24 = vld [vmem:[#allocation9 + $0x48] ss:$16 sps:$4 sm:$0xff]  }
 0x1a3   :  { %4093 = vrcp.f32 %v1219_v61  ;;  %v5242_v61 = vld [vmem:[#allocation9 + $0x88] ss:$16 sps:$4 sm:$0xff]  }
 0x1ac   :  { %v4092_v3 = vpop.eup %4091 }
 0x1ad   :  { %v1227_v46 = vmul.f32 %v4092_v3, %v1226_v1  ;;  %v4094_v37 = vpop.eup %4093  ;;  %v5246_v1 = vld [vmem:[#allocation9 + $0xa8] ss:$16 sps:$4 sm:$0xff]  }
 0x1ae   :  { %v1230_v7 = vsub.f32 1.0, %v4094_v37  ;;  %v1232_v54 = vmul.f32 0.0, %v4094_v37  ;;  %v5250_v3 = vld [vmem:[#allocation9 + $0xc8] ss:$16 sps:$4 sm:$0xff]  }
 0x1af   :  { %v1228_v5 = vadd.f32 %v1227_v46, %v547_v52  ;;  %v5254_v52 = vld [vmem:[#allocation9 + $0xe8] ss:$16 sps:$4 sm:$0xff]   ;;  %v5258_v46 = vld [vmem:[#allocation8 + $0xc] ss:$24 sps:$4 sm:$0xff]  }
 0x1b1   :  { %4095 = vtanh.f32 %v1228_v5 }
 0x1bb   :  { %v4096_v9 = vpop.eup %4095 }
 0x1bc   :  { %v1231_v57 = vmul.f32 %v4096_v9, %v1230_v7 }
 0x1be   :  { %v5218_v43 = vadd.f32 %v1232_v54, %v1231_v57  ;;  %v5306_v57 = vrot.slane %v5096_v49, %v5209_v26  ;;  %v7392_v26 = vld [vmem:[#allocation57_spill] sm:$0xff] }
 0x1c0   :  { %v5224_v56 = vpack.c.bf16 %v5218_v43, %v5218_v43 }
 0x1c2   :  { %1408 = vmatmul.mubr.bf16.vlgmr.msra.gmra.mrb[12].mxu1 %v5224_v56 }
 0x1c3   :  { %3670 = vmatpush3.bf16.msra.mxu1 %v5220_v60  ;;  %3685 = vmatprep.mubr.msk.bf16.mxu1 %vm4645_vm0, %v7342_v34 }
 0x1c4   :  { %3671 = vmatprep.subr.bf16.mxu1 %v7342_v34 }
 0x1c7   :  { %3672 = vmatpush3.bf16.msra.mxu1 %v5228_v20 }
 0x1c8   :  { %3673 = vmatprep.subr.bf16.mxu1 %v7342_v34 }
 0x1cb   :  { %3674 = vmatpush3.bf16.msra.mxu1 %v5234_v24 }
 0x1cc   :  { %3675 = vmatprep.subr.bf16.mxu1 %v7342_v34 }
 0x1cf   :  { %3676 = vmatpush3.bf16.msra.mxu1 %v5238_v29 }
 0x1d0   :  { %3677 = vmatprep.subr.bf16.mxu1 %v7342_v34 }
 0x1d3   :  { %3678 = vmatpush3.bf16.msra.mxu1 %v5242_v61 }
 0x1d4   :  { %3679 = vmatprep.subr.bf16.mxu1 %v7342_v34 }
 0x1d7   :  { %3680 = vmatpush3.bf16.msra.mxu1 %v5246_v1 }
 0x1d8   :  { %3681 = vmatprep.subr.bf16.mxu1 %v7342_v34 }
 0x1db   :  { %3682 = vmatpush3.bf16.msra.mxu1 %v5250_v3 }
 0x1dc   :  { %3683 = vmatprep.subr.bf16.mxu1 %v7342_v34 }
 0x1df   :  { %3684 = vmatpush3.bf16.msra.mxu1 %v5254_v52 }
 0x1e0   :  { %1524 = vmatprep.subr.bf16.mxu1 %v5258_v46 }
 0x1e2   :  { %3686 = vmatmul.mubr.bf16.vlgmr.msra.gmra.mrb[16].mxu1 %v5224_v56 }
 0x1e3   :  { %1525 = vmatpush1.bf16.msra.mxu1 %v4757_v35  ;;  %v7343_v35 = vld [vmem:[#allocation17_spill] sm:$0xff] }
 0x1e4   :  { %1526 = vmatprep.subr.bf16.mxu1 %v4760_v36  ;;  %v7344_v36 = vld [vmem:[#allocation18_spill] sm:$0xff] }
 0x1e7   :  { %1527 = vmatpush1.bf16.msra.mxu1 %v4768_v39  ;;  %v7345_v39 = vld [vmem:[#allocation19_spill] sm:$0xff] }
 0x1e8   :  { %1528 = vmatprep.subr.bf16.mxu1 %v4772_v40  ;;  %v7346_v40 = vld [vmem:[#allocation20_spill] sm:$0xff] }
 0x1eb   :  { %1529 = vmatpush1.bf16.msra.mxu1 %v4781_v44  ;;  %v7347_v44 = vld [vmem:[#allocation21_spill] sm:$0xff] }
 0x1ec   :  { %1530 = vmatprep.subr.bf16.mxu1 %v4785_v45  ;;  %v7348_v45 = vld [vmem:[#allocation22_spill] sm:$0xff] }
 0x1ef   :  { %1531 = vmatpush1.bf16.msra.mxu1 %v4793_v48  ;;  %v1198_v48 = vpop.f32.mrb[20].mxu0 }
 0x1f0   :  { %1532 = vmatprep.subr.bf16.mxu1 %v4797_v50  ;;  %v7349_v50 = vld [vmem:[#allocation23_spill] sm:$0xff] }
 0x1f1   :  { %7406 = vst [vmem:[#allocation23_spill] sm:$0xff] %v5383_v31 }
 0x1f3   :  { %1533 = vmatpush1.bf16.msra.mxu1 %v4805_v53  ;;  %v7350_v53 = vld [vmem:[#allocation24_spill] sm:$0xff] }
 0x1f4   :  { %1534 = vmatprep.subr.bf16.mxu1 %v4811_v55  ;;  %v7351_v55 = vld [vmem:[#allocation25_spill] sm:$0xff] }
 0x1f5   :  { %7408 = vst [vmem:[#allocation25_spill] sm:$0xff] %v5389_v38 }
 0x1f7   :  { %1535 = vmatpush1.bf16.msra.mxu1 %v4819_v58  ;;  %v7352_v58 = vld [vmem:[#allocation40_spill] sm:$0xff] }
 0x1f8   :  { %1536 = vmatprep.subr.bf16.mxu1 %v4823_v59  ;;  %v1200_v59 = vpop.f32.mrb[21].mxu0  ;;  %7409 = vst [vmem:[#allocation40_spill] sm:$0xff] %v5392_v32 }
 0x1fb   :  { %1537 = vmatpush1.bf16.msra.mxu1 %v4832_v62  ;;  %v1202_v62 = vpop.f32.mrb[22].mxu0 }
 0x1fc   :  { %1538 = vmatprep.subr.bf16.mxu1 %v4836_v63  ;;  %v1203_v63 = vpop.f32.mrb[23].mxu0 }
 0x1ff   :  { %1539 = vmatpush1.bf16.msra.mxu1 %v4840_v2  ;;  %v1237_v2 = vsub.s32 1, %v5084_v18 }
 0x200   :  { %1540 = vmatprep.subr.bf16.mxu1 %v4844_v4 }
 0x201   :  { %v5296_v4 = vrot.slane %v5090_v42, %v1237_v2 }
 0x203   :  { %1541 = vmatpush1.bf16.msra.mxu1 %v4852_v6  ;;  %7353 = vst [vmem:[#allocation17_spill] sm:$0xff] %v5296_v4  ;;  %v5299_v6 = vrot.slane %v5096_v49, %v1237_v2 }
 0x204   :  { %1542 = vmatprep.subr.bf16.mxu1 %v4856_v8 }
 0x207   :  { %1543 = vmatpush1.bf16.msra.mxu1 %v4864_v10 }
 0x208   :  { %1544 = vmatprep.subr.bf16.mxu1 %v4868_v12 }
 0x20b   :  { %1545 = vmatpush1.bf16.msra.mxu1 %v4876_v14 }
 0x20c   :  { %1546 = vmatprep.subr.bf16.mxu1 %v4880_v16 }
 0x20f   :  { %1547 = vmatpush1.bf16.msra.mxu1 %v7343_v35 }
 0x210   :  { %1548 = vmatprep.subr.bf16.mxu1 %v7344_v36 }
 0x213   :  { %1549 = vmatpush1.bf16.msra.mxu1 %v7345_v39  ;;  %v1474_v39 = vadd.f32 %v5306_v57, %v1200_v59 }
 0x214   :  { %1550 = vmatprep.subr.bf16.mxu1 %v7346_v40  ;;  %v5310_v40 = vrot.slane %v5106_v30, %v1237_v2  ;;  %v7354_v2 = vld [vmem:[#allocation26_spill] sm:$0xff] }
 0x215   :  { %7410 = vst [vmem:[#allocation26_spill] sm:$0xff] %v5395_v22 }
 0x217   :  { %1551 = vmatpush1.bf16.msra.mxu1 %v7347_v44 }
 0x218   :  { %1552 = vmatprep.subr.bf16.mxu1 %v7348_v45 }
 0x21b   :  { %1553 = vmatpush1.bf16.msra.mxu1 %v7349_v50 }
 0x21c   :  { %1554 = vmatprep.subr.bf16.mxu1 %v7350_v53 }
 0x21f   :  { %1555 = vmatpush1.bf16.msra.mxu1 %v7351_v55 }
 0x220   :  { %1632 = vmatprep.subr.bf16.mxu1 %v7352_v58 }
 0x295   :  { %v1409_v8 = vpop.f32.mrb[12].mxu1 }
 0x296   :  { %v1410_v10 = vadd.f32 %v1409_v8, %v5296_v4  ;;  %v1411_v12 = vpop.f32.mrb[13].mxu1 }
 0x297   :  { %v1412_v14 = vadd.f32 %v1411_v12, %v5299_v6  ;;  %v1413_v16 = vpop.f32.mrb[14].mxu1 }
 0x298   :  { %v1456_v5 = vadd.f32 %v1410_v10, %v5206_v41  ;;  %v1414_v37 = vpop.f32.mrb[15].mxu1 }
 0x299   :  { %v1463_v7 = vadd.f32 %v1412_v14, %v1198_v48 }
 0x29a   :  { %v3514_v9 = vmul.f32 -1.442695, %v1456_v5 }
 0x29b   :  { %v3515_v18 = vmul.f32 -1.442695, %v1463_v7  ;;  %v7355_v7 = vld [vmem:[#allocation27_spill] sm:$0xff] }
 0x29c   :  { %4097 = vpow2.f32 %v3514_v9  ;;  %v7356_v9 = vld [vmem:[#allocation42_spill] sm:$0xff]  ;;  %7411 = vst [vmem:[#allocation27_spill] sm:$0xff] %v5398_v33 }
 0x29d   :  { %4099 = vpow2.f32 %v3515_v18  ;;  %v7357_v18 = vld [vmem:[#allocation44_spill] sm:$0xff] }
 0x2a6   :  { %v4098_v42 = vpop.eup %4097 }
 0x2a7   :  { %v1460_v54 = vadd.f32 1.0, %v4098_v42  ;;  %v4100_v35 = vpop.eup %4099  ;;  %v7358_v42 = vmov 0  }
 0x2a8   :  { %v1467_v36 = vadd.f32 1.0, %v4100_v35  ;;  %v7360_v35 = vld [vmem:[#allocation29_spill] sm:$0xff] }
 0x2a9   :  { %4101 = vrcp.f32 %v1460_v54  ;;  %v7359_v54 = vld [vmem:[#allocation28_spill] sm:$0xff] }
 0x2aa   :  { %4103 = vrcp.f32 %v1467_v36  ;;  %v7361_v36 = vld [vmem:[#allocation46_spill] sm:$0xff] }
 0x2b3   :  { %v4102_v41 = vpop.eup %4101 }
 0x2b4   :  { %v1475_v44 = vmul.f32 %v4102_v41, %v1474_v39  ;;  %v4104_v49 = vpop.eup %4103  ;;  %v7362_v39 = vld [vmem:[#allocation48_spill] sm:$0xff]  ;;  %v7363_v41 = vld [vmem:[#allocation30_spill] sm:$0xff] }
 0x2b5   :  { %v1450_v48 = vpop.f32.mrb[16].mxu1  ;;  %v1478_v14 = vsub.f32 1.0, %v4104_v49  ;;  %v1480_v37 = vmul.f32 0.0, %v4104_v49  ;;  %v7371_v49 = vld [vmem:[#allocation34_spill] sm:$0xff] }
 0x2b6   :  { %v1451_v62 = vadd.f32 %v1450_v48, %v5310_v40  ;;  %v3687_v63 = vpop.f32.mrb[17].mxu1  ;;  %v7365_v48 = vld [vmem:[#allocation50_spill] sm:$0xff] }
 0x2b7   :  { %v1453_v8 = vpop.f32.mrb[18].mxu1  ;;  %v7367_v63 = vld [vmem:[#allocation32_spill] sm:$0xff] }
 0x2b8   :  { %v1476_v10 = vadd.f32 %v1475_v44, %v1451_v62  ;;  %v3688_v12 = vpop.f32.mrb[19].mxu1  ;;  %v7364_v44 = vld [vmem:[#allocation31_spill] sm:$0xff]  ;;  %v7366_v62 = vld [vmem:[#allocation52_spill] sm:$0xff]  ;;  %v7368_v8 = vld [vmem:[#allocation33_spill] sm:$0xff] }
 0x2b9   :  { %v7370_v12 = vld [vmem:[#allocation56_spill] sm:$0xff] }
 0x2ba   :  { %4105 = vtanh.f32 %v1476_v10  ;;  %v7369_v10 = vld [vmem:[#allocation54_spill] sm:$0xff] }
 0x2c4   :  { %v4106_v16 = vpop.eup %4105 }
 0x2c5   :  { %v1479_v5 = vmul.f32 %v4106_v16, %v1478_v14  ;;  %v7372_v14 = vld [vmem:[#allocation35_spill] sm:$0xff]  ;;  %v7373_v16 = vld [vmem:[#allocation58_spill] sm:$0xff] }
 0x2c7   :  { %v5313_v59 = vadd.f32 %v1480_v37, %v1479_v5  ;;  %v7374_v5 = vld [vmem:[#allocation60_spill] sm:$0xff] }
 0x2c8   :  { %v7375_v37 = vld [vmem:[#allocation36_spill] sm:$0xff] }
 0x2c9   :  { %v1482_v30 = vpack.c.bf16 %v5313_v59, %v5313_v59 }
 0x2cb   :  { %1515 = vmatprep.mubr.bf16.mxu0 %v1482_v30  ;;  %1556 = vmatprep.mubr.bf16.mxu1 %v1482_v30 }
 0x2cc   :  { %1516 = vmatmul.mubr.bf16.vlgmr.msra.gmra.mrb[24].mxu0 %v5224_v56  ;;  %1557 = vmatmul.mubr.bf16.vlgmr.msra.gmra.mrb[20].mxu1 %v5224_v56 }
 0x2cd   :  { %1566 = vmatpush1.bf16.msra.mxu0 %v7354_v2  ;;  %1597 = vmatprep.mubr.bf16.mxu0 %v1482_v30  ;;  %v7376_v30 = vld [vmem:[#allocation37_spill] sm:$0xff]  ;;  %v7377_v2 = vld [vmem:[#allocation62_spill] sm:$0xff] }
 0x2ce   :  { %1567 = vmatprep.subr.bf16.mxu0 %v7355_v7  ;;  %1633 = vmatpush1.bf16.msra.mxu1 %v7356_v9  ;;  %v7378_v7 = vld [vmem:[#allocation64_spill] sm:$0xff]  ;;  %v7379_v9 = vld [vmem:[#allocation38_spill] sm:$0xff] }
 0x2cf   :  { %1634 = vmatprep.subr.bf16.mxu1 %v7357_v18  ;;  %1664 = vmatprep.mubr.bf16.mxu1 %v7358_v42 }
 0x2d1   :  { %1568 = vmatpush1.bf16.msra.mxu0 %v7359_v54  ;;  %v7380_v54 = vld [vmem:[#allocation39_spill] sm:$0xff] }
 0x2d2   :  { %1569 = vmatprep.subr.bf16.mxu0 %v7360_v35  ;;  %1635 = vmatpush1.bf16.msra.mxu1 %v7361_v36  ;;  %v7381_v35 = vld [vmem:[#allocation66_spill] sm:$0xff] }
 0x2d3   :  { %1636 = vmatprep.subr.bf16.mxu1 %v7362_v39 }
 0x2d5   :  { %1570 = vmatpush1.bf16.msra.mxu0 %v7363_v41  ;;  %v7382_v41 = vld [vmem:[#allocation68_spill] sm:$0xff] }
 0x2d6   :  { %1571 = vmatprep.subr.bf16.mxu0 %v7364_v44  ;;  %1637 = vmatpush1.bf16.msra.mxu1 %v7365_v48  ;;  %v7383_v44 = vld [vmem:[#allocation41_spill] sm:$0xff] }
 0x2d7   :  { %1638 = vmatprep.subr.bf16.mxu1 %v7366_v62 }
 0x2d9   :  { %1572 = vmatpush1.bf16.msra.mxu0 %v7367_v63  ;;  %v7384_v63 = vld [vmem:[#allocation43_spill] sm:$0xff] }
 0x2da   :  { %1573 = vmatprep.subr.bf16.mxu0 %v7368_v8  ;;  %1639 = vmatpush1.bf16.msra.mxu1 %v7369_v10  ;;  %v7385_v8 = vld [vmem:[#allocation70_spill] sm:$0xff] }
 0x2db   :  { %1640 = vmatprep.subr.bf16.mxu1 %v7370_v12 }
 0x2dd   :  { %1574 = vmatpush1.bf16.msra.mxu0 %v7371_v49  ;;  %v7386_v49 = vld [vmem:[#allocation45_spill] sm:$0xff] }
 0x2de   :  { %1575 = vmatprep.subr.bf16.mxu0 %v7372_v14  ;;  %1641 = vmatpush1.bf16.msra.mxu1 %v7373_v16  ;;  %v7387_v14 = vld [vmem:[#allocation47_spill] sm:$0xff] }
 0x2df   :  { %1642 = vmatprep.subr.bf16.mxu1 %v7374_v5 }
 0x2e1   :  { %1576 = vmatpush1.bf16.msra.mxu0 %v7375_v37  ;;  %v7388_v37 = vld [vmem:[#allocation49_spill] sm:$0xff] }
 0x2e2   :  { %1577 = vmatprep.subr.bf16.mxu0 %v7376_v30  ;;  %1643 = vmatpush1.bf16.msra.mxu1 %v7377_v2  ;;  %v7389_v30 = vld [vmem:[#allocation51_spill] sm:$0xff] }
 0x2e3   :  { %1644 = vmatprep.subr.bf16.mxu1 %v7378_v7 }
 0x2e5   :  { %1578 = vmatpush1.bf16.msra.mxu0 %v7379_v9  ;;  %v7390_v9 = vld [vmem:[#allocation53_spill] sm:$0xff] }
 0x2e6   :  { %1579 = vmatprep.subr.bf16.mxu0 %v7380_v54  ;;  %1645 = vmatpush1.bf16.msra.mxu1 %v7381_v35  ;;  %v7391_v54 = vld [vmem:[#allocation55_spill] sm:$0xff] }
 0x2e7   :  { %1646 = vmatprep.subr.bf16.mxu1 %v7382_v41 }
 0x2e9   :  { %1580 = vmatpush1.bf16.msra.mxu0 %v7383_v44  ;;  %v7393_v44 = vld [vmem:[#allocation59_spill] sm:$0xff] }
 0x2ea   :  { %1581 = vmatprep.subr.bf16.mxu0 %v7384_v63  ;;  %1647 = vmatpush1.bf16.msra.mxu1 %v7385_v8  ;;  %v7394_v63 = vld [vmem:[#allocation61_spill] sm:$0xff] }
 0x2eb   :  { %3689 = vmatprep.subr.bf16.mxu1 %v7342_v34 }
 0x2ed   :  { %1582 = vmatpush1.bf16.msra.mxu0 %v7386_v49  ;;  %v7397_v49 = vld [vmem:[#allocation67_spill] sm:$0xff] }
 0x2ee   :  { %1583 = vmatprep.subr.bf16.mxu0 %v7387_v14  ;;  %v7398_v14 = vld [vmem:[#allocation69_spill] sm:$0xff] }
 0x2f1   :  { %1584 = vmatpush1.bf16.msra.mxu0 %v7388_v37  ;;  %v7399_v37 = vld [vmem:[#allocation71_spill] sm:$0xff] }
 0x2f2   :  { %1585 = vmatprep.subr.bf16.mxu0 %v7389_v30  ;;  %v7400_v30 = vld [vmem:[#allocation72_spill] sm:$0xff] }
 0x2f5   :  { %1586 = vmatpush1.bf16.msra.mxu0 %v7390_v9  ;;  %v5367_v9 = vld [vmem:[#allocation8 + $0x4] ss:$24 sps:$4 sm:$0xff]  }
 0x2f6   :  { %1587 = vmatprep.subr.bf16.mxu0 %v7391_v54  ;;  %7401 = vst [vmem:[#allocation18_spill] sm:$0xff] %v5367_v9  ;;  %v5374_v54 = vld [vmem:[#allocation8 + $0x34] ss:$24 sps:$4 sm:$0xff]  }
 0x2f7   :  { %7403 = vst [vmem:[#allocation20_spill] sm:$0xff] %v5374_v54 }
 0x2f9   :  { %1588 = vmatpush1.bf16.msra.mxu0 %v7392_v26  ;;  %v5371_v26 = vld [vmem:[#allocation8] ss:$24 sps:$4 sm:$0xff]  }
 0x2fa   :  { %1589 = vmatprep.subr.bf16.mxu0 %v7393_v44  ;;  %7402 = vst [vmem:[#allocation19_spill] sm:$0xff] %v5371_v26  ;;  %v5377_v44 = vld [vmem:[#allocation8 + $0x30] ss:$24 sps:$4 sm:$0xff]  }
 0x2fb   :  { %7404 = vst [vmem:[#allocation21_spill] sm:$0xff] %v5377_v44 }
 0x2fd   :  { %1590 = vmatpush1.bf16.msra.mxu0 %v7394_v63  ;;  %v5380_v63 = vld [vmem:[#allocation8 + $0x64] ss:$24 sps:$4 sm:$0xff]  }
 0x2fe   :  { %1591 = vmatprep.subr.bf16.mxu0 %v7395_v47  ;;  %7405 = vst [vmem:[#allocation22_spill] sm:$0xff] %v5380_v63 }
 0x301   :  { %1592 = vmatpush1.bf16.msra.mxu0 %v7396_v51 }
 0x302   :  { %1593 = vmatprep.subr.bf16.mxu0 %v7397_v49 }
 0x305   :  { %1594 = vmatpush1.bf16.msra.mxu0 %v7398_v14 }
 0x306   :  { %1595 = vmatprep.subr.bf16.mxu0 %v7399_v37 }
 0x309   :  { %1596 = vmatpush1.bf16.msra.mxu0 %v7400_v30 }
 0x30a   :  { %1736 = vmatprep.subr.bf16.mxu0 %v5367_v9 }
 0x30c   :  { %1598 = vmatmul.mubr.bf16.vlgmr.msra.gmra.mrb[28].mxu0 %v5224_v56  ;;  %v5386_v56 = vld [vmem:[#allocation8 + $0x94] ss:$24 sps:$4 sm:$0xff]  }
 0x30d   :  { %1737 = vmatpush1.bf16.msra.mxu0 %v5371_v26  ;;  %7407 = vst [vmem:[#allocation24_spill] sm:$0xff] %v5386_v56 }
 0x30e   :  { %1738 = vmatprep.subr.bf16.mxu0 %v5374_v54 }
 0x311   :  { %1739 = vmatpush1.bf16.msra.mxu0 %v5377_v44 }
 0x312   :  { %1740 = vmatprep.subr.bf16.mxu0 %v5380_v63 }
 0x315   :  { %1741 = vmatpush1.bf16.msra.mxu0 %v5383_v31  ;;  %v5401_v31 = vld [vmem:[#allocation8 + $0xf0] ss:$24 sps:$4 sm:$0xff]  }
 0x316   :  { %1742 = vmatprep.subr.bf16.mxu0 %v5386_v56  ;;  %7412 = vst [vmem:[#allocation42_spill] sm:$0xff] %v5401_v31  ;;  %v5404_v56 = vld [vmem:[#allocation8 + $0x124] ss:$24 sps:$4 sm:$0xff]  }
 0x317   :  { %7413 = vst [vmem:[#allocation44_spill] sm:$0xff] %v5404_v56 }
 0x319   :  { %1743 = vmatpush1.bf16.msra.mxu0 %v5389_v38  ;;  %v5407_v38 = vld [vmem:[#allocation8 + $0x120] ss:$24 sps:$4 sm:$0xff]  }
 0x31a   :  { %1744 = vmatprep.subr.bf16.mxu0 %v5392_v32  ;;  %7414 = vst [vmem:[#allocation28_spill] sm:$0xff] %v5407_v38  ;;  %v5410_v32 = vld [vmem:[#allocation8 + $0x154] ss:$24 sps:$4 sm:$0xff]  }
 0x31b   :  { %7415 = vst [vmem:[#allocation29_spill] sm:$0xff] %v5410_v32 }
 0x31d   :  { %1745 = vmatpush1.bf16.msra.mxu0 %v5395_v22  ;;  %v5413_v22 = vld [vmem:[#allocation8 + $0x150] ss:$24 sps:$4 sm:$0xff]  }
 0x31e   :  { %1746 = vmatprep.subr.bf16.mxu0 %v5398_v33  ;;  %7416 = vst [vmem:[#allocation46_spill] sm:$0xff] %v5413_v22  ;;  %v5416_v33 = vld [vmem:[#allocation8 + $0x184] ss:$24 sps:$4 sm:$0xff]  }
 0x31f   :  { %7417 = vst [vmem:[#allocation48_spill] sm:$0xff] %v5416_v33 }
 0x321   :  { %1747 = vmatpush1.bf16.msra.mxu0 %v5401_v31  ;;  %v5419_v31 = vld [vmem:[#allocation8 + $0x180] ss:$24 sps:$4 sm:$0xff]  }
 0x322   :  { %1748 = vmatprep.subr.bf16.mxu0 %v5404_v56  ;;  %7418 = vst [vmem:[#allocation30_spill] sm:$0xff] %v5419_v31  ;;  %v5422_v56 = vld [vmem:[#allocation8 + $0x1b4] ss:$24 sps:$4 sm:$0xff]  }
 0x323   :  { %7419 = vst [vmem:[#allocation31_spill] sm:$0xff] %v5422_v56 }
 0x325   :  { %1749 = vmatpush1.bf16.msra.mxu0 %v5407_v38  ;;  %v5425_v38 = vld [vmem:[#allocation8 + $0x1b0] ss:$24 sps:$4 sm:$0xff]  }
 0x326   :  { %1750 = vmatprep.subr.bf16.mxu0 %v5410_v32  ;;  %7420 = vst [vmem:[#allocation50_spill] sm:$0xff] %v5425_v38  ;;  %v5428_v32 = vld [vmem:[#allocation8 + $0x1e4] ss:$24 sps:$4 sm:$0xff]  }
 0x327   :  { %7421 = vst [vmem:[#allocation52_spill] sm:$0xff] %v5428_v32 }
 0x329   :  { %1751 = vmatpush1.bf16.msra.mxu0 %v5413_v22  ;;  %v5431_v22 = vld [vmem:[#allocation8 + $0x1e0] ss:$24 sps:$4 sm:$0xff]  }
 0x32a   :  { %1752 = vmatprep.subr.bf16.mxu0 %v5416_v33  ;;  %7422 = vst [vmem:[#allocation32_spill] sm:$0xff] %v5431_v22  ;;  %v5434_v33 = vld [vmem:[#allocation8 + $0x214] ss:$24 sps:$4 sm:$0xff]  }
 0x32b   :  { %7423 = vst [vmem:[#allocation33_spill] sm:$0xff] %v5434_v33 }
 0x32d   :  { %1753 = vmatpush1.bf16.msra.mxu0 %v5419_v31  ;;  %v5437_v31 = vld [vmem:[#allocation8 + $0x210] ss:$24 sps:$4 sm:$0xff]  }
 0x32e   :  { %1754 = vmatprep.subr.bf16.mxu0 %v5422_v56  ;;  %7424 = vst [vmem:[#allocation54_spill] sm:$0xff] %v5437_v31 }
 0x331   :  { %1755 = vmatpush1.bf16.msra.mxu0 %v5425_v38 }
 0x332   :  { %1756 = vmatprep.subr.bf16.mxu0 %v5428_v32 }
 0x335   :  { %1757 = vmatpush1.bf16.msra.mxu0 %v5431_v22  ;;  %v7425_v22 = vld [vmem:[#allocation73_spill] sm:$0xff] }
 0x336   :  { %1758 = vmatprep.subr.bf16.mxu0 %v5434_v33 }
 0x339   :  { %1759 = vmatpush1.bf16.msra.mxu0 %v5437_v31 }
 0x33a   :  { %1760 = vmatprep.subr.bf16.mxu0 %v4866_v11 }
 0x33d   :  { %1761 = vmatpush1.bf16.msra.mxu0 %v4874_v13 }
 0x33e   :  { %1762 = vmatprep.subr.bf16.mxu0 %v4878_v15  ;;  %v7426_v15 = vld [vmem:[#allocation74_spill] sm:$0xff] }
 0x341   :  { %1763 = vmatpush1.bf16.msra.mxu0 %v4886_v17 }
 0x342   :  { %1764 = vmatprep.subr.bf16.mxu0 %v4890_v19 }
 0x345   :  { %1765 = vmatpush1.bf16.msra.mxu0 %v4898_v21 }
 0x346   :  { %1766 = vmatprep.subr.bf16.mxu0 %v4902_v23 }
 0x349   :  { %1767 = vmatpush1.bf16.msra.mxu0 %v4910_v28 }
 0x34a   :  { %1818 = vmatprep.subr.bf16.mxu0 %v4936_v25 }
 0x39f   :  { %v1517_v33 = vpop.f32.mrb[24].mxu0  ;;  %v1558_v31 = vpop.f32.mrb[20].mxu1 }
 0x3a0   :  { %v1609_v11 = vadd.f32 %v1517_v33, %v7425_v22  ;;  %v1519_v32 = vpop.f32.mrb[25].mxu0  ;;  %v5450_v13 = vpop.f32.mrb[21].mxu1  ;;  %v1623_v33 = vadd.f32 %v1558_v31, %v5213_v27 }
 0x3a1   :  { %v1616_v38 = vadd.f32 %v1519_v32, %v7426_v15  ;;  %v1521_v17 = vpop.f32.mrb[26].mxu0  ;;  %v1562_v56 = vpop.f32.mrb[22].mxu1 }
 0x3a2   :  { %v3516_v19 = vmul.f32 -1.442695, %v1609_v11  ;;  %v1522_v63 = vpop.f32.mrb[27].mxu0  ;;  %v1563_v21 = vpop.f32.mrb[23].mxu1 }
 0x3a3   :  { %v3517_v23 = vmul.f32 -1.442695, %v1616_v38  ;;  %v5492_v21 = vld [vmem:[#allocation8 + $0x38] ss:$24 sps:$4 sm:$0xff]  }
 0x3a4   :  { %4107 = vpow2.f32 %v3516_v19  ;;  %v5489_v19 = vld [vmem:[#allocation8 + $0x3c] ss:$24 sps:$4 sm:$0xff]  }
 0x3a5   :  { %4109 = vpow2.f32 %v3517_v23  ;;  %v5495_v23 = vld [vmem:[#allocation8 + $0x6c] ss:$24 sps:$4 sm:$0xff]  }
 0x3ae   :  { %v4108_v28 = vpop.eup %4107 }
 0x3af   :  { %v1613_v44 = vadd.f32 1.0, %v4108_v28  ;;  %v4110_v25 = vpop.eup %4109  ;;  %v5498_v28 = vld [vmem:[#allocation8 + $0x68] ss:$24 sps:$4 sm:$0xff]  }
 0x3b0   :  { %v1620_v54 = vadd.f32 1.0, %v4110_v25  ;;  %v5501_v25 = vld [vmem:[#allocation8 + $0x9c] ss:$24 sps:$4 sm:$0xff]  }
 0x3b1   :  { %4111 = vrcp.f32 %v1613_v44 }
 0x3b2   :  { %4113 = vrcp.f32 %v1620_v54  ;;  %v5486_v54 = vld [vmem:[#allocation8 + $0x8] ss:$24 sps:$4 sm:$0xff]  }
 0x3bb   :  { %v4112_v22 = vpop.eup %4111 }
 0x3bc   :  { %v1624_v26 = vmul.f32 %v4112_v22, %v1623_v33  ;;  %v4114_v56 = vpop.eup %4113  ;;  %v5504_v33 = vld [vmem:[#allocation8 + $0x98] ss:$24 sps:$4 sm:$0xff]   ;;  %v5507_v22 = vld [vmem:[#allocation8 + $0xcc] ss:$24 sps:$4 sm:$0xff]  }
 0x3bd   :  { %v1627_v11 = vsub.f32 1.0, %v4114_v56  ;;  %v1629_v15 = vmul.f32 %v4114_v56, %v5218_v43  ;;  %7427 = vst [vmem:[#allocation56_spill] sm:$0xff] %v5507_v22  ;;  %v5513_v56 = vld [vmem:[#allocation8 + $0xfc] ss:$24 sps:$4 sm:$0xff]  }
 0x3be   :  { %v1625_v32 = vadd.f32 %v1624_v26, %v5141_v0  ;;  %7429 = vst [vmem:[#allocation35_spill] sm:$0xff] %v5513_v56 }
 0x3c0   :  { %4115 = vtanh.f32 %v1625_v32  ;;  %v5510_v32 = vld [vmem:[#allocation8 + $0xc8] ss:$24 sps:$4 sm:$0xff]  }
 0x3c1   :  { %7428 = vst [vmem:[#allocation34_spill] sm:$0xff] %v5510_v32 }
 0x3ca   :  { %v4116_v63 = vpop.eup %4115 }
 0x3cb   :  { %v1628_v38 = vmul.f32 %v4116_v63, %v1627_v11  ;;  %v5516_v11 = vld [vmem:[#allocation8 + $0xf8] ss:$24 sps:$4 sm:$0xff]   ;;  %v5519_v63 = vld [vmem:[#allocation8 + $0x12c] ss:$24 sps:$4 sm:$0xff]  }
 0x3cc   :  { %7430 = vst [vmem:[#allocation58_spill] sm:$0xff] %v5516_v11  ;;  %7431 = vst [vmem:[#allocation60_spill] sm:$0xff] %v5519_v63 }
 0x3cd   :  { %v5456_v17 = vadd.f32 %v1629_v15, %v1628_v38  ;;  %v5522_v15 = vld [vmem:[#allocation8 + $0x128] ss:$24 sps:$4 sm:$0xff]   ;;  %v5525_v38 = vld [vmem:[#allocation8 + $0x15c] ss:$24 sps:$4 sm:$0xff]  }
 0x3ce   :  { %7432 = vst [vmem:[#allocation36_spill] sm:$0xff] %v5522_v15  ;;  %7433 = vst [vmem:[#allocation37_spill] sm:$0xff] %v5525_v38 }
 0x3cf   :  { %v5460_v44 = vpack.c.bf16 %v5456_v17, %v5456_v17 }
 0x3d1   :  { %1665 = vmatmul.mubr.bf16.vlgmr.msra.gmra.mrb[24].mxu1 %v5460_v44 }
 0x3d2   :  { %3690 = vmatpush3.bf16.msra.mxu1 %v5220_v60  ;;  %3705 = vmatprep.mubr.msk.bf16.mxu1 %vm4645_vm0, %v7342_v34 }
 0x3d3   :  { %3691 = vmatprep.subr.bf16.mxu1 %v7342_v34 }
 0x3d6   :  { %3692 = vmatpush3.bf16.msra.mxu1 %v5228_v20 }
 0x3d7   :  { %3693 = vmatprep.subr.bf16.mxu1 %v7342_v34 }
 0x3da   :  { %3694 = vmatpush3.bf16.msra.mxu1 %v5234_v24 }
 0x3db   :  { %3695 = vmatprep.subr.bf16.mxu1 %v7342_v34 }
 0x3de   :  { %3696 = vmatpush3.bf16.msra.mxu1 %v5238_v29 }
 0x3df   :  { %v5472_v0 = vpop.f32.mrb[28].mxu0  ;;  %3697 = vmatprep.subr.bf16.mxu1 %v7342_v34 }
 0x3e0   :  { %v5475_v31 = vpop.f32.mrb[29].mxu0 }
 0x3e1   :  { %v1603_v43 = vpop.f32.mrb[30].mxu0 }
 0x3e2   :  { %v1604_v26 = vpop.f32.mrb[31].mxu0  ;;  %3698 = vmatpush3.bf16.msra.mxu1 %v5242_v61  ;;  %v5528_v43 = vld [vmem:[#allocation8 + $0x158] ss:$24 sps:$4 sm:$0xff]  }
 0x3e3   :  { %3699 = vmatprep.subr.bf16.mxu1 %v7342_v34  ;;  %7434 = vst [vmem:[#allocation62_spill] sm:$0xff] %v5528_v43  ;;  %v5531_v26 = vld [vmem:[#allocation8 + $0x18c] ss:$24 sps:$4 sm:$0xff]  }
 0x3e4   :  { %7435 = vst [vmem:[#allocation64_spill] sm:$0xff] %v5531_v26 }
 0x3e6   :  { %3700 = vmatpush3.bf16.msra.mxu1 %v5246_v1 }
 0x3e7   :  { %3701 = vmatprep.subr.bf16.mxu1 %v7342_v34 }
 0x3ea   :  { %3702 = vmatpush3.bf16.msra.mxu1 %v5250_v3 }
 0x3eb   :  { %3703 = vmatprep.subr.bf16.mxu1 %v7342_v34 }
 0x3ee   :  { %3704 = vmatpush3.bf16.msra.mxu1 %v5254_v52 }
 0x3ef   :  { %1777 = vmatprep.subr.bf16.mxu1 %v5258_v46 }
 0x3f1   :  { %3706 = vmatmul.mubr.bf16.vlgmr.msra.gmra.mrb[28].mxu1 %v5460_v44 }
 0x3f2   :  { %1778 = vmatpush1.bf16.msra.mxu1 %v5486_v54 }
 0x3f3   :  { %1779 = vmatprep.subr.bf16.mxu1 %v5489_v19 }
 0x3f6   :  { %1780 = vmatpush1.bf16.msra.mxu1 %v5492_v21 }
 0x3f7   :  { %1781 = vmatprep.subr.bf16.mxu1 %v5495_v23 }
 0x3fa   :  { %1782 = vmatpush1.bf16.msra.mxu1 %v5498_v28 }
 0x3fb   :  { %1783 = vmatprep.subr.bf16.mxu1 %v5501_v25 }
 0x3fe   :  { %1784 = vmatpush1.bf16.msra.mxu1 %v5504_v33 }
 0x3ff   :  { %1785 = vmatprep.subr.bf16.mxu1 %v5507_v22 }
 0x402   :  { %1786 = vmatpush1.bf16.msra.mxu1 %v5510_v32 }
 0x403   :  { %1787 = vmatprep.subr.bf16.mxu1 %v5513_v56 }
 0x406   :  { %1788 = vmatpush1.bf16.msra.mxu1 %v5516_v11  ;;  %v5534_v11 = vld [vmem:[#allocation8 + $0x188] ss:$24 sps:$4 sm:$0xff]  }
 0x407   :  { %1789 = vmatprep.subr.bf16.mxu1 %v5519_v63  ;;  %7436 = vst [vmem:[#allocation38_spill] sm:$0xff] %v5534_v11  ;;  %v5537_v63 = vld [vmem:[#allocation8 + $0x1bc] ss:$24 sps:$4 sm:$0xff]  }
 0x408   :  { %7437 = vst [vmem:[#allocation39_spill] sm:$0xff] %v5537_v63 }
 0x40a   :  { %1790 = vmatpush1.bf16.msra.mxu1 %v5522_v15  ;;  %v5540_v15 = vld [vmem:[#allocation8 + $0x1b8] ss:$24 sps:$4 sm:$0xff]  }
 0x40b   :  { %1791 = vmatprep.subr.bf16.mxu1 %v5525_v38  ;;  %7438 = vst [vmem:[#allocation66_spill] sm:$0xff] %v5540_v15  ;;  %v5543_v38 = vld [vmem:[#allocation8 + $0x1ec] ss:$24 sps:$4 sm:$0xff]  }
 0x40c   :  { %7439 = vst [vmem:[#allocation68_spill] sm:$0xff] %v5543_v38 }
 0x40e   :  { %1792 = vmatpush1.bf16.msra.mxu1 %v5528_v43  ;;  %v5546_v43 = vld [vmem:[#allocation8 + $0x1e8] ss:$24 sps:$4 sm:$0xff]  }
 0x40f   :  { %1793 = vmatprep.subr.bf16.mxu1 %v5531_v26  ;;  %7440 = vst [vmem:[#allocation41_spill] sm:$0xff] %v5546_v43  ;;  %v5549_v26 = vld [vmem:[#allocation8 + $0x21c] ss:$24 sps:$4 sm:$0xff]  }
 0x410   :  { %7441 = vst [vmem:[#allocation43_spill] sm:$0xff] %v5549_v26 }
 0x412   :  { %1794 = vmatpush1.bf16.msra.mxu1 %v5534_v11  ;;  %v5552_v11 = vld [vmem:[#allocation8 + $0x218] ss:$24 sps:$4 sm:$0xff]  }
 0x413   :  { %1795 = vmatprep.subr.bf16.mxu1 %v5537_v63  ;;  %7442 = vst [vmem:[#allocation70_spill] sm:$0xff] %v5552_v11  ;;  %v5555_v63 = vld [vmem:[#allocation8 + $0x24c] ss:$24 sps:$4 sm:$0xff]  }
 0x414   :  { %7443 = vst [vmem:[#allocation45_spill] sm:$0xff] %v5555_v63 }
 0x416   :  { %1796 = vmatpush1.bf16.msra.mxu1 %v5540_v15  ;;  %v5558_v15 = vld [vmem:[#allocation8 + $0x248] ss:$24 sps:$4 sm:$0xff]  }
 0x417   :  { %1797 = vmatprep.subr.bf16.mxu1 %v5543_v38  ;;  %7444 = vst [vmem:[#allocation47_spill] sm:$0xff] %v5558_v15  ;;  %v5561_v38 = vld [vmem:[#allocation8 + $0x27c] ss:$24 sps:$4 sm:$0xff]  }
 0x418   :  { %7445 = vst [vmem:[#allocation49_spill] sm:$0xff] %v5561_v38 }
 0x41a   :  { %1798 = vmatpush1.bf16.msra.mxu1 %v5546_v43  ;;  %v5564_v43 = vld [vmem:[#allocation8 + $0x278] ss:$24 sps:$4 sm:$0xff]  }
 0x41b   :  { %1799 = vmatprep.subr.bf16.mxu1 %v5549_v26  ;;  %7446 = vst [vmem:[#allocation51_spill] sm:$0xff] %v5564_v43 }
 0x41e   :  { %1800 = vmatpush1.bf16.msra.mxu1 %v5552_v11 }
 0x41f   :  { %1801 = vmatprep.subr.bf16.mxu1 %v5555_v63 }
 0x422   :  { %1802 = vmatpush1.bf16.msra.mxu1 %v5558_v15 }
 0x423   :  { %1803 = vmatprep.subr.bf16.mxu1 %v5561_v38 }
 0x426   :  { %1804 = vmatpush1.bf16.msra.mxu1 %v5564_v43 }
 0x427   :  { %1805 = vmatprep.subr.bf16.mxu1 %v7348_v45 }
 0x42a   :  { %1806 = vmatpush1.bf16.msra.mxu1 %v7349_v50 }
 0x42b   :  { %1807 = vmatprep.subr.bf16.mxu1 %v7350_v53 }
 0x42e   :  { %1808 = vmatpush1.bf16.msra.mxu1 %v7351_v55 }
 0x42f   :  { %1885 = vmatprep.subr.bf16.mxu1 %v7352_v58 }
 0x4a4   :  { %v1666_v63 = vpop.f32.mrb[24].mxu1 }
 0x4a5   :  { %v1667_v15 = vadd.f32 %v1666_v63, %v5296_v4  ;;  %v1668_v11 = vpop.f32.mrb[25].mxu1  ;;  %v1727_v63 = vadd.f32 %v5475_v31, %v5306_v57 }
 0x4a6   :  { %v1669_v38 = vadd.f32 %v1668_v11, %v5299_v6  ;;  %v1670_v26 = vpop.f32.mrb[26].mxu1 }
 0x4a7   :  { %v1713_v56 = vadd.f32 %v1667_v15, %v5450_v13  ;;  %v1671_v43 = vpop.f32.mrb[27].mxu1 }
 0x4a8   :  { %v1720_v45 = vadd.f32 %v1669_v38, %v5472_v0 }
 0x4a9   :  { %v3518_v32 = vmul.f32 -1.442695, %v1713_v56 }
 0x4aa   :  { %v3519_v50 = vmul.f32 -1.442695, %v1720_v45 }
 0x4ab   :  { %4117 = vpow2.f32 %v3518_v32 }
 0x4ac   :  { %4119 = vpow2.f32 %v3519_v50 }
 0x4b5   :  { %v4118_v53 = vpop.eup %4117 }
 0x4b6   :  { %v1717_v55 = vadd.f32 1.0, %v4118_v53  ;;  %v4120_v58 = vpop.eup %4119 }
 0x4b7   :  { %v1724_v4 = vadd.f32 1.0, %v4120_v58  ;;  %v5597_v58 = vld [vmem:[#allocation8 + $0x40] ss:$24 sps:$4 sm:$0xff]  }
 0x4b8   :  { %4121 = vrcp.f32 %v1717_v55 }
 0x4b9   :  { %4123 = vrcp.f32 %v1724_v4  ;;  %v5586_v4 = vld [vmem:[#allocation8 + $0x10] ss:$24 sps:$4 sm:$0xff]  }
 0x4c2   :  { %v4122_v22 = vpop.eup %4121 }
 0x4c3   :  { %v1728_v11 = vmul.f32 %v4122_v22, %v1727_v63  ;;  %v4124_v38 = vpop.eup %4123  ;;  %v5589_v22 = vld [vmem:[#allocation8 + $0x44] ss:$24 sps:$4 sm:$0xff]   ;;  %v5600_v63 = vld [vmem:[#allocation8 + $0x74] ss:$24 sps:$4 sm:$0xff]  }
 0x4c4   :  { %v1707_v26 = vpop.f32.mrb[28].mxu1  ;;  %v1731_v43 = vsub.f32 1.0, %v4124_v38  ;;  %v1733_v53 = vmul.f32 %v4124_v38, %v5313_v59  ;;  %v5592_v59 = vld [vmem:[#allocation9] ss:$16 sps:$4 sm:$0xff]  }
 0x4c5   :  { %v1708_v13 = vadd.f32 %v1707_v26, %v5310_v40  ;;  %v3707_v15 = vpop.f32.mrb[29].mxu1  ;;  %v5608_v26 = vld [vmem:[#allocation8 + $0xa4] ss:$24 sps:$4 sm:$0xff]   ;;  %v7462_v38 = vld [vmem:[#allocation19_spill] sm:$0xff] }
 0x4c6   :  { %v1710_v0 = vpop.f32.mrb[30].mxu1  ;;  %v5665_v15 = vld [vmem:[#allocation8 + $0x1f0] ss:$24 sps:$4 sm:$0xff]  }
 0x4c7   :  { %v1729_v56 = vadd.f32 %v1728_v11, %v1708_v13  ;;  %v3708_v32 = vpop.f32.mrb[31].mxu1  ;;  %v5605_v11 = vld [vmem:[#allocation8 + $0x70] ss:$24 sps:$4 sm:$0xff]   ;;  %v5616_v13 = vld [vmem:[#allocation8 + $0xd4] ss:$24 sps:$4 sm:$0xff]   ;;  %7457 = vst [vmem:[#allocation72_spill] sm:$0xff] %v5665_v15 }
 0x4c8   :  { %v5671_v0 = vld [vmem:[#allocation8 + $0x220] ss:$24 sps:$4 sm:$0xff]   ;;  %v5677_v32 = vld [vmem:[#allocation8 + $0x250] ss:$24 sps:$4 sm:$0xff]  }
 0x4c9   :  { %4125 = vtanh.f32 %v1729_v56  ;;  %7459 = vst [vmem:[#allocation74_spill] sm:$0xff] %v5671_v0  ;;  %v5674_v56 = vld [vmem:[#allocation8 + $0x254] ss:$24 sps:$4 sm:$0xff]   ;;  %7461 = vst [vmem:[#allocation95_spill] sm:$0xff] %v5677_v32 }
 0x4ca   :  { %7460 = vst [vmem:[#allocation94_spill] sm:$0xff] %v5674_v56 }
 0x4d3   :  { %v4126_v45 = vpop.eup %4125 }
 0x4d4   :  { %v1732_v50 = vmul.f32 %v4126_v45, %v1731_v43  ;;  %v7463_v43 = vld [vmem:[#allocation20_spill] sm:$0xff]  ;;  %v7464_v45 = vld [vmem:[#allocation21_spill] sm:$0xff] }
 0x4d6   :  { %v5580_v55 = vadd.f32 %v1733_v53, %v1732_v50  ;;  %v7471_v50 = vld [vmem:[#allocation27_spill] sm:$0xff]  ;;  %v7473_v53 = vld [vmem:[#allocation44_spill] sm:$0xff] }
 0x4d8   :  { %v1735_v31 = vpack.c.bf16 %v5580_v55, %v5580_v55 }
 0x4da   :  { %1768 = vmatprep.mubr.bf16.mxu0 %v1735_v31  ;;  %1809 = vmatprep.mubr.bf16.mxu1 %v1735_v31 }
 0x4db   :  { %1769 = vmatmul.mubr.bf16.vlgmr.msra.gmra.mrb[32].mxu0 %v5460_v44  ;;  %1810 = vmatmul.mubr.bf16.vlgmr.msra.gmra.mrb[32].mxu1 %v5460_v44 }
 0x4dc   :  { %1819 = vmatpush1.bf16.msra.mxu0 %v5586_v4  ;;  %1850 = vmatprep.mubr.bf16.mxu0 %v1735_v31  ;;  %v7474_v31 = vld [vmem:[#allocation28_spill] sm:$0xff] }
 0x4dd   :  { %1820 = vmatprep.subr.bf16.mxu0 %v5589_v22  ;;  %1886 = vmatpush1.bf16.msra.mxu1 %v5592_v59 }
 0x4de   :  { %1887 = vmatprep.subr.bf16.mxu1 %v7357_v18  ;;  %1917 = vmatprep.mubr.bf16.mxu1 %v7358_v42  ;;  %v5613_v18 = vld [vmem:[#allocation8 + $0xa0] ss:$24 sps:$4 sm:$0xff]  }
 0x4e0   :  { %1821 = vmatpush1.bf16.msra.mxu0 %v5597_v58 }
 0x4e1   :  { %1822 = vmatprep.subr.bf16.mxu0 %v5600_v63  ;;  %1888 = vmatpush1.bf16.msra.mxu1 %v7361_v36  ;;  %v5621_v36 = vld [vmem:[#allocation8 + $0xd0] ss:$24 sps:$4 sm:$0xff]  }
 0x4e2   :  { %1889 = vmatprep.subr.bf16.mxu1 %v7362_v39  ;;  %v5624_v39 = vld [vmem:[#allocation8 + $0x104] ss:$24 sps:$4 sm:$0xff]  }
 0x4e4   :  { %1823 = vmatpush1.bf16.msra.mxu0 %v5605_v11 }
 0x4e5   :  { %1824 = vmatprep.subr.bf16.mxu0 %v5608_v26  ;;  %1890 = vmatpush1.bf16.msra.mxu1 %v7365_v48  ;;  %v5629_v48 = vld [vmem:[#allocation8 + $0x100] ss:$24 sps:$4 sm:$0xff]  }
 0x4e6   :  { %1891 = vmatprep.subr.bf16.mxu1 %v7366_v62  ;;  %7447 = vst [vmem:[#allocation53_spill] sm:$0xff] %v5629_v48  ;;  %v5632_v62 = vld [vmem:[#allocation8 + $0x134] ss:$24 sps:$4 sm:$0xff]  }
 0x4e7   :  { %7448 = vst [vmem:[#allocation55_spill] sm:$0xff] %v5632_v62 }
 0x4e8   :  { %1825 = vmatpush1.bf16.msra.mxu0 %v5613_v18 }
 0x4e9   :  { %1826 = vmatprep.subr.bf16.mxu0 %v5616_v13  ;;  %1892 = vmatpush1.bf16.msra.mxu1 %v7369_v10  ;;  %v5637_v10 = vld [vmem:[#allocation8 + $0x130] ss:$24 sps:$4 sm:$0xff]  }
 0x4ea   :  { %1893 = vmatprep.subr.bf16.mxu1 %v7370_v12  ;;  %7449 = vst [vmem:[#allocation57_spill] sm:$0xff] %v5637_v10  ;;  %v5640_v12 = vld [vmem:[#allocation8 + $0x164] ss:$24 sps:$4 sm:$0xff]  }
 0x4eb   :  { %7450 = vst [vmem:[#allocation59_spill] sm:$0xff] %v5640_v12 }
 0x4ec   :  { %1827 = vmatpush1.bf16.msra.mxu0 %v5621_v36 }
 0x4ed   :  { %1828 = vmatprep.subr.bf16.mxu0 %v5624_v39  ;;  %1894 = vmatpush1.bf16.msra.mxu1 %v7373_v16  ;;  %v5645_v16 = vld [vmem:[#allocation8 + $0x160] ss:$24 sps:$4 sm:$0xff]  }
 0x4ee   :  { %1895 = vmatprep.subr.bf16.mxu1 %v7374_v5  ;;  %7451 = vst [vmem:[#allocation61_spill] sm:$0xff] %v5645_v16  ;;  %v5648_v5 = vld [vmem:[#allocation8 + $0x194] ss:$24 sps:$4 sm:$0xff]  }
 0x4ef   :  { %7452 = vst [vmem:[#allocation63_spill] sm:$0xff] %v5648_v5 }
 0x4f0   :  { %1829 = vmatpush1.bf16.msra.mxu0 %v5629_v48 }
 0x4f1   :  { %1830 = vmatprep.subr.bf16.mxu0 %v5632_v62  ;;  %1896 = vmatpush1.bf16.msra.mxu1 %v7377_v2  ;;  %v5653_v2 = vld [vmem:[#allocation8 + $0x190] ss:$24 sps:$4 sm:$0xff]  }
 0x4f2   :  { %1897 = vmatprep.subr.bf16.mxu1 %v7378_v7  ;;  %7453 = vst [vmem:[#allocation65_spill] sm:$0xff] %v5653_v2  ;;  %v5656_v7 = vld [vmem:[#allocation8 + $0x1c4] ss:$24 sps:$4 sm:$0xff]  }
 0x4f3   :  { %7454 = vst [vmem:[#allocation67_spill] sm:$0xff] %v5656_v7 }
 0x4f4   :  { %1831 = vmatpush1.bf16.msra.mxu0 %v5637_v10 }
 0x4f5   :  { %1832 = vmatprep.subr.bf16.mxu0 %v5640_v12  ;;  %1898 = vmatpush1.bf16.msra.mxu1 %v7381_v35  ;;  %v5659_v35 = vld [vmem:[#allocation8 + $0x1c0] ss:$24 sps:$4 sm:$0xff]  }
 0x4f6   :  { %1899 = vmatprep.subr.bf16.mxu1 %v7382_v41  ;;  %7455 = vst [vmem:[#allocation69_spill] sm:$0xff] %v5659_v35  ;;  %v5662_v41 = vld [vmem:[#allocation8 + $0x1f4] ss:$24 sps:$4 sm:$0xff]  }
 0x4f7   :  { %7456 = vst [vmem:[#allocation71_spill] sm:$0xff] %v5662_v41 }
 0x4f8   :  { %1833 = vmatpush1.bf16.msra.mxu0 %v5645_v16 }
 0x4f9   :  { %1834 = vmatprep.subr.bf16.mxu0 %v5648_v5  ;;  %1900 = vmatpush1.bf16.msra.mxu1 %v7385_v8  ;;  %v5668_v8 = vld [vmem:[#allocation8 + $0x224] ss:$24 sps:$4 sm:$0xff]  }
 0x4fa   :  { %3709 = vmatprep.subr.bf16.mxu1 %v7342_v34  ;;  %7458 = vst [vmem:[#allocation73_spill] sm:$0xff] %v5668_v8 }
 0x4fc   :  { %1835 = vmatpush1.bf16.msra.mxu0 %v5653_v2 }
 0x4fd   :  { %1836 = vmatprep.subr.bf16.mxu0 %v5656_v7 }
 0x500   :  { %1837 = vmatpush1.bf16.msra.mxu0 %v5659_v35 }
 0x501   :  { %1838 = vmatprep.subr.bf16.mxu0 %v5662_v41  ;;  %v7496_v41 = vld [vmem:[#allocation75_spill] sm:$0xff] }
 0x504   :  { %1839 = vmatpush1.bf16.msra.mxu0 %v5665_v15 }
 0x505   :  { %1840 = vmatprep.subr.bf16.mxu0 %v5668_v8 }
 0x508   :  { %1841 = vmatpush1.bf16.msra.mxu0 %v5671_v0 }
 0x509   :  { %1842 = vmatprep.subr.bf16.mxu0 %v5674_v56 }
 0x50c   :  { %1843 = vmatpush1.bf16.msra.mxu0 %v5677_v32 }
 0x50d   :  { %1844 = vmatprep.subr.bf16.mxu0 %v7395_v47  ;;  %v7465_v47 = vld [vmem:[#allocation22_spill] sm:$0xff] }
 0x510   :  { %1845 = vmatpush1.bf16.msra.mxu0 %v7396_v51  ;;  %v7466_v51 = vld [vmem:[#allocation23_spill] sm:$0xff] }
 0x511   :  { %1846 = vmatprep.subr.bf16.mxu0 %v7397_v49  ;;  %v7467_v49 = vld [vmem:[#allocation24_spill] sm:$0xff] }
 0x514   :  { %1847 = vmatpush1.bf16.msra.mxu0 %v7398_v14  ;;  %v7468_v14 = vld [vmem:[#allocation25_spill] sm:$0xff] }
 0x515   :  { %1848 = vmatprep.subr.bf16.mxu0 %v7399_v37  ;;  %v7469_v37 = vld [vmem:[#allocation40_spill] sm:$0xff] }
 0x518   :  { %1849 = vmatpush1.bf16.msra.mxu0 %v7400_v30  ;;  %v7470_v30 = vld [vmem:[#allocation26_spill] sm:$0xff] }
 0x519   :  { %1989 = vmatprep.subr.bf16.mxu0 %v5367_v9 }
 0x51b   :  { %1851 = vmatmul.mubr.bf16.vlgmr.msra.gmra.mrb[36].mxu0 %v5460_v44  ;;  %v7472_v44 = vld [vmem:[#allocation42_spill] sm:$0xff] }
 0x51c   :  { %1990 = vmatpush1.bf16.msra.mxu0 %v7462_v38 }
 0x51d   :  { %1991 = vmatprep.subr.bf16.mxu0 %v7463_v43 }
 0x520   :  { %1992 = vmatpush1.bf16.msra.mxu0 %v7464_v45  ;;  %v7475_v45 = vld [vmem:[#allocation29_spill] sm:$0xff] }
 0x521   :  { %1993 = vmatprep.subr.bf16.mxu0 %v7465_v47  ;;  %v7476_v47 = vld [vmem:[#allocation46_spill] sm:$0xff] }
 0x524   :  { %1994 = vmatpush1.bf16.msra.mxu0 %v7466_v51  ;;  %v7477_v51 = vld [vmem:[#allocation48_spill] sm:$0xff] }
 0x525   :  { %1995 = vmatprep.subr.bf16.mxu0 %v7467_v49  ;;  %v7478_v49 = vld [vmem:[#allocation30_spill] sm:$0xff] }
 0x528   :  { %1996 = vmatpush1.bf16.msra.mxu0 %v7468_v14  ;;  %v7479_v14 = vld [vmem:[#allocation31_spill] sm:$0xff] }
 0x529   :  { %1997 = vmatprep.subr.bf16.mxu0 %v7469_v37  ;;  %v7480_v37 = vld [vmem:[#allocation50_spill] sm:$0xff] }
 0x52c   :  { %1998 = vmatpush1.bf16.msra.mxu0 %v7470_v30  ;;  %v7481_v30 = vld [vmem:[#allocation52_spill] sm:$0xff] }
 0x52d   :  { %1999 = vmatprep.subr.bf16.mxu0 %v7471_v50  ;;  %v7482_v50 = vld [vmem:[#allocation32_spill] sm:$0xff] }
 0x530   :  { %2000 = vmatpush1.bf16.msra.mxu0 %v7472_v44  ;;  %v7483_v44 = vld [vmem:[#allocation33_spill] sm:$0xff] }
 0x531   :  { %2001 = vmatprep.subr.bf16.mxu0 %v7473_v53  ;;  %v7484_v53 = vld [vmem:[#allocation54_spill] sm:$0xff] }
 0x534   :  { %2002 = vmatpush1.bf16.msra.mxu0 %v7474_v31  ;;  %v5711_v31 = vld [vmem:[#allocation8 + $0x244] ss:$24 sps:$4 sm:$0xff]  }
 0x535   :  { %2003 = vmatprep.subr.bf16.mxu0 %v7475_v45  ;;  %7485 = vst [vmem:[#allocation96_spill] sm:$0xff] %v5711_v31 }
 0x538   :  { %2004 = vmatpush1.bf16.msra.mxu0 %v7476_v47  ;;  %v5714_v47 = vld [vmem:[#allocation8 + $0x240] ss:$24 sps:$4 sm:$0xff]  }
 0x539   :  { %2005 = vmatprep.subr.bf16.mxu0 %v7477_v51  ;;  %7486 = vst [vmem:[#allocation97_spill] sm:$0xff] %v5714_v47 }
 0x53c   :  { %2006 = vmatpush1.bf16.msra.mxu0 %v7478_v49  ;;  %v5717_v49 = vld [vmem:[#allocation8 + $0x274] ss:$24 sps:$4 sm:$0xff]  }
 0x53d   :  { %2007 = vmatprep.subr.bf16.mxu0 %v7479_v14  ;;  %7487 = vst [vmem:[#allocation98_spill] sm:$0xff] %v5717_v49 }
 0x540   :  { %2008 = vmatpush1.bf16.msra.mxu0 %v7480_v37  ;;  %v5720_v37 = vld [vmem:[#allocation8 + $0x270] ss:$24 sps:$4 sm:$0xff]  }
 0x541   :  { %2009 = vmatprep.subr.bf16.mxu0 %v7481_v30  ;;  %7488 = vst [vmem:[#allocation99_spill] sm:$0xff] %v5720_v37  ;;  %v7494_v30 = vld [vmem:[#allocation76_spill] sm:$0xff] }
 0x544   :  { %2010 = vmatpush1.bf16.msra.mxu0 %v7482_v50  ;;  %v5723_v50 = vld [vmem:[#allocation8 + $0x2a4] ss:$24 sps:$4 sm:$0xff]  }
 0x545   :  { %2011 = vmatprep.subr.bf16.mxu0 %v7483_v44  ;;  %7489 = vst [vmem:[#allocation100_spill] sm:$0xff] %v5723_v50 }
 0x548   :  { %2012 = vmatpush1.bf16.msra.mxu0 %v7484_v53  ;;  %v5726_v53 = vld [vmem:[#allocation8 + $0x2a0] ss:$24 sps:$4 sm:$0xff]  }
 0x549   :  { %2013 = vmatprep.subr.bf16.mxu0 %v5711_v31  ;;  %7490 = vst [vmem:[#allocation101_spill] sm:$0xff] %v5726_v53  ;;  %v5729_v31 = vld [vmem:[#allocation8 + $0x2d4] ss:$24 sps:$4 sm:$0xff]  }
 0x54a   :  { %7491 = vst [vmem:[#allocation102_spill] sm:$0xff] %v5729_v31 }
 0x54c   :  { %2014 = vmatpush1.bf16.msra.mxu0 %v5714_v47  ;;  %v5732_v47 = vld [vmem:[#allocation8 + $0x2d0] ss:$24 sps:$4 sm:$0xff]  }
 0x54d   :  { %2015 = vmatprep.subr.bf16.mxu0 %v5717_v49  ;;  %7492 = vst [vmem:[#allocation103_spill] sm:$0xff] %v5732_v47  ;;  %v5735_v49 = vld [vmem:[#allocation8 + $0x14] ss:$24 sps:$4 sm:$0xff]  }
 0x54e   :  { %7493 = vst [vmem:[#allocation104_spill] sm:$0xff] %v5735_v49 }
 0x550   :  { %2016 = vmatpush1.bf16.msra.mxu0 %v5720_v37 }
 0x551   :  { %2017 = vmatprep.subr.bf16.mxu0 %v5723_v50 }
 0x554   :  { %2018 = vmatpush1.bf16.msra.mxu0 %v5726_v53  ;;  %v7495_v53 = vld [vmem:[#allocation77_spill] sm:$0xff] }
 0x555   :  { %2019 = vmatprep.subr.bf16.mxu0 %v5729_v31 }
 0x558   :  { %2020 = vmatpush1.bf16.msra.mxu0 %v5732_v47 }
 0x559   :  { %2071 = vmatprep.subr.bf16.mxu0 %v5735_v49 }
 0x5ae   :  { %v1770_v37 = vpop.f32.mrb[32].mxu0  ;;  %v1811_v44 = vpop.f32.mrb[32].mxu1 }
 0x5af   :  { %v1862_v50 = vadd.f32 %v1770_v37, %v7494_v30  ;;  %v1772_v14 = vpop.f32.mrb[33].mxu0  ;;  %v5739_v51 = vpop.f32.mrb[33].mxu1  ;;  %v1876_v37 = vadd.f32 %v1811_v44, %v5213_v27  ;;  %v7509_v44 = vld [vmem:[#allocation68_spill] sm:$0xff] }
 0x5b0   :  { %v1869_v45 = vadd.f32 %v1772_v14, %v7495_v53  ;;  %v1774_v43 = vpop.f32.mrb[34].mxu0  ;;  %v1815_v38 = vpop.f32.mrb[34].mxu1  ;;  %v7510_v53 = vld [vmem:[#allocation41_spill] sm:$0xff] }
 0x5b1   :  { %v3520_v31 = vmul.f32 -1.442695, %v1862_v50  ;;  %v1775_v9 = vpop.f32.mrb[35].mxu0  ;;  %v1816_v32 = vpop.f32.mrb[35].mxu1  ;;  %v7508_v50 = vld [vmem:[#allocation66_spill] sm:$0xff] }
 0x5b2   :  { %v3521_v47 = vmul.f32 -1.442695, %v1869_v45 }
 0x5b3   :  { %4127 = vpow2.f32 %v3520_v31  ;;  %v7511_v31 = vld [vmem:[#allocation43_spill] sm:$0xff] }
 0x5b4   :  { %4129 = vpow2.f32 %v3521_v47 }
 0x5bd   :  { %v4128_v56 = vpop.eup %4127 }
 0x5be   :  { %v1866_v0 = vadd.f32 1.0, %v4128_v56  ;;  %v4130_v49 = vpop.eup %4129  ;;  %v7506_v56 = vld [vmem:[#allocation38_spill] sm:$0xff] }
 0x5bf   :  { %v1873_v8 = vadd.f32 1.0, %v4130_v49  ;;  %v7507_v49 = vld [vmem:[#allocation39_spill] sm:$0xff] }
 0x5c0   :  { %4131 = vrcp.f32 %v1866_v0 }
 0x5c1   :  { %4133 = vrcp.f32 %v1873_v8  ;;  %v7505_v8 = vld [vmem:[#allocation64_spill] sm:$0xff] }
 0x5ca   :  { %v4132_v30 = vpop.eup %4131 }
 0x5cb   :  { %v1877_v15 = vmul.f32 %v4132_v30, %v1876_v37  ;;  %v4134_v38 = vpop.eup %4133  ;;  %v7512_v37 = vld [vmem:[#allocation70_spill] sm:$0xff]  ;;  %v7513_v30 = vld [vmem:[#allocation45_spill] sm:$0xff] }
 0x5cc   :  { %v1880_v43 = vsub.f32 1.0, %v4134_v38  ;;  %v1882_v32 = vmul.f32 %v4134_v38, %v5456_v17  ;;  %v7515_v38 = vld [vmem:[#allocation49_spill] sm:$0xff] }
 0x5cd   :  { %v1878_v14 = vadd.f32 %v1877_v15, %v7496_v41 }
 0x5cf   :  { %4135 = vtanh.f32 %v1878_v14  ;;  %v7514_v14 = vld [vmem:[#allocation47_spill] sm:$0xff] }
 0x5d9   :  { %v4136_v9 = vpop.eup %4135 }
 0x5da   :  { %v1881_v45 = vmul.f32 %v4136_v9, %v1880_v43  ;;  %v7516_v43 = vld [vmem:[#allocation51_spill] sm:$0xff]  ;;  %v5800_v9 = vld [vmem:[#allocation8 + $0x2ac] ss:$24 sps:$4 sm:$0xff]  }
 0x5db   :  { %7517 = vst [vmem:[#allocation76_spill] sm:$0xff] %v5800_v9 }
 0x5dc   :  { %v5745_v47 = vadd.f32 %v1882_v32, %v1881_v45  ;;  %v5803_v32 = vld [vmem:[#allocation8 + $0x2a8] ss:$24 sps:$4 sm:$0xff]   ;;  %v5806_v45 = vld [vmem:[#allocation8 + $0x2dc] ss:$24 sps:$4 sm:$0xff]  }
 0x5dd   :  { %7518 = vst [vmem:[#allocation77_spill] sm:$0xff] %v5803_v32  ;;  %7519 = vst [vmem:[#allocation75_spill] sm:$0xff] %v5806_v45 }
 0x5de   :  { %v5749_v0 = vpack.c.bf16 %v5745_v47, %v5745_v47 }
 0x5e0   :  { %1918 = vmatmul.mubr.bf16.vlgmr.msra.gmra.mrb[36].mxu1 %v5749_v0 }
 0x5e1   :  { %3710 = vmatpush3.bf16.msra.mxu1 %v5220_v60  ;;  %3725 = vmatprep.mubr.msk.bf16.mxu1 %vm4645_vm0, %v7342_v34 }
 0x5e2   :  { %3711 = vmatprep.subr.bf16.mxu1 %v7342_v34 }
 0x5e5   :  { %3712 = vmatpush3.bf16.msra.mxu1 %v5228_v20  ;;  %v7497_v20 = vld [vmem:[#allocation56_spill] sm:$0xff] }
 0x5e6   :  { %3713 = vmatprep.subr.bf16.mxu1 %v7342_v34 }
 0x5e9   :  { %3714 = vmatpush3.bf16.msra.mxu1 %v5234_v24  ;;  %v7498_v24 = vld [vmem:[#allocation34_spill] sm:$0xff] }
 0x5ea   :  { %3715 = vmatprep.subr.bf16.mxu1 %v7342_v34 }
 0x5ed   :  { %3716 = vmatpush3.bf16.msra.mxu1 %v5238_v29  ;;  %v7499_v29 = vld [vmem:[#allocation35_spill] sm:$0xff] }
 0x5ee   :  { %v1852_v17 = vpop.f32.mrb[36].mxu0  ;;  %3717 = vmatprep.subr.bf16.mxu1 %v7342_v34 }
 0x5ef   :  { %v5762_v41 = vpop.f32.mrb[37].mxu0 }
 0x5f0   :  { %v1856_v60 = vpop.f32.mrb[38].mxu0 }
 0x5f1   :  { %v1857_v15 = vpop.f32.mrb[39].mxu0  ;;  %3718 = vmatpush3.bf16.msra.mxu1 %v5242_v61  ;;  %v7500_v61 = vld [vmem:[#allocation58_spill] sm:$0xff]  ;;  %v5809_v60 = vld [vmem:[#allocation8 + $0x2d8] ss:$24 sps:$4 sm:$0xff]  }
 0x5f2   :  { %3719 = vmatprep.subr.bf16.mxu1 %v7342_v34  ;;  %7520 = vst [vmem:[#allocation56_spill] sm:$0xff] %v5809_v60  ;;  %v5812_v15 = vld [vmem:[#allocation9 + $0x4] ss:$16 sps:$4 sm:$0xff]  }
 0x5f3   :  { %7521 = vst [vmem:[#allocation34_spill] sm:$0xff] %v5812_v15 }
 0x5f5   :  { %3720 = vmatpush3.bf16.msra.mxu1 %v5246_v1  ;;  %v7501_v1 = vld [vmem:[#allocation60_spill] sm:$0xff] }
 0x5f6   :  { %3721 = vmatprep.subr.bf16.mxu1 %v7342_v34 }
 0x5f9   :  { %3722 = vmatpush3.bf16.msra.mxu1 %v5250_v3  ;;  %v7502_v3 = vld [vmem:[#allocation36_spill] sm:$0xff] }
 0x5fa   :  { %3723 = vmatprep.subr.bf16.mxu1 %v7342_v34 }
 0x5fd   :  { %3724 = vmatpush3.bf16.msra.mxu1 %v5254_v52  ;;  %v7503_v52 = vld [vmem:[#allocation37_spill] sm:$0xff] }
 0x5fe   :  { %2030 = vmatprep.subr.bf16.mxu1 %v5258_v46  ;;  %v7504_v46 = vld [vmem:[#allocation62_spill] sm:$0xff] }
 0x600   :  { %3726 = vmatmul.mubr.bf16.vlgmr.msra.gmra.mrb[40].mxu1 %v5749_v0 }
 0x601   :  { %2031 = vmatpush1.bf16.msra.mxu1 %v5486_v54 }
 0x602   :  { %2032 = vmatprep.subr.bf16.mxu1 %v5489_v19 }
 0x605   :  { %2033 = vmatpush1.bf16.msra.mxu1 %v5492_v21 }
 0x606   :  { %2034 = vmatprep.subr.bf16.mxu1 %v5495_v23 }
 0x609   :  { %2035 = vmatpush1.bf16.msra.mxu1 %v5498_v28 }
 0x60a   :  { %2036 = vmatprep.subr.bf16.mxu1 %v5501_v25 }
 0x60d   :  { %2037 = vmatpush1.bf16.msra.mxu1 %v5504_v33 }
 0x60e   :  { %2038 = vmatprep.subr.bf16.mxu1 %v7497_v20 }
 0x611   :  { %2039 = vmatpush1.bf16.msra.mxu1 %v7498_v24 }
 0x612   :  { %2040 = vmatprep.subr.bf16.mxu1 %v7499_v29 }
 0x615   :  { %2041 = vmatpush1.bf16.msra.mxu1 %v7500_v61 }
 0x616   :  { %2042 = vmatprep.subr.bf16.mxu1 %v7501_v1 }
 0x619   :  { %2043 = vmatpush1.bf16.msra.mxu1 %v7502_v3 }
 0x61a   :  { %2044 = vmatprep.subr.bf16.mxu1 %v7503_v52 }
 0x61d   :  { %2045 = vmatpush1.bf16.msra.mxu1 %v7504_v46 }
 0x61e   :  { %2046 = vmatprep.subr.bf16.mxu1 %v7505_v8 }
 0x621   :  { %2047 = vmatpush1.bf16.msra.mxu1 %v7506_v56 }
 0x622   :  { %2048 = vmatprep.subr.bf16.mxu1 %v7507_v49 }
 0x625   :  { %2049 = vmatpush1.bf16.msra.mxu1 %v7508_v50 }
 0x626   :  { %2050 = vmatprep.subr.bf16.mxu1 %v7509_v44 }
 0x629   :  { %2051 = vmatpush1.bf16.msra.mxu1 %v7510_v53 }
 0x62a   :  { %2052 = vmatprep.subr.bf16.mxu1 %v7511_v31 }
 0x62d   :  { %2053 = vmatpush1.bf16.msra.mxu1 %v7512_v37 }
 0x62e   :  { %2054 = vmatprep.subr.bf16.mxu1 %v7513_v30 }
 0x631   :  { %2055 = vmatpush1.bf16.msra.mxu1 %v7514_v14 }
 0x632   :  { %2056 = vmatprep.subr.bf16.mxu1 %v7515_v38  ;;  %v7522_v38 = vld [vmem:[#allocation17_spill] sm:$0xff] }
 0x635   :  { %2057 = vmatpush1.bf16.msra.mxu1 %v7516_v43 }
 0x636   :  { %2058 = vmatprep.subr.bf16.mxu1 %v5800_v9 }
 0x639   :  { %2059 = vmatpush1.bf16.msra.mxu1 %v5803_v32 }
 0x63a   :  { %2060 = vmatprep.subr.bf16.mxu1 %v5806_v45 }
 0x63d   :  { %2061 = vmatpush1.bf16.msra.mxu1 %v5809_v60 }
 0x63e   :  { %2138 = vmatprep.subr.bf16.mxu1 %v5812_v15  ;;  %v1980_v15 = vadd.f32 %v5762_v41, %v5306_v57 }
 0x6b3   :  { %v1919_v43 = vpop.f32.mrb[36].mxu1 }
 0x6b4   :  { %v1920_v14 = vadd.f32 %v1919_v43, %v7522_v38  ;;  %v1921_v9 = vpop.f32.mrb[37].mxu1 }
 0x6b5   :  { %v1922_v30 = vadd.f32 %v1921_v9, %v5299_v6  ;;  %v1923_v37 = vpop.f32.mrb[38].mxu1 }
 0x6b6   :  { %v1966_v32 = vadd.f32 %v1920_v14, %v5739_v51  ;;  %v1924_v31 = vpop.f32.mrb[39].mxu1 }
 0x6b7   :  { %v1973_v53 = vadd.f32 %v1922_v30, %v1852_v17 }
 0x6b8   :  { %v3522_v45 = vmul.f32 -1.442695, %v1966_v32 }
 0x6b9   :  { %v3523_v44 = vmul.f32 -1.442695, %v1973_v53 }
 0x6ba   :  { %4137 = vpow2.f32 %v3522_v45 }
 0x6bb   :  { %4139 = vpow2.f32 %v3523_v44 }
 0x6c4   :  { %v4138_v60 = vpop.eup %4137 }
 0x6c5   :  { %v1970_v50 = vadd.f32 1.0, %v4138_v60  ;;  %v4140_v49 = vpop.eup %4139  ;;  %v5848_v60 = vld [vmem:[#allocation9 + $0x64] ss:$16 sps:$4 sm:$0xff]  }
 0x6c6   :  { %v1977_v43 = vadd.f32 1.0, %v4140_v49  ;;  %v5840_v49 = vld [vmem:[#allocation9 + $0x44] ss:$16 sps:$4 sm:$0xff]  }
 0x6c7   :  { %4141 = vrcp.f32 %v1970_v50 }
 0x6c8   :  { %4143 = vrcp.f32 %v1977_v43  ;;  %v5856_v43 = vld [vmem:[#allocation9 + $0x84] ss:$16 sps:$4 sm:$0xff]  }
 0x6d1   :  { %v4142_v38 = vpop.eup %4141 }
 0x6d2   :  { %v1981_v56 = vmul.f32 %v4142_v38, %v1980_v15  ;;  %v4144_v44 = vpop.eup %4143  ;;  %v5845_v38 = vld [vmem:[#allocation9 + $0x40] ss:$16 sps:$4 sm:$0xff]  }
 0x6d3   :  { %v1960_v9 = vpop.f32.mrb[40].mxu1  ;;  %v1984_v53 = vsub.f32 1.0, %v4144_v44  ;;  %v1986_v32 = vmul.f32 %v4144_v44, %v5580_v55  ;;  %v5837_v55 = vld [vmem:[#allocation9 + $0x20] ss:$16 sps:$4 sm:$0xff]  }
 0x6d4   :  { %v1961_v51 = vadd.f32 %v1960_v9, %v5310_v40  ;;  %v3727_v31 = vpop.f32.mrb[41].mxu1  ;;  %v5853_v15 = vld [vmem:[#allocation9 + $0x60] ss:$16 sps:$4 sm:$0xff]  }
 0x6d5   :  { %v1963_v17 = vpop.f32.mrb[42].mxu1  ;;  %v5861_v9 = vld [vmem:[#allocation9 + $0x80] ss:$16 sps:$4 sm:$0xff]  }
 0x6d6   :  { %v1982_v37 = vadd.f32 %v1981_v56, %v1961_v51  ;;  %v3728_v30 = vpop.f32.mrb[43].mxu1  ;;  %v5831_v56 = vld [vmem:[#allocation9 + $0x24] ss:$16 sps:$4 sm:$0xff]   ;;  %v5869_v31 = vld [vmem:[#allocation9 + $0xa0] ss:$16 sps:$4 sm:$0xff]  }
 0x6d7   :  { %v5864_v51 = vld [vmem:[#allocation9 + $0xa4] ss:$16 sps:$4 sm:$0xff]   ;;  %7523 = vst [vmem:[#allocation35_spill] sm:$0xff] %v5869_v31  ;;  %v5885_v44 = vld [vmem:[#allocation9 + $0xe0] ss:$16 sps:$4 sm:$0xff]  }
 0x6d8   :  { %4145 = vtanh.f32 %v1982_v37  ;;  %v5872_v17 = vld [vmem:[#allocation9 + $0xc4] ss:$16 sps:$4 sm:$0xff]   ;;  %v5877_v37 = vld [vmem:[#allocation9 + $0xc0] ss:$16 sps:$4 sm:$0xff]   ;;  %7527 = vst [vmem:[#allocation37_spill] sm:$0xff] %v5885_v44 }
 0x6d9   :  { %7524 = vst [vmem:[#allocation58_spill] sm:$0xff] %v5872_v17  ;;  %7525 = vst [vmem:[#allocation60_spill] sm:$0xff] %v5877_v37  ;;  %v5880_v30 = vld [vmem:[#allocation9 + $0xe4] ss:$16 sps:$4 sm:$0xff]  }
 0x6da   :  { %7526 = vst [vmem:[#allocation36_spill] sm:$0xff] %v5880_v30 }
 0x6e2   :  { %v4146_v14 = vpop.eup %4145 }
 0x6e3   :  { %v1985_v50 = vmul.f32 %v4146_v14, %v1984_v53  ;;  %v7528_v53 = vld [vmem:[#allocation71_spill] sm:$0xff]  ;;  %v7529_v14 = vld [vmem:[#allocation72_spill] sm:$0xff] }
 0x6e5   :  { %v5822_v45 = vadd.f32 %v1986_v32, %v1985_v50  ;;  %v7530_v50 = vld [vmem:[#allocation73_spill] sm:$0xff]  ;;  %v7531_v32 = vld [vmem:[#allocation74_spill] sm:$0xff] }
 0x6e7   :  { %v1988_v41 = vpack.c.bf16 %v5822_v45, %v5822_v45 }
 0x6e9   :  { %2021 = vmatprep.mubr.bf16.mxu0 %v1988_v41  ;;  %2062 = vmatprep.mubr.bf16.mxu1 %v1988_v41 }
 0x6ea   :  { %2022 = vmatmul.mubr.bf16.vlgmr.msra.gmra.mrb[40].mxu0 %v5749_v0  ;;  %2063 = vmatmul.mubr.bf16.vlgmr.msra.gmra.mrb[44].mxu1 %v5749_v0 }
 0x6eb   :  { %2072 = vmatpush1.bf16.msra.mxu0 %v5586_v4  ;;  %2103 = vmatprep.mubr.bf16.mxu0 %v1988_v41  ;;  %v7532_v41 = vld [vmem:[#allocation94_spill] sm:$0xff] }
 0x6ec   :  { %2073 = vmatprep.subr.bf16.mxu0 %v5589_v22  ;;  %2139 = vmatpush1.bf16.msra.mxu1 %v5592_v59 }
 0x6ed   :  { %2140 = vmatprep.subr.bf16.mxu1 %v5831_v56  ;;  %2170 = vmatprep.mubr.bf16.mxu1 %v7358_v42 }
 0x6ef   :  { %2074 = vmatpush1.bf16.msra.mxu0 %v5597_v58 }
 0x6f0   :  { %2075 = vmatprep.subr.bf16.mxu0 %v5600_v63  ;;  %2141 = vmatpush1.bf16.msra.mxu1 %v5837_v55 }
 0x6f1   :  { %2142 = vmatprep.subr.bf16.mxu1 %v5840_v49 }
 0x6f3   :  { %2076 = vmatpush1.bf16.msra.mxu0 %v5605_v11 }
 0x6f4   :  { %2077 = vmatprep.subr.bf16.mxu0 %v5608_v26  ;;  %2143 = vmatpush1.bf16.msra.mxu1 %v5845_v38 }
 0x6f5   :  { %2144 = vmatprep.subr.bf16.mxu1 %v5848_v60 }
 0x6f7   :  { %2078 = vmatpush1.bf16.msra.mxu0 %v5613_v18 }
 0x6f8   :  { %2079 = vmatprep.subr.bf16.mxu0 %v5616_v13  ;;  %2145 = vmatpush1.bf16.msra.mxu1 %v5853_v15 }
 0x6f9   :  { %2146 = vmatprep.subr.bf16.mxu1 %v5856_v43 }
 0x6fb   :  { %2080 = vmatpush1.bf16.msra.mxu0 %v5621_v36 }
 0x6fc   :  { %2081 = vmatprep.subr.bf16.mxu0 %v5624_v39  ;;  %2147 = vmatpush1.bf16.msra.mxu1 %v5861_v9 }
 0x6fd   :  { %2148 = vmatprep.subr.bf16.mxu1 %v5864_v51 }
 0x6ff   :  { %2082 = vmatpush1.bf16.msra.mxu0 %v5629_v48  ;;  %v7575_v48 = vld [vmem:[#allocation78_spill] sm:$0xff] }
 0x700   :  { %2083 = vmatprep.subr.bf16.mxu0 %v5632_v62  ;;  %2149 = vmatpush1.bf16.msra.mxu1 %v5869_v31 }
 0x701   :  { %2150 = vmatprep.subr.bf16.mxu1 %v5872_v17 }
 0x703   :  { %2084 = vmatpush1.bf16.msra.mxu0 %v5637_v10 }
 0x704   :  { %2085 = vmatprep.subr.bf16.mxu0 %v5640_v12  ;;  %2151 = vmatpush1.bf16.msra.mxu1 %v5877_v37 }
 0x705   :  { %2152 = vmatprep.subr.bf16.mxu1 %v5880_v30 }
 0x707   :  { %2086 = vmatpush1.bf16.msra.mxu0 %v5645_v16  ;;  %v7573_v16 = vld [vmem:[#allocation79_spill] sm:$0xff] }
 0x708   :  { %2087 = vmatprep.subr.bf16.mxu0 %v5648_v5  ;;  %2153 = vmatpush1.bf16.msra.mxu1 %v5885_v44  ;;  %v7533_v5 = vld [vmem:[#allocation95_spill] sm:$0xff]  ;;  %v5898_v44 = vld [vmem:[#allocation8 + $0x284] ss:$24 sps:$4 sm:$0xff]  }
 0x709   :  { %3729 = vmatprep.subr.bf16.mxu1 %v7342_v34  ;;  %7534 = vst [vmem:[#allocation62_spill] sm:$0xff] %v5898_v44 }
 0x70b   :  { %2088 = vmatpush1.bf16.msra.mxu0 %v5653_v2  ;;  %v5901_v2 = vld [vmem:[#allocation8 + $0x280] ss:$24 sps:$4 sm:$0xff]  }
 0x70c   :  { %2089 = vmatprep.subr.bf16.mxu0 %v5656_v7  ;;  %7535 = vst [vmem:[#allocation64_spill] sm:$0xff] %v5901_v2  ;;  %v7548_v7 = vld [vmem:[#allocation40_spill] sm:$0xff] }
 0x70f   :  { %2090 = vmatpush1.bf16.msra.mxu0 %v5659_v35  ;;  %v5904_v35 = vld [vmem:[#allocation8 + $0x2b4] ss:$24 sps:$4 sm:$0xff]  }
 0x710   :  { %2091 = vmatprep.subr.bf16.mxu0 %v7528_v53  ;;  %7536 = vst [vmem:[#allocation105_spill] sm:$0xff] %v5904_v35  ;;  %v7546_v53 = vld [vmem:[#allocation24_spill] sm:$0xff] }
 0x713   :  { %2092 = vmatpush1.bf16.msra.mxu0 %v7529_v14  ;;  %v5907_v14 = vld [vmem:[#allocation8 + $0x2b0] ss:$24 sps:$4 sm:$0xff]  }
 0x714   :  { %2093 = vmatprep.subr.bf16.mxu0 %v7530_v50  ;;  %7537 = vst [vmem:[#allocation106_spill] sm:$0xff] %v5907_v14  ;;  %v7544_v50 = vld [vmem:[#allocation22_spill] sm:$0xff] }
 0x717   :  { %2094 = vmatpush1.bf16.msra.mxu0 %v7531_v32  ;;  %v5910_v32 = vld [vmem:[#allocation8 + $0x2e4] ss:$24 sps:$4 sm:$0xff]  }
 0x718   :  { %2095 = vmatprep.subr.bf16.mxu0 %v7532_v41  ;;  %7538 = vst [vmem:[#allocation107_spill] sm:$0xff] %v5910_v32  ;;  %v7542_v41 = vld [vmem:[#allocation20_spill] sm:$0xff] }
 0x71b   :  { %2096 = vmatpush1.bf16.msra.mxu0 %v7533_v5  ;;  %v5913_v5 = vld [vmem:[#allocation8 + $0x2e0] ss:$24 sps:$4 sm:$0xff]  }
 0x71c   :  { %2097 = vmatprep.subr.bf16.mxu0 %v5898_v44  ;;  %7539 = vst [vmem:[#allocation108_spill] sm:$0xff] %v5913_v5  ;;  %v7540_v44 = vld [vmem:[#allocation18_spill] sm:$0xff] }
 0x71f   :  { %2098 = vmatpush1.bf16.msra.mxu0 %v5901_v2  ;;  %v7541_v2 = vld [vmem:[#allocation19_spill] sm:$0xff] }
 0x720   :  { %2099 = vmatprep.subr.bf16.mxu0 %v5904_v35  ;;  %v7543_v35 = vld [vmem:[#allocation21_spill] sm:$0xff] }
 0x723   :  { %2100 = vmatpush1.bf16.msra.mxu0 %v5907_v14  ;;  %v7545_v14 = vld [vmem:[#allocation23_spill] sm:$0xff] }
 0x724   :  { %2101 = vmatprep.subr.bf16.mxu0 %v5910_v32  ;;  %v7547_v32 = vld [vmem:[#allocation25_spill] sm:$0xff] }
 0x727   :  { %2102 = vmatpush1.bf16.msra.mxu0 %v5913_v5  ;;  %v7549_v5 = vld [vmem:[#allocation26_spill] sm:$0xff] }
 0x728   :  { %2242 = vmatprep.subr.bf16.mxu0 %v7540_v44  ;;  %v7550_v44 = vld [vmem:[#allocation27_spill] sm:$0xff] }
 0x72a   :  { %2104 = vmatmul.mubr.bf16.vlgmr.msra.gmra.mrb[44].mxu0 %v5749_v0  ;;  %v7551_v0 = vld [vmem:[#allocation42_spill] sm:$0xff] }
 0x72b   :  { %2243 = vmatpush1.bf16.msra.mxu0 %v7541_v2  ;;  %v7552_v2 = vld [vmem:[#allocation44_spill] sm:$0xff] }
 0x72c   :  { %2244 = vmatprep.subr.bf16.mxu0 %v7542_v41  ;;  %v7553_v41 = vld [vmem:[#allocation28_spill] sm:$0xff] }
 0x72f   :  { %2245 = vmatpush1.bf16.msra.mxu0 %v7543_v35  ;;  %v7554_v35 = vld [vmem:[#allocation29_spill] sm:$0xff] }
 0x730   :  { %2246 = vmatprep.subr.bf16.mxu0 %v7544_v50  ;;  %v7555_v50 = vld [vmem:[#allocation46_spill] sm:$0xff] }
 0x733   :  { %2247 = vmatpush1.bf16.msra.mxu0 %v7545_v14  ;;  %v7556_v14 = vld [vmem:[#allocation48_spill] sm:$0xff] }
 0x734   :  { %2248 = vmatprep.subr.bf16.mxu0 %v7546_v53  ;;  %v7557_v53 = vld [vmem:[#allocation30_spill] sm:$0xff] }
 0x737   :  { %2249 = vmatpush1.bf16.msra.mxu0 %v7547_v32  ;;  %v7558_v32 = vld [vmem:[#allocation31_spill] sm:$0xff] }
 0x738   :  { %2250 = vmatprep.subr.bf16.mxu0 %v7548_v7  ;;  %v7559_v7 = vld [vmem:[#allocation50_spill] sm:$0xff] }
 0x73b   :  { %2251 = vmatpush1.bf16.msra.mxu0 %v7549_v5  ;;  %v7560_v5 = vld [vmem:[#allocation52_spill] sm:$0xff] }
 0x73c   :  { %2252 = vmatprep.subr.bf16.mxu0 %v7550_v44  ;;  %v7561_v44 = vld [vmem:[#allocation32_spill] sm:$0xff] }
 0x73f   :  { %2253 = vmatpush1.bf16.msra.mxu0 %v7551_v0  ;;  %v7562_v0 = vld [vmem:[#allocation33_spill] sm:$0xff] }
 0x740   :  { %2254 = vmatprep.subr.bf16.mxu0 %v7552_v2  ;;  %v7563_v2 = vld [vmem:[#allocation54_spill] sm:$0xff] }
 0x743   :  { %2255 = vmatpush1.bf16.msra.mxu0 %v7553_v41  ;;  %v7564_v41 = vld [vmem:[#allocation96_spill] sm:$0xff] }
 0x744   :  { %2256 = vmatprep.subr.bf16.mxu0 %v7554_v35  ;;  %v7565_v35 = vld [vmem:[#allocation97_spill] sm:$0xff] }
 0x747   :  { %2257 = vmatpush1.bf16.msra.mxu0 %v7555_v50  ;;  %v7566_v50 = vld [vmem:[#allocation98_spill] sm:$0xff] }
 0x748   :  { %2258 = vmatprep.subr.bf16.mxu0 %v7556_v14  ;;  %v7567_v14 = vld [vmem:[#allocation99_spill] sm:$0xff] }
 0x74b   :  { %2259 = vmatpush1.bf16.msra.mxu0 %v7557_v53  ;;  %v7568_v53 = vld [vmem:[#allocation100_spill] sm:$0xff] }
 0x74c   :  { %2260 = vmatprep.subr.bf16.mxu0 %v7558_v32  ;;  %v7569_v32 = vld [vmem:[#allocation101_spill] sm:$0xff] }
 0x74f   :  { %2261 = vmatpush1.bf16.msra.mxu0 %v7559_v7  ;;  %v7570_v7 = vld [vmem:[#allocation102_spill] sm:$0xff] }
 0x750   :  { %2262 = vmatprep.subr.bf16.mxu0 %v7560_v5  ;;  %v7571_v5 = vld [vmem:[#allocation103_spill] sm:$0xff] }
 0x753   :  { %2263 = vmatpush1.bf16.msra.mxu0 %v7561_v44  ;;  %v7572_v44 = vld [vmem:[#allocation104_spill] sm:$0xff] }
 0x754   :  { %2264 = vmatprep.subr.bf16.mxu0 %v7562_v0 }
 0x757   :  { %2265 = vmatpush1.bf16.msra.mxu0 %v7563_v2 }
 0x758   :  { %2266 = vmatprep.subr.bf16.mxu0 %v7564_v41 }
 0x75b   :  { %2267 = vmatpush1.bf16.msra.mxu0 %v7565_v35 }
 0x75c   :  { %2268 = vmatprep.subr.bf16.mxu0 %v7566_v50  ;;  %v7574_v50 = vld [vmem:[#allocation80_spill] sm:$0xff] }
 0x75f   :  { %2269 = vmatpush1.bf16.msra.mxu0 %v7567_v14 }
 0x760   :  { %2270 = vmatprep.subr.bf16.mxu0 %v7568_v53 }
 0x763   :  { %2271 = vmatpush1.bf16.msra.mxu0 %v7569_v32 }
 0x764   :  { %2272 = vmatprep.subr.bf16.mxu0 %v7570_v7 }
 0x767   :  { %2273 = vmatpush1.bf16.msra.mxu0 %v7571_v5 }
 0x768   :  { %2324 = vmatprep.subr.bf16.mxu0 %v7572_v44 }
 0x7bd   :  { %v2023_v0 = vpop.f32.mrb[40].mxu0  ;;  %v2064_v2 = vpop.f32.mrb[44].mxu1 }
 0x7be   :  { %v2115_v41 = vadd.f32 %v2023_v0, %v7573_v16  ;;  %v2025_v30 = vpop.f32.mrb[41].mxu0  ;;  %v5951_v35 = vpop.f32.mrb[45].mxu1  ;;  %v2129_v16 = vadd.f32 %v2064_v2, %v5213_v27  ;;  %v5988_v2 = vld [vmem:[#allocation9 + $0xa8] ss:$16 sps:$4 sm:$0xff]  }
 0x7bf   :  { %v2122_v37 = vadd.f32 %v2025_v30, %v7574_v50  ;;  %v2027_v14 = vpop.f32.mrb[42].mxu0  ;;  %v2068_v12 = vpop.f32.mrb[46].mxu1 }
 0x7c0   :  { %v3524_v53 = vmul.f32 -1.442695, %v2115_v41  ;;  %v2028_v10 = vpop.f32.mrb[43].mxu0  ;;  %v2069_v32 = vpop.f32.mrb[47].mxu1 }
 0x7c1   :  { %v3525_v7 = vmul.f32 -1.442695, %v2122_v37 }
 0x7c2   :  { %4147 = vpow2.f32 %v3524_v53  ;;  %v5964_v53 = vld [vmem:[#allocation9 + $0x8] ss:$16 sps:$4 sm:$0xff]  }
 0x7c3   :  { %4149 = vpow2.f32 %v3525_v7 }
 0x7cc   :  { %v4148_v5 = vpop.eup %4147 }
 0x7cd   :  { %v2119_v17 = vadd.f32 1.0, %v4148_v5  ;;  %v4150_v44 = vpop.eup %4149 }
 0x7ce   :  { %v2126_v31 = vadd.f32 1.0, %v4150_v44  ;;  %v5984_v44 = vld [vmem:[#allocation9 + $0x88] ss:$16 sps:$4 sm:$0xff]  }
 0x7cf   :  { %4151 = vrcp.f32 %v2119_v17 }
 0x7d0   :  { %4153 = vrcp.f32 %v2126_v31 }
 0x7d9   :  { %v4152_v0 = vpop.eup %4151 }
 0x7da   :  { %v2130_v62 = vmul.f32 %v4152_v0, %v2129_v16  ;;  %v4154_v12 = vpop.eup %4153  ;;  %v5992_v16 = vld [vmem:[#allocation9 + $0xc8] ss:$16 sps:$4 sm:$0xff]  }
 0x7db   :  { %v2133_v41 = vsub.f32 1.0, %v4154_v12  ;;  %v2135_v50 = vmul.f32 %v4154_v12, %v5745_v47  ;;  %v5978_v47 = vld [vmem:[#allocation9 + $0x68] ss:$16 sps:$4 sm:$0xff]  }
 0x7dc   :  { %v2131_v30 = vadd.f32 %v2130_v62, %v7575_v48  ;;  %v5970_v48 = vld [vmem:[#allocation9 + $0x28] ss:$16 sps:$4 sm:$0xff]  }
 0x7dd   :  { %v5974_v62 = vld [vmem:[#allocation9 + $0x48] ss:$16 sps:$4 sm:$0xff]  }
 0x7de   :  { %4155 = vtanh.f32 %v2131_v30  ;;  %v5996_v0 = vld [vmem:[#allocation9 + $0xe8] ss:$16 sps:$4 sm:$0xff]   ;;  %v5999_v30 = vld [vmem:[#allocation8 + $0xc] ss:$24 sps:$4 sm:$0xff]  }
 0x7e8   :  { %v4156_v10 = vpop.eup %4155 }
 0x7e9   :  { %v2134_v37 = vmul.f32 %v4156_v10, %v2133_v41  ;;  %v7592_v41 = vld [vmem:[#allocation17_spill] sm:$0xff] }
 0x7eb   :  { %v5957_v14 = vadd.f32 %v2135_v50, %v2134_v37 }
 0x7ed   :  { %v5961_v17 = vpack.c.bf16 %v5957_v14, %v5957_v14 }
 0x7ef   :  { %2171 = vmatmul.mubr.bf16.vlgmr.msra.gmra.mrb[48].mxu1 %v5961_v17 }
 0x7f0   :  { %3730 = vmatpush3.bf16.msra.mxu1 %v5964_v53  ;;  %3745 = vmatprep.mubr.msk.bf16.mxu1 %vm4645_vm0, %v7342_v34 }
 0x7f1   :  { %3731 = vmatprep.subr.bf16.mxu1 %v7342_v34 }
 0x7f4   :  { %3732 = vmatpush3.bf16.msra.mxu1 %v5970_v48 }
 0x7f5   :  { %3733 = vmatprep.subr.bf16.mxu1 %v7342_v34 }
 0x7f8   :  { %3734 = vmatpush3.bf16.msra.mxu1 %v5974_v62 }
 0x7f9   :  { %3735 = vmatprep.subr.bf16.mxu1 %v7342_v34 }
 0x7fc   :  { %3736 = vmatpush3.bf16.msra.mxu1 %v5978_v47 }
 0x7fd   :  { %v2105_v31 = vpop.f32.mrb[44].mxu0  ;;  %3737 = vmatprep.subr.bf16.mxu1 %v7342_v34 }
 0x7fe   :  { %v5982_v32 = vpop.f32.mrb[45].mxu0 }
 0x7ff   :  { %v2109_v7 = vpop.f32.mrb[46].mxu0 }
 0x800   :  { %v2110_v5 = vpop.f32.mrb[47].mxu0  ;;  %3738 = vmatpush3.bf16.msra.mxu1 %v5984_v44 }
 0x801   :  { %3739 = vmatprep.subr.bf16.mxu1 %v7342_v34 }
 0x804   :  { %3740 = vmatpush3.bf16.msra.mxu1 %v5988_v2 }
 0x805   :  { %3741 = vmatprep.subr.bf16.mxu1 %v7342_v34 }
 0x808   :  { %3742 = vmatpush3.bf16.msra.mxu1 %v5992_v16 }
 0x809   :  { %3743 = vmatprep.subr.bf16.mxu1 %v7342_v34 }
 0x80c   :  { %3744 = vmatpush3.bf16.msra.mxu1 %v5996_v0 }
 0x80d   :  { %2283 = vmatprep.subr.bf16.mxu1 %v5999_v30 }
 0x80f   :  { %3746 = vmatmul.mubr.bf16.vlgmr.msra.gmra.mrb[52].mxu1 %v5961_v17 }
 0x810   :  { %2284 = vmatpush1.bf16.msra.mxu1 %v5486_v54  ;;  %v7576_v54 = vld [vmem:[#allocation38_spill] sm:$0xff] }
 0x811   :  { %2285 = vmatprep.subr.bf16.mxu1 %v5489_v19  ;;  %v7577_v19 = vld [vmem:[#allocation39_spill] sm:$0xff] }
 0x814   :  { %2286 = vmatpush1.bf16.msra.mxu1 %v5492_v21  ;;  %v7578_v21 = vld [vmem:[#allocation66_spill] sm:$0xff] }
 0x815   :  { %2287 = vmatprep.subr.bf16.mxu1 %v5495_v23  ;;  %v7579_v23 = vld [vmem:[#allocation68_spill] sm:$0xff] }
 0x818   :  { %2288 = vmatpush1.bf16.msra.mxu1 %v5498_v28  ;;  %v7580_v28 = vld [vmem:[#allocation41_spill] sm:$0xff] }
 0x819   :  { %2289 = vmatprep.subr.bf16.mxu1 %v5501_v25  ;;  %v7581_v25 = vld [vmem:[#allocation43_spill] sm:$0xff] }
 0x81c   :  { %2290 = vmatpush1.bf16.msra.mxu1 %v5504_v33  ;;  %v7582_v33 = vld [vmem:[#allocation70_spill] sm:$0xff] }
 0x81d   :  { %2291 = vmatprep.subr.bf16.mxu1 %v7497_v20  ;;  %v7583_v20 = vld [vmem:[#allocation45_spill] sm:$0xff] }
 0x820   :  { %2292 = vmatpush1.bf16.msra.mxu1 %v7498_v24  ;;  %v7584_v24 = vld [vmem:[#allocation47_spill] sm:$0xff] }
 0x821   :  { %2293 = vmatprep.subr.bf16.mxu1 %v7499_v29  ;;  %v7585_v29 = vld [vmem:[#allocation49_spill] sm:$0xff] }
 0x824   :  { %2294 = vmatpush1.bf16.msra.mxu1 %v7500_v61  ;;  %v7586_v61 = vld [vmem:[#allocation51_spill] sm:$0xff] }
 0x825   :  { %2295 = vmatprep.subr.bf16.mxu1 %v7501_v1  ;;  %v7587_v1 = vld [vmem:[#allocation76_spill] sm:$0xff] }
 0x828   :  { %2296 = vmatpush1.bf16.msra.mxu1 %v7502_v3  ;;  %v7588_v3 = vld [vmem:[#allocation77_spill] sm:$0xff] }
 0x829   :  { %2297 = vmatprep.subr.bf16.mxu1 %v7503_v52  ;;  %v7589_v52 = vld [vmem:[#allocation75_spill] sm:$0xff] }
 0x82c   :  { %2298 = vmatpush1.bf16.msra.mxu1 %v7504_v46  ;;  %v7590_v46 = vld [vmem:[#allocation56_spill] sm:$0xff] }
 0x82d   :  { %2299 = vmatprep.subr.bf16.mxu1 %v7505_v8  ;;  %v7591_v8 = vld [vmem:[#allocation34_spill] sm:$0xff] }
 0x830   :  { %2300 = vmatpush1.bf16.msra.mxu1 %v7576_v54 }
 0x831   :  { %2301 = vmatprep.subr.bf16.mxu1 %v7577_v19 }
 0x834   :  { %2302 = vmatpush1.bf16.msra.mxu1 %v7578_v21 }
 0x835   :  { %2303 = vmatprep.subr.bf16.mxu1 %v7579_v23 }
 0x838   :  { %2304 = vmatpush1.bf16.msra.mxu1 %v7580_v28 }
 0x839   :  { %2305 = vmatprep.subr.bf16.mxu1 %v7581_v25 }
 0x83c   :  { %2306 = vmatpush1.bf16.msra.mxu1 %v7582_v33 }
 0x83d   :  { %2307 = vmatprep.subr.bf16.mxu1 %v7583_v20  ;;  %v2233_v20 = vadd.f32 %v5982_v32, %v5306_v57 }
 0x840   :  { %2308 = vmatpush1.bf16.msra.mxu1 %v7584_v24 }
 0x841   :  { %2309 = vmatprep.subr.bf16.mxu1 %v7585_v29 }
 0x844   :  { %2310 = vmatpush1.bf16.msra.mxu1 %v7586_v61 }
 0x845   :  { %2311 = vmatprep.subr.bf16.mxu1 %v7587_v1 }
 0x848   :  { %2312 = vmatpush1.bf16.msra.mxu1 %v7588_v3 }
 0x849   :  { %2313 = vmatprep.subr.bf16.mxu1 %v7589_v52 }
 0x84c   :  { %2314 = vmatpush1.bf16.msra.mxu1 %v7590_v46 }
 0x84d   :  { %2391 = vmatprep.subr.bf16.mxu1 %v7591_v8 }
 0x8c2   :  { %v2172_v12 = vpop.f32.mrb[48].mxu1 }
 0x8c3   :  { %v2173_v10 = vadd.f32 %v2172_v12, %v7592_v41  ;;  %v2174_v50 = vpop.f32.mrb[49].mxu1 }
 0x8c4   :  { %v2175_v37 = vadd.f32 %v2174_v50, %v5299_v6  ;;  %v2176_v7 = vpop.f32.mrb[50].mxu1 }
 0x8c5   :  { %v2219_v5 = vadd.f32 %v2173_v10, %v5951_v35  ;;  %v2177_v54 = vpop.f32.mrb[51].mxu1 }
 0x8c6   :  { %v2226_v19 = vadd.f32 %v2175_v37, %v2105_v31 }
 0x8c7   :  { %v3526_v21 = vmul.f32 -1.442695, %v2219_v5 }
 0x8c8   :  { %v3527_v23 = vmul.f32 -1.442695, %v2226_v19 }
 0x8c9   :  { %4157 = vpow2.f32 %v3526_v21 }
 0x8ca   :  { %4159 = vpow2.f32 %v3527_v23 }
 0x8d3   :  { %v4158_v28 = vpop.eup %4157 }
 0x8d4   :  { %v2223_v25 = vadd.f32 1.0, %v4158_v28  ;;  %v4160_v33 = vpop.eup %4159  ;;  %v7605_v28 = vld [vmem:[#allocation67_spill] sm:$0xff] }
 0x8d5   :  { %v2230_v24 = vadd.f32 1.0, %v4160_v33  ;;  %v7607_v33 = vld [vmem:[#allocation71_spill] sm:$0xff] }
 0x8d6   :  { %4161 = vrcp.f32 %v2223_v25  ;;  %v7606_v25 = vld [vmem:[#allocation69_spill] sm:$0xff] }
 0x8d7   :  { %4163 = vrcp.f32 %v2230_v24  ;;  %v7609_v24 = vld [vmem:[#allocation73_spill] sm:$0xff] }
 0x8e0   :  { %v4162_v29 = vpop.eup %4161 }
 0x8e1   :  { %v2234_v61 = vmul.f32 %v4162_v29, %v2233_v20  ;;  %v4164_v7 = vpop.eup %4163  ;;  %v7608_v20 = vld [vmem:[#allocation72_spill] sm:$0xff]  ;;  %v7610_v29 = vld [vmem:[#allocation74_spill] sm:$0xff] }
 0x8e2   :  { %v2213_v12 = vpop.f32.mrb[52].mxu1  ;;  %v2237_v5 = vsub.f32 1.0, %v4164_v7  ;;  %v2239_v21 = vmul.f32 %v4164_v7, %v5822_v45  ;;  %v7604_v45 = vld [vmem:[#allocation65_spill] sm:$0xff]  ;;  %v7618_v7 = vld [vmem:[#allocation108_spill] sm:$0xff] }
 0x8e3   :  { %v2214_v35 = vadd.f32 %v2213_v12, %v5310_v40  ;;  %v3747_v10 = vpop.f32.mrb[53].mxu1  ;;  %v7612_v12 = vld [vmem:[#allocation95_spill] sm:$0xff] }
 0x8e4   :  { %v2216_v31 = vpop.f32.mrb[54].mxu1  ;;  %v7614_v10 = vld [vmem:[#allocation64_spill] sm:$0xff] }
 0x8e5   :  { %v2235_v50 = vadd.f32 %v2234_v61, %v2214_v35  ;;  %v3748_v37 = vpop.f32.mrb[55].mxu1  ;;  %v7611_v61 = vld [vmem:[#allocation94_spill] sm:$0xff]  ;;  %v7615_v31 = vld [vmem:[#allocation105_spill] sm:$0xff] }
 0x8e6   :  { %v7613_v35 = vld [vmem:[#allocation62_spill] sm:$0xff]  ;;  %v7617_v37 = vld [vmem:[#allocation107_spill] sm:$0xff] }
 0x8e7   :  { %4165 = vtanh.f32 %v2235_v50  ;;  %v7616_v50 = vld [vmem:[#allocation106_spill] sm:$0xff] }
 0x8f1   :  { %v4166_v54 = vpop.eup %4165 }
 0x8f2   :  { %v2238_v19 = vmul.f32 %v4166_v54, %v2237_v5  ;;  %v6096_v5 = vld [vmem:[#allocation8 + $0x4] ss:$24 sps:$4 sm:$0xff]   ;;  %v6100_v54 = vld [vmem:[#allocation8] ss:$24 sps:$4 sm:$0xff]  }
 0x8f3   :  { %7619 = vst [vmem:[#allocation18_spill] sm:$0xff] %v6096_v5  ;;  %7620 = vst [vmem:[#allocation19_spill] sm:$0xff] %v6100_v54 }
 0x8f4   :  { %v6042_v23 = vadd.f32 %v2239_v21, %v2238_v19  ;;  %v6103_v19 = vld [vmem:[#allocation8 + $0x34] ss:$24 sps:$4 sm:$0xff]   ;;  %v6106_v21 = vld [vmem:[#allocation8 + $0x30] ss:$24 sps:$4 sm:$0xff]  }
 0x8f5   :  { %7621 = vst [vmem:[#allocation20_spill] sm:$0xff] %v6103_v19  ;;  %7622 = vst [vmem:[#allocation21_spill] sm:$0xff] %v6106_v21 }
 0x8f6   :  { %v2241_v32 = vpack.c.bf16 %v6042_v23, %v6042_v23 }
 0x8f8   :  { %2274 = vmatprep.mubr.bf16.mxu0 %v2241_v32  ;;  %2315 = vmatprep.mubr.bf16.mxu1 %v2241_v32 }
 0x8f9   :  { %2275 = vmatmul.mubr.bf16.vlgmr.msra.gmra.mrb[48].mxu0 %v5961_v17  ;;  %2316 = vmatmul.mubr.bf16.vlgmr.msra.gmra.mrb[56].mxu1 %v5961_v17 }
 0x8fa   :  { %2325 = vmatpush1.bf16.msra.mxu0 %v5586_v4  ;;  %2356 = vmatprep.mubr.bf16.mxu0 %v2241_v32  ;;  %v7593_v4 = vld [vmem:[#allocation53_spill] sm:$0xff] }
 0x8fb   :  { %2326 = vmatprep.subr.bf16.mxu0 %v5589_v22  ;;  %2392 = vmatpush1.bf16.msra.mxu1 %v5592_v59  ;;  %v7594_v22 = vld [vmem:[#allocation55_spill] sm:$0xff]  ;;  %v6109_v32 = vld [vmem:[#allocation8 + $0x64] ss:$24 sps:$4 sm:$0xff]  }
 0x8fc   :  { %2393 = vmatprep.subr.bf16.mxu1 %v5831_v56  ;;  %2423 = vmatprep.mubr.bf16.mxu1 %v7358_v42  ;;  %v7595_v59 = vld [vmem:[#allocation35_spill] sm:$0xff]  ;;  %7623 = vst [vmem:[#allocation22_spill] sm:$0xff] %v6109_v32 }
 0x8fe   :  { %2327 = vmatpush1.bf16.msra.mxu0 %v5597_v58  ;;  %v7596_v58 = vld [vmem:[#allocation58_spill] sm:$0xff] }
 0x8ff   :  { %2328 = vmatprep.subr.bf16.mxu0 %v5600_v63  ;;  %2394 = vmatpush1.bf16.msra.mxu1 %v5837_v55  ;;  %v7597_v63 = vld [vmem:[#allocation57_spill] sm:$0xff] }
 0x900   :  { %2395 = vmatprep.subr.bf16.mxu1 %v5840_v49 }
 0x902   :  { %2329 = vmatpush1.bf16.msra.mxu0 %v5605_v11  ;;  %v7598_v11 = vld [vmem:[#allocation59_spill] sm:$0xff] }
 0x903   :  { %2330 = vmatprep.subr.bf16.mxu0 %v5608_v26  ;;  %2396 = vmatpush1.bf16.msra.mxu1 %v5845_v38  ;;  %v7599_v26 = vld [vmem:[#allocation60_spill] sm:$0xff] }
 0x904   :  { %2397 = vmatprep.subr.bf16.mxu1 %v5848_v60 }
 0x906   :  { %2331 = vmatpush1.bf16.msra.mxu0 %v5613_v18  ;;  %v7600_v18 = vld [vmem:[#allocation36_spill] sm:$0xff] }
 0x907   :  { %2332 = vmatprep.subr.bf16.mxu0 %v5616_v13  ;;  %2398 = vmatpush1.bf16.msra.mxu1 %v5853_v15  ;;  %v7601_v13 = vld [vmem:[#allocation61_spill] sm:$0xff] }
 0x908   :  { %2399 = vmatprep.subr.bf16.mxu1 %v5856_v43 }
 0x90a   :  { %2333 = vmatpush1.bf16.msra.mxu0 %v5621_v36  ;;  %v7602_v36 = vld [vmem:[#allocation63_spill] sm:$0xff] }
 0x90b   :  { %2334 = vmatprep.subr.bf16.mxu0 %v5624_v39  ;;  %2400 = vmatpush1.bf16.msra.mxu1 %v5861_v9  ;;  %v7603_v39 = vld [vmem:[#allocation37_spill] sm:$0xff] }
 0x90c   :  { %2401 = vmatprep.subr.bf16.mxu1 %v5864_v51 }
 0x90e   :  { %2335 = vmatpush1.bf16.msra.mxu0 %v7593_v4  ;;  %v6112_v4 = vld [vmem:[#allocation8 + $0x60] ss:$24 sps:$4 sm:$0xff]  }
 0x90f   :  { %2336 = vmatprep.subr.bf16.mxu0 %v7594_v22  ;;  %2402 = vmatpush1.bf16.msra.mxu1 %v7595_v59  ;;  %7624 = vst [vmem:[#allocation23_spill] sm:$0xff] %v6112_v4  ;;  %v6118_v22 = vld [vmem:[#allocation8 + $0x90] ss:$24 sps:$4 sm:$0xff]  }
 0x910   :  { %2403 = vmatprep.subr.bf16.mxu1 %v7596_v58  ;;  %7626 = vst [vmem:[#allocation25_spill] sm:$0xff] %v6118_v22 }
 0x912   :  { %2337 = vmatpush1.bf16.msra.mxu0 %v7597_v63  ;;  %v6121_v63 = vld [vmem:[#allocation8 + $0xc4] ss:$24 sps:$4 sm:$0xff]  }
 0x913   :  { %2338 = vmatprep.subr.bf16.mxu0 %v7598_v11  ;;  %2404 = vmatpush1.bf16.msra.mxu1 %v7599_v26  ;;  %7627 = vst [vmem:[#allocation40_spill] sm:$0xff] %v6121_v63  ;;  %v6124_v11 = vld [vmem:[#allocation8 + $0xc0] ss:$24 sps:$4 sm:$0xff]  }
 0x914   :  { %2405 = vmatprep.subr.bf16.mxu1 %v7600_v18  ;;  %7628 = vst [vmem:[#allocation26_spill] sm:$0xff] %v6124_v11 }
 0x916   :  { %2339 = vmatpush1.bf16.msra.mxu0 %v7601_v13  ;;  %v6127_v13 = vld [vmem:[#allocation8 + $0xf4] ss:$24 sps:$4 sm:$0xff]  }
 0x917   :  { %2340 = vmatprep.subr.bf16.mxu0 %v7602_v36  ;;  %2406 = vmatpush1.bf16.msra.mxu1 %v7603_v39  ;;  %7629 = vst [vmem:[#allocation27_spill] sm:$0xff] %v6127_v13  ;;  %v6130_v36 = vld [vmem:[#allocation8 + $0xf0] ss:$24 sps:$4 sm:$0xff]  }
 0x918   :  { %3749 = vmatprep.subr.bf16.mxu1 %v7342_v34  ;;  %7630 = vst [vmem:[#allocation42_spill] sm:$0xff] %v6130_v36 }
 0x91a   :  { %2341 = vmatpush1.bf16.msra.mxu0 %v7604_v45  ;;  %v6133_v45 = vld [vmem:[#allocation8 + $0x124] ss:$24 sps:$4 sm:$0xff]  }
 0x91b   :  { %2342 = vmatprep.subr.bf16.mxu0 %v7605_v28  ;;  %7631 = vst [vmem:[#allocation44_spill] sm:$0xff] %v6133_v45  ;;  %v6136_v28 = vld [vmem:[#allocation8 + $0x120] ss:$24 sps:$4 sm:$0xff]  }
 0x91c   :  { %7632 = vst [vmem:[#allocation28_spill] sm:$0xff] %v6136_v28 }
 0x91e   :  { %2343 = vmatpush1.bf16.msra.mxu0 %v7606_v25  ;;  %v6139_v25 = vld [vmem:[#allocation8 + $0x154] ss:$24 sps:$4 sm:$0xff]  }
 0x91f   :  { %2344 = vmatprep.subr.bf16.mxu0 %v7607_v33  ;;  %7633 = vst [vmem:[#allocation29_spill] sm:$0xff] %v6139_v25  ;;  %v6142_v33 = vld [vmem:[#allocation8 + $0x150] ss:$24 sps:$4 sm:$0xff]  }
 0x920   :  { %7634 = vst [vmem:[#allocation46_spill] sm:$0xff] %v6142_v33 }
 0x922   :  { %2345 = vmatpush1.bf16.msra.mxu0 %v7608_v20  ;;  %v6145_v20 = vld [vmem:[#allocation8 + $0x184] ss:$24 sps:$4 sm:$0xff]  }
 0x923   :  { %2346 = vmatprep.subr.bf16.mxu0 %v7609_v24  ;;  %7635 = vst [vmem:[#allocation48_spill] sm:$0xff] %v6145_v20  ;;  %v6148_v24 = vld [vmem:[#allocation8 + $0x180] ss:$24 sps:$4 sm:$0xff]  }
 0x924   :  { %7636 = vst [vmem:[#allocation30_spill] sm:$0xff] %v6148_v24 }
 0x926   :  { %2347 = vmatpush1.bf16.msra.mxu0 %v7610_v29  ;;  %v6151_v29 = vld [vmem:[#allocation8 + $0x1b4] ss:$24 sps:$4 sm:$0xff]  }
 0x927   :  { %2348 = vmatprep.subr.bf16.mxu0 %v7611_v61  ;;  %7637 = vst [vmem:[#allocation31_spill] sm:$0xff] %v6151_v29  ;;  %v6154_v61 = vld [vmem:[#allocation8 + $0x1b0] ss:$24 sps:$4 sm:$0xff]  }
 0x928   :  { %7638 = vst [vmem:[#allocation50_spill] sm:$0xff] %v6154_v61 }
 0x92a   :  { %2349 = vmatpush1.bf16.msra.mxu0 %v7612_v12  ;;  %v6157_v12 = vld [vmem:[#allocation8 + $0x1e4] ss:$24 sps:$4 sm:$0xff]  }
 0x92b   :  { %2350 = vmatprep.subr.bf16.mxu0 %v7613_v35  ;;  %7639 = vst [vmem:[#allocation52_spill] sm:$0xff] %v6157_v12 }
 0x92e   :  { %2351 = vmatpush1.bf16.msra.mxu0 %v7614_v10 }
 0x92f   :  { %2352 = vmatprep.subr.bf16.mxu0 %v7615_v31 }
 0x932   :  { %2353 = vmatpush1.bf16.msra.mxu0 %v7616_v50 }
 0x933   :  { %2354 = vmatprep.subr.bf16.mxu0 %v7617_v37 }
 0x936   :  { %2355 = vmatpush1.bf16.msra.mxu0 %v7618_v7 }
 0x937   :  { %2495 = vmatprep.subr.bf16.mxu0 %v6096_v5 }
 0x939   :  { %2357 = vmatmul.mubr.bf16.vlgmr.msra.gmra.mrb[52].mxu0 %v5961_v17  ;;  %v6115_v17 = vld [vmem:[#allocation8 + $0x94] ss:$24 sps:$4 sm:$0xff]  }
 0x93a   :  { %2496 = vmatpush1.bf16.msra.mxu0 %v6100_v54  ;;  %7625 = vst [vmem:[#allocation24_spill] sm:$0xff] %v6115_v17  ;;  %v7654_v54 = vld [vmem:[#allocation86_spill] sm:$0xff] }
 0x93b   :  { %2497 = vmatprep.subr.bf16.mxu0 %v6103_v19 }
 0x93e   :  { %2498 = vmatpush1.bf16.msra.mxu0 %v6106_v21 }
 0x93f   :  { %2499 = vmatprep.subr.bf16.mxu0 %v6109_v32 }
 0x942   :  { %2500 = vmatpush1.bf16.msra.mxu0 %v6112_v4 }
 0x943   :  { %2501 = vmatprep.subr.bf16.mxu0 %v6115_v17 }
 0x946   :  { %2502 = vmatpush1.bf16.msra.mxu0 %v6118_v22 }
 0x947   :  { %2503 = vmatprep.subr.bf16.mxu0 %v6121_v63 }
 0x94a   :  { %2504 = vmatpush1.bf16.msra.mxu0 %v6124_v11  ;;  %v7652_v11 = vld [vmem:[#allocation81_spill] sm:$0xff] }
 0x94b   :  { %2505 = vmatprep.subr.bf16.mxu0 %v6127_v13 }
 0x94e   :  { %2506 = vmatpush1.bf16.msra.mxu0 %v6130_v36  ;;  %v7650_v36 = vld [vmem:[#allocation103_spill] sm:$0xff] }
 0x94f   :  { %2507 = vmatprep.subr.bf16.mxu0 %v6133_v45  ;;  %v7648_v45 = vld [vmem:[#allocation101_spill] sm:$0xff] }
 0x952   :  { %2508 = vmatpush1.bf16.msra.mxu0 %v6136_v28  ;;  %v7646_v28 = vld [vmem:[#allocation99_spill] sm:$0xff] }
 0x953   :  { %2509 = vmatprep.subr.bf16.mxu0 %v6139_v25  ;;  %v7644_v25 = vld [vmem:[#allocation97_spill] sm:$0xff] }
 0x956   :  { %2510 = vmatpush1.bf16.msra.mxu0 %v6142_v33  ;;  %v6160_v33 = vld [vmem:[#allocation8 + $0x1e0] ss:$24 sps:$4 sm:$0xff]  }
 0x957   :  { %2511 = vmatprep.subr.bf16.mxu0 %v6145_v20  ;;  %7640 = vst [vmem:[#allocation32_spill] sm:$0xff] %v6160_v33  ;;  %v6163_v20 = vld [vmem:[#allocation8 + $0x214] ss:$24 sps:$4 sm:$0xff]  }
 0x958   :  { %7641 = vst [vmem:[#allocation33_spill] sm:$0xff] %v6163_v20 }
 0x95a   :  { %2512 = vmatpush1.bf16.msra.mxu0 %v6148_v24  ;;  %v6166_v24 = vld [vmem:[#allocation8 + $0x210] ss:$24 sps:$4 sm:$0xff]  }
 0x95b   :  { %2513 = vmatprep.subr.bf16.mxu0 %v6151_v29  ;;  %7642 = vst [vmem:[#allocation54_spill] sm:$0xff] %v6166_v24  ;;  %v7643_v29 = vld [vmem:[#allocation96_spill] sm:$0xff] }
 0x95e   :  { %2514 = vmatpush1.bf16.msra.mxu0 %v6154_v61  ;;  %v7645_v61 = vld [vmem:[#allocation98_spill] sm:$0xff] }
 0x95f   :  { %2515 = vmatprep.subr.bf16.mxu0 %v6157_v12  ;;  %v7647_v12 = vld [vmem:[#allocation100_spill] sm:$0xff] }
 0x962   :  { %2516 = vmatpush1.bf16.msra.mxu0 %v6160_v33  ;;  %v7649_v33 = vld [vmem:[#allocation102_spill] sm:$0xff] }
 0x963   :  { %2517 = vmatprep.subr.bf16.mxu0 %v6163_v20  ;;  %v7651_v20 = vld [vmem:[#allocation104_spill] sm:$0xff] }
 0x966   :  { %2518 = vmatpush1.bf16.msra.mxu0 %v6166_v24 }
 0x967   :  { %2519 = vmatprep.subr.bf16.mxu0 %v7643_v29 }
 0x96a   :  { %2520 = vmatpush1.bf16.msra.mxu0 %v7644_v25 }
 0x96b   :  { %2521 = vmatprep.subr.bf16.mxu0 %v7645_v61  ;;  %v7653_v61 = vld [vmem:[#allocation82_spill] sm:$0xff] }
 0x96e   :  { %2522 = vmatpush1.bf16.msra.mxu0 %v7646_v28 }
 0x96f   :  { %2523 = vmatprep.subr.bf16.mxu0 %v7647_v12 }
 0x972   :  { %2524 = vmatpush1.bf16.msra.mxu0 %v7648_v45 }
 0x973   :  { %2525 = vmatprep.subr.bf16.mxu0 %v7649_v33 }
 0x976   :  { %2526 = vmatpush1.bf16.msra.mxu0 %v7650_v36 }
 0x977   :  { %2577 = vmatprep.subr.bf16.mxu0 %v7651_v20 }
 0x9cc   :  { %v2276_v13 = vpop.f32.mrb[48].mxu0  ;;  %v2317_v24 = vpop.f32.mrb[56].mxu1 }
 0x9cd   :  { %v2368_v29 = vadd.f32 %v2276_v13, %v7652_v11  ;;  %v2278_v63 = vpop.f32.mrb[49].mxu0  ;;  %v6179_v25 = vpop.f32.mrb[57].mxu1  ;;  %v2382_v11 = vadd.f32 %v2317_v24, %v5213_v27  ;;  %v6215_v24 = vld [vmem:[#allocation8 + $0x8] ss:$24 sps:$4 sm:$0xff]  }
 0x9ce   :  { %v2375_v22 = vadd.f32 %v2278_v63, %v7653_v61  ;;  %v2280_v28 = vpop.f32.mrb[50].mxu0  ;;  %v2321_v17 = vpop.f32.mrb[58].mxu1 }
 0x9cf   :  { %v3528_v12 = vmul.f32 -1.442695, %v2368_v29  ;;  %v2281_v4 = vpop.f32.mrb[51].mxu0  ;;  %v2322_v45 = vpop.f32.mrb[59].mxu1 }
 0x9d0   :  { %v3529_v33 = vmul.f32 -1.442695, %v2375_v22  ;;  %v6221_v45 = vld [vmem:[#allocation8 + $0x38] ss:$24 sps:$4 sm:$0xff]  }
 0x9d1   :  { %4167 = vpow2.f32 %v3528_v12  ;;  %v6218_v12 = vld [vmem:[#allocation8 + $0x3c] ss:$24 sps:$4 sm:$0xff]  }
 0x9d2   :  { %4169 = vpow2.f32 %v3529_v33  ;;  %v6224_v33 = vld [vmem:[#allocation8 + $0x6c] ss:$24 sps:$4 sm:$0xff]  }
 0x9db   :  { %v4168_v36 = vpop.eup %4167 }
 0x9dc   :  { %v2372_v32 = vadd.f32 1.0, %v4168_v36  ;;  %v4170_v20 = vpop.eup %4169  ;;  %v6227_v36 = vld [vmem:[#allocation8 + $0x68] ss:$24 sps:$4 sm:$0xff]  }
 0x9dd   :  { %v2379_v21 = vadd.f32 1.0, %v4170_v20  ;;  %v6230_v20 = vld [vmem:[#allocation8 + $0x9c] ss:$24 sps:$4 sm:$0xff]  }
 0x9de   :  { %4171 = vrcp.f32 %v2372_v32 }
 0x9df   :  { %4173 = vrcp.f32 %v2379_v21 }
 0x9e8   :  { %v4172_v13 = vpop.eup %4171 }
 0x9e9   :  { %v2383_v19 = vmul.f32 %v4172_v13, %v2382_v11  ;;  %v4174_v17 = vpop.eup %4173  ;;  %v6233_v11 = vld [vmem:[#allocation8 + $0x98] ss:$24 sps:$4 sm:$0xff]   ;;  %v6236_v13 = vld [vmem:[#allocation8 + $0xcc] ss:$24 sps:$4 sm:$0xff]  }
 0x9ea   :  { %v2386_v29 = vsub.f32 1.0, %v4174_v17  ;;  %v2388_v61 = vmul.f32 %v4174_v17, %v5957_v14  ;;  %7655 = vst [vmem:[#allocation79_spill] sm:$0xff] %v6236_v13  ;;  %v6242_v17 = vld [vmem:[#allocation8 + $0xfc] ss:$24 sps:$4 sm:$0xff]  }
 0x9eb   :  { %v2384_v63 = vadd.f32 %v2383_v19, %v7654_v54  ;;  %7657 = vst [vmem:[#allocation78_spill] sm:$0xff] %v6242_v17 }
 0x9ed   :  { %4175 = vtanh.f32 %v2384_v63  ;;  %v6239_v63 = vld [vmem:[#allocation8 + $0xc8] ss:$24 sps:$4 sm:$0xff]  }
 0x9ee   :  { %7656 = vst [vmem:[#allocation80_spill] sm:$0xff] %v6239_v63 }
 0x9f7   :  { %v4176_v4 = vpop.eup %4175 }
 0x9f8   :  { %v2387_v22 = vmul.f32 %v4176_v4, %v2386_v29  ;;  %v6245_v29 = vld [vmem:[#allocation8 + $0xf8] ss:$24 sps:$4 sm:$0xff]   ;;  %v6248_v4 = vld [vmem:[#allocation8 + $0x12c] ss:$24 sps:$4 sm:$0xff]  }
 0x9f9   :  { %7658 = vst [vmem:[#allocation38_spill] sm:$0xff] %v6245_v29  ;;  %7659 = vst [vmem:[#allocation39_spill] sm:$0xff] %v6248_v4 }
 0x9fa   :  { %v6185_v28 = vadd.f32 %v2388_v61, %v2387_v22  ;;  %v6251_v61 = vld [vmem:[#allocation8 + $0x128] ss:$24 sps:$4 sm:$0xff]   ;;  %v6254_v22 = vld [vmem:[#allocation8 + $0x15c] ss:$24 sps:$4 sm:$0xff]  }
 0x9fb   :  { %7660 = vst [vmem:[#allocation66_spill] sm:$0xff] %v6251_v61  ;;  %7661 = vst [vmem:[#allocation68_spill] sm:$0xff] %v6254_v22 }
 0x9fc   :  { %v6189_v32 = vpack.c.bf16 %v6185_v28, %v6185_v28 }
 0x9fe   :  { %2424 = vmatmul.mubr.bf16.vlgmr.msra.gmra.mrb[60].mxu1 %v6189_v32 }
 0x9ff   :  { %3750 = vmatpush3.bf16.msra.mxu1 %v5964_v53  ;;  %3765 = vmatprep.mubr.msk.bf16.mxu1 %vm4645_vm0, %v7342_v34 }
 0xa00   :  { %3751 = vmatprep.subr.bf16.mxu1 %v7342_v34 }
 0xa03   :  { %3752 = vmatpush3.bf16.msra.mxu1 %v5970_v48 }
 0xa04   :  { %3753 = vmatprep.subr.bf16.mxu1 %v7342_v34 }
 0xa07   :  { %3754 = vmatpush3.bf16.msra.mxu1 %v5974_v62 }
 0xa08   :  { %3755 = vmatprep.subr.bf16.mxu1 %v7342_v34 }
 0xa0b   :  { %3756 = vmatpush3.bf16.msra.mxu1 %v5978_v47 }
 0xa0c   :  { %v6201_v14 = vpop.f32.mrb[52].mxu0  ;;  %3757 = vmatprep.subr.bf16.mxu1 %v7342_v34 }
 0xa0d   :  { %v6204_v54 = vpop.f32.mrb[53].mxu0 }
 0xa0e   :  { %v2362_v19 = vpop.f32.mrb[54].mxu0 }
 0xa0f   :  { %v2363_v21 = vpop.f32.mrb[55].mxu0  ;;  %3758 = vmatpush3.bf16.msra.mxu1 %v5984_v44  ;;  %v6257_v19 = vld [vmem:[#allocation8 + $0x158] ss:$24 sps:$4 sm:$0xff]  }
 0xa10   :  { %3759 = vmatprep.subr.bf16.mxu1 %v7342_v34  ;;  %7662 = vst [vmem:[#allocation41_spill] sm:$0xff] %v6257_v19  ;;  %v6260_v21 = vld [vmem:[#allocation8 + $0x18c] ss:$24 sps:$4 sm:$0xff]  }
 0xa11   :  { %7663 = vst [vmem:[#allocation43_spill] sm:$0xff] %v6260_v21 }
 0xa13   :  { %3760 = vmatpush3.bf16.msra.mxu1 %v5988_v2 }
 0xa14   :  { %3761 = vmatprep.subr.bf16.mxu1 %v7342_v34 }
 0xa17   :  { %3762 = vmatpush3.bf16.msra.mxu1 %v5992_v16 }
 0xa18   :  { %3763 = vmatprep.subr.bf16.mxu1 %v7342_v34 }
 0xa1b   :  { %3764 = vmatpush3.bf16.msra.mxu1 %v5996_v0 }
 0xa1c   :  { %2536 = vmatprep.subr.bf16.mxu1 %v5999_v30 }
 0xa1e   :  { %3766 = vmatmul.mubr.bf16.vlgmr.msra.gmra.mrb[64].mxu1 %v6189_v32 }
 0xa1f   :  { %2537 = vmatpush1.bf16.msra.mxu1 %v6215_v24 }
 0xa20   :  { %2538 = vmatprep.subr.bf16.mxu1 %v6218_v12 }
 0xa23   :  { %2539 = vmatpush1.bf16.msra.mxu1 %v6221_v45 }
 0xa24   :  { %2540 = vmatprep.subr.bf16.mxu1 %v6224_v33 }
 0xa27   :  { %2541 = vmatpush1.bf16.msra.mxu1 %v6227_v36 }
 0xa28   :  { %2542 = vmatprep.subr.bf16.mxu1 %v6230_v20 }
 0xa2b   :  { %2543 = vmatpush1.bf16.msra.mxu1 %v6233_v11 }
 0xa2c   :  { %2544 = vmatprep.subr.bf16.mxu1 %v6236_v13 }
 0xa2f   :  { %2545 = vmatpush1.bf16.msra.mxu1 %v6239_v63 }
 0xa30   :  { %2546 = vmatprep.subr.bf16.mxu1 %v6242_v17 }
 0xa33   :  { %2547 = vmatpush1.bf16.msra.mxu1 %v6245_v29  ;;  %v6263_v29 = vld [vmem:[#allocation8 + $0x188] ss:$24 sps:$4 sm:$0xff]  }
 0xa34   :  { %2548 = vmatprep.subr.bf16.mxu1 %v6248_v4  ;;  %7664 = vst [vmem:[#allocation70_spill] sm:$0xff] %v6263_v29  ;;  %v6266_v4 = vld [vmem:[#allocation8 + $0x1bc] ss:$24 sps:$4 sm:$0xff]  }
 0xa35   :  { %7665 = vst [vmem:[#allocation45_spill] sm:$0xff] %v6266_v4 }
 0xa37   :  { %2549 = vmatpush1.bf16.msra.mxu1 %v6251_v61  ;;  %v6269_v61 = vld [vmem:[#allocation8 + $0x1b8] ss:$24 sps:$4 sm:$0xff]  }
 0xa38   :  { %2550 = vmatprep.subr.bf16.mxu1 %v6254_v22  ;;  %7666 = vst [vmem:[#allocation47_spill] sm:$0xff] %v6269_v61  ;;  %v6272_v22 = vld [vmem:[#allocation8 + $0x1ec] ss:$24 sps:$4 sm:$0xff]  }
 0xa39   :  { %7667 = vst [vmem:[#allocation49_spill] sm:$0xff] %v6272_v22 }
 0xa3b   :  { %2551 = vmatpush1.bf16.msra.mxu1 %v6257_v19  ;;  %v6275_v19 = vld [vmem:[#allocation8 + $0x1e8] ss:$24 sps:$4 sm:$0xff]  }
 0xa3c   :  { %2552 = vmatprep.subr.bf16.mxu1 %v6260_v21  ;;  %7668 = vst [vmem:[#allocation51_spill] sm:$0xff] %v6275_v19  ;;  %v6278_v21 = vld [vmem:[#allocation8 + $0x21c] ss:$24 sps:$4 sm:$0xff]  }
 0xa3d   :  { %7669 = vst [vmem:[#allocation76_spill] sm:$0xff] %v6278_v21 }
 0xa3f   :  { %2553 = vmatpush1.bf16.msra.mxu1 %v6263_v29  ;;  %v6281_v29 = vld [vmem:[#allocation8 + $0x218] ss:$24 sps:$4 sm:$0xff]  }
 0xa40   :  { %2554 = vmatprep.subr.bf16.mxu1 %v6266_v4  ;;  %7670 = vst [vmem:[#allocation77_spill] sm:$0xff] %v6281_v29  ;;  %v6284_v4 = vld [vmem:[#allocation8 + $0x24c] ss:$24 sps:$4 sm:$0xff]  }
 0xa41   :  { %7671 = vst [vmem:[#allocation75_spill] sm:$0xff] %v6284_v4 }
 0xa43   :  { %2555 = vmatpush1.bf16.msra.mxu1 %v6269_v61  ;;  %v6287_v61 = vld [vmem:[#allocation8 + $0x248] ss:$24 sps:$4 sm:$0xff]  }
 0xa44   :  { %2556 = vmatprep.subr.bf16.mxu1 %v6272_v22  ;;  %7672 = vst [vmem:[#allocation56_spill] sm:$0xff] %v6287_v61  ;;  %v6290_v22 = vld [vmem:[#allocation8 + $0x27c] ss:$24 sps:$4 sm:$0xff]  }
 0xa45   :  { %7673 = vst [vmem:[#allocation34_spill] sm:$0xff] %v6290_v22 }
 0xa47   :  { %2557 = vmatpush1.bf16.msra.mxu1 %v6275_v19  ;;  %v6293_v19 = vld [vmem:[#allocation8 + $0x278] ss:$24 sps:$4 sm:$0xff]  }
 0xa48   :  { %2558 = vmatprep.subr.bf16.mxu1 %v6278_v21  ;;  %7674 = vst [vmem:[#allocation53_spill] sm:$0xff] %v6293_v19 }
 0xa4b   :  { %2559 = vmatpush1.bf16.msra.mxu1 %v6281_v29 }
 0xa4c   :  { %2560 = vmatprep.subr.bf16.mxu1 %v6284_v4 }
 0xa4f   :  { %2561 = vmatpush1.bf16.msra.mxu1 %v6287_v61 }
 0xa50   :  { %2562 = vmatprep.subr.bf16.mxu1 %v6290_v22 }
 0xa53   :  { %2563 = vmatpush1.bf16.msra.mxu1 %v6293_v19 }
 0xa54   :  { %2564 = vmatprep.subr.bf16.mxu1 %v7587_v1 }
 0xa57   :  { %2565 = vmatpush1.bf16.msra.mxu1 %v7588_v3 }
 0xa58   :  { %2566 = vmatprep.subr.bf16.mxu1 %v7589_v52 }
 0xa5b   :  { %2567 = vmatpush1.bf16.msra.mxu1 %v7590_v46 }
 0xa5c   :  { %2644 = vmatprep.subr.bf16.mxu1 %v7591_v8 }
 0xad1   :  { %v2425_v4 = vpop.f32.mrb[60].mxu1 }
 0xad2   :  { %v2426_v61 = vadd.f32 %v2425_v4, %v7592_v41  ;;  %v2427_v29 = vpop.f32.mrb[61].mxu1  ;;  %v2486_v4 = vadd.f32 %v6204_v54, %v5306_v57 }
 0xad3   :  { %v2428_v22 = vadd.f32 %v2427_v29, %v5299_v6  ;;  %v2429_v21 = vpop.f32.mrb[62].mxu1 }
 0xad4   :  { %v2472_v17 = vadd.f32 %v2426_v61, %v6179_v25  ;;  %v2430_v19 = vpop.f32.mrb[63].mxu1 }
 0xad5   :  { %v2479_v1 = vadd.f32 %v2428_v22, %v6201_v14 }
 0xad6   :  { %v3530_v63 = vmul.f32 -1.442695, %v2472_v17 }
 0xad7   :  { %v3531_v3 = vmul.f32 -1.442695, %v2479_v1 }
 0xad8   :  { %4177 = vpow2.f32 %v3530_v63 }
 0xad9   :  { %4179 = vpow2.f32 %v3531_v3 }
 0xae2   :  { %v4178_v52 = vpop.eup %4177 }
 0xae3   :  { %v2476_v46 = vadd.f32 1.0, %v4178_v52  ;;  %v4180_v8 = vpop.eup %4179 }
 0xae4   :  { %v2483_v41 = vadd.f32 1.0, %v4180_v8  ;;  %v6326_v8 = vld [vmem:[#allocation8 + $0x40] ss:$24 sps:$4 sm:$0xff]  }
 0xae5   :  { %4181 = vrcp.f32 %v2476_v46 }
 0xae6   :  { %4183 = vrcp.f32 %v2483_v41  ;;  %v6315_v41 = vld [vmem:[#allocation8 + $0x10] ss:$24 sps:$4 sm:$0xff]  }
 0xaef   :  { %v4182_v13 = vpop.eup %4181 }
 0xaf0   :  { %v2487_v29 = vmul.f32 %v4182_v13, %v2486_v4  ;;  %v4184_v22 = vpop.eup %4183  ;;  %v6318_v13 = vld [vmem:[#allocation8 + $0x44] ss:$24 sps:$4 sm:$0xff]   ;;  %v6329_v4 = vld [vmem:[#allocation8 + $0x74] ss:$24 sps:$4 sm:$0xff]  }
 0xaf1   :  { %v2466_v21 = vpop.f32.mrb[64].mxu1  ;;  %v2490_v19 = vsub.f32 1.0, %v4184_v22  ;;  %v2492_v52 = vmul.f32 %v4184_v22, %v6042_v23  ;;  %v6321_v23 = vld [vmem:[#allocation9] ss:$16 sps:$4 sm:$0xff]  }
 0xaf2   :  { %v2467_v25 = vadd.f32 %v2466_v21, %v5310_v40  ;;  %v3767_v61 = vpop.f32.mrb[65].mxu1  ;;  %v6337_v21 = vld [vmem:[#allocation8 + $0xa4] ss:$24 sps:$4 sm:$0xff]   ;;  %v7690_v22 = vld [vmem:[#allocation19_spill] sm:$0xff] }
 0xaf3   :  { %v2469_v14 = vpop.f32.mrb[66].mxu1  ;;  %v6394_v61 = vld [vmem:[#allocation8 + $0x1f0] ss:$24 sps:$4 sm:$0xff]  }
 0xaf4   :  { %v2488_v17 = vadd.f32 %v2487_v29, %v2467_v25  ;;  %v3768_v63 = vpop.f32.mrb[67].mxu1  ;;  %v6334_v29 = vld [vmem:[#allocation8 + $0x70] ss:$24 sps:$4 sm:$0xff]   ;;  %v6345_v25 = vld [vmem:[#allocation8 + $0xd4] ss:$24 sps:$4 sm:$0xff]   ;;  %7685 = vst [vmem:[#allocation65_spill] sm:$0xff] %v6394_v61 }
 0xaf5   :  { %v6400_v14 = vld [vmem:[#allocation8 + $0x220] ss:$24 sps:$4 sm:$0xff]   ;;  %v6406_v63 = vld [vmem:[#allocation8 + $0x250] ss:$24 sps:$4 sm:$0xff]  }
 0xaf6   :  { %4185 = vtanh.f32 %v2488_v17  ;;  %7687 = vst [vmem:[#allocation69_spill] sm:$0xff] %v6400_v14  ;;  %v6403_v17 = vld [vmem:[#allocation8 + $0x254] ss:$24 sps:$4 sm:$0xff]   ;;  %7689 = vst [vmem:[#allocation72_spill] sm:$0xff] %v6406_v63 }
 0xaf7   :  { %7688 = vst [vmem:[#allocation71_spill] sm:$0xff] %v6403_v17 }
 0xb00   :  { %v4186_v1 = vpop.eup %4185 }
 0xb01   :  { %v2491_v3 = vmul.f32 %v4186_v1, %v2490_v19  ;;  %v7691_v19 = vld [vmem:[#allocation20_spill] sm:$0xff]  ;;  %v7692_v1 = vld [vmem:[#allocation21_spill] sm:$0xff] }
 0xb03   :  { %v6309_v46 = vadd.f32 %v2492_v52, %v2491_v3  ;;  %v7699_v3 = vld [vmem:[#allocation27_spill] sm:$0xff]  ;;  %v7701_v52 = vld [vmem:[#allocation44_spill] sm:$0xff] }
 0xb05   :  { %v2494_v54 = vpack.c.bf16 %v6309_v46, %v6309_v46 }
 0xb07   :  { %2527 = vmatprep.mubr.bf16.mxu0 %v2494_v54  ;;  %2568 = vmatprep.mubr.bf16.mxu1 %v2494_v54 }
 0xb08   :  { %2528 = vmatmul.mubr.bf16.vlgmr.msra.gmra.mrb[56].mxu0 %v6189_v32  ;;  %2569 = vmatmul.mubr.bf16.vlgmr.msra.gmra.mrb[68].mxu1 %v6189_v32 }
 0xb09   :  { %2578 = vmatpush1.bf16.msra.mxu0 %v6315_v41  ;;  %2609 = vmatprep.mubr.bf16.mxu0 %v2494_v54  ;;  %v7702_v54 = vld [vmem:[#allocation28_spill] sm:$0xff] }
 0xb0a   :  { %2579 = vmatprep.subr.bf16.mxu0 %v6318_v13  ;;  %2645 = vmatpush1.bf16.msra.mxu1 %v6321_v23 }
 0xb0b   :  { %2646 = vmatprep.subr.bf16.mxu1 %v5831_v56  ;;  %2676 = vmatprep.mubr.bf16.mxu1 %v7358_v42  ;;  %v6342_v56 = vld [vmem:[#allocation8 + $0xa0] ss:$24 sps:$4 sm:$0xff]  }
 0xb0d   :  { %2580 = vmatpush1.bf16.msra.mxu0 %v6326_v8 }
 0xb0e   :  { %2581 = vmatprep.subr.bf16.mxu0 %v6329_v4  ;;  %2647 = vmatpush1.bf16.msra.mxu1 %v5837_v55  ;;  %v6350_v55 = vld [vmem:[#allocation8 + $0xd0] ss:$24 sps:$4 sm:$0xff]  }
 0xb0f   :  { %2648 = vmatprep.subr.bf16.mxu1 %v5840_v49  ;;  %v6353_v49 = vld [vmem:[#allocation8 + $0x104] ss:$24 sps:$4 sm:$0xff]  }
 0xb11   :  { %2582 = vmatpush1.bf16.msra.mxu0 %v6334_v29 }
 0xb12   :  { %2583 = vmatprep.subr.bf16.mxu0 %v6337_v21  ;;  %2649 = vmatpush1.bf16.msra.mxu1 %v5845_v38  ;;  %v6358_v38 = vld [vmem:[#allocation8 + $0x100] ss:$24 sps:$4 sm:$0xff]  }
 0xb13   :  { %2650 = vmatprep.subr.bf16.mxu1 %v5848_v60  ;;  %7675 = vst [vmem:[#allocation55_spill] sm:$0xff] %v6358_v38  ;;  %v6361_v60 = vld [vmem:[#allocation8 + $0x134] ss:$24 sps:$4 sm:$0xff]  }
 0xb14   :  { %7676 = vst [vmem:[#allocation35_spill] sm:$0xff] %v6361_v60 }
 0xb15   :  { %2584 = vmatpush1.bf16.msra.mxu0 %v6342_v56 }
 0xb16   :  { %2585 = vmatprep.subr.bf16.mxu0 %v6345_v25  ;;  %2651 = vmatpush1.bf16.msra.mxu1 %v5853_v15  ;;  %v6366_v15 = vld [vmem:[#allocation8 + $0x130] ss:$24 sps:$4 sm:$0xff]  }
 0xb17   :  { %2652 = vmatprep.subr.bf16.mxu1 %v5856_v43  ;;  %7677 = vst [vmem:[#allocation58_spill] sm:$0xff] %v6366_v15  ;;  %v6369_v43 = vld [vmem:[#allocation8 + $0x164] ss:$24 sps:$4 sm:$0xff]  }
 0xb18   :  { %7678 = vst [vmem:[#allocation57_spill] sm:$0xff] %v6369_v43 }
 0xb19   :  { %2586 = vmatpush1.bf16.msra.mxu0 %v6350_v55 }
 0xb1a   :  { %2587 = vmatprep.subr.bf16.mxu0 %v6353_v49  ;;  %2653 = vmatpush1.bf16.msra.mxu1 %v5861_v9  ;;  %v6374_v9 = vld [vmem:[#allocation8 + $0x160] ss:$24 sps:$4 sm:$0xff]  }
 0xb1b   :  { %2654 = vmatprep.subr.bf16.mxu1 %v5864_v51  ;;  %7679 = vst [vmem:[#allocation59_spill] sm:$0xff] %v6374_v9  ;;  %v6377_v51 = vld [vmem:[#allocation8 + $0x194] ss:$24 sps:$4 sm:$0xff]  }
 0xb1c   :  { %7680 = vst [vmem:[#allocation60_spill] sm:$0xff] %v6377_v51 }
 0xb1d   :  { %2588 = vmatpush1.bf16.msra.mxu0 %v6358_v38 }
 0xb1e   :  { %2589 = vmatprep.subr.bf16.mxu0 %v6361_v60  ;;  %2655 = vmatpush1.bf16.msra.mxu1 %v7595_v59  ;;  %v6382_v59 = vld [vmem:[#allocation8 + $0x190] ss:$24 sps:$4 sm:$0xff]  }
 0xb1f   :  { %2656 = vmatprep.subr.bf16.mxu1 %v7596_v58  ;;  %7681 = vst [vmem:[#allocation36_spill] sm:$0xff] %v6382_v59  ;;  %v6385_v58 = vld [vmem:[#allocation8 + $0x1c4] ss:$24 sps:$4 sm:$0xff]  }
 0xb20   :  { %7682 = vst [vmem:[#allocation61_spill] sm:$0xff] %v6385_v58 }
 0xb21   :  { %2590 = vmatpush1.bf16.msra.mxu0 %v6366_v15 }
 0xb22   :  { %2591 = vmatprep.subr.bf16.mxu0 %v6369_v43  ;;  %2657 = vmatpush1.bf16.msra.mxu1 %v7599_v26  ;;  %v6388_v26 = vld [vmem:[#allocation8 + $0x1c0] ss:$24 sps:$4 sm:$0xff]  }
 0xb23   :  { %2658 = vmatprep.subr.bf16.mxu1 %v7600_v18  ;;  %7683 = vst [vmem:[#allocation63_spill] sm:$0xff] %v6388_v26  ;;  %v6391_v18 = vld [vmem:[#allocation8 + $0x1f4] ss:$24 sps:$4 sm:$0xff]  }
 0xb24   :  { %7684 = vst [vmem:[#allocation37_spill] sm:$0xff] %v6391_v18 }
 0xb25   :  { %2592 = vmatpush1.bf16.msra.mxu0 %v6374_v9 }
 0xb26   :  { %2593 = vmatprep.subr.bf16.mxu0 %v6377_v51  ;;  %2659 = vmatpush1.bf16.msra.mxu1 %v7603_v39  ;;  %v6397_v39 = vld [vmem:[#allocation8 + $0x224] ss:$24 sps:$4 sm:$0xff]  }
 0xb27   :  { %3769 = vmatprep.subr.bf16.mxu1 %v7342_v34  ;;  %7686 = vst [vmem:[#allocation67_spill] sm:$0xff] %v6397_v39 }
 0xb29   :  { %2594 = vmatpush1.bf16.msra.mxu0 %v6382_v59 }
 0xb2a   :  { %2595 = vmatprep.subr.bf16.mxu0 %v6385_v58 }
 0xb2d   :  { %2596 = vmatpush1.bf16.msra.mxu0 %v6388_v26 }
 0xb2e   :  { %2597 = vmatprep.subr.bf16.mxu0 %v6391_v18  ;;  %v7724_v18 = vld [vmem:[#allocation88_spill] sm:$0xff] }
 0xb31   :  { %2598 = vmatpush1.bf16.msra.mxu0 %v6394_v61 }
 0xb32   :  { %2599 = vmatprep.subr.bf16.mxu0 %v6397_v39 }
 0xb35   :  { %2600 = vmatpush1.bf16.msra.mxu0 %v6400_v14 }
 0xb36   :  { %2601 = vmatprep.subr.bf16.mxu0 %v6403_v17 }
 0xb39   :  { %2602 = vmatpush1.bf16.msra.mxu0 %v6406_v63 }
 0xb3a   :  { %2603 = vmatprep.subr.bf16.mxu0 %v7613_v35  ;;  %v7693_v35 = vld [vmem:[#allocation22_spill] sm:$0xff] }
 0xb3d   :  { %2604 = vmatpush1.bf16.msra.mxu0 %v7614_v10  ;;  %v7694_v10 = vld [vmem:[#allocation23_spill] sm:$0xff] }
 0xb3e   :  { %2605 = vmatprep.subr.bf16.mxu0 %v7615_v31  ;;  %v7695_v31 = vld [vmem:[#allocation24_spill] sm:$0xff] }
 0xb41   :  { %2606 = vmatpush1.bf16.msra.mxu0 %v7616_v50  ;;  %v7696_v50 = vld [vmem:[#allocation25_spill] sm:$0xff] }
 0xb42   :  { %2607 = vmatprep.subr.bf16.mxu0 %v7617_v37  ;;  %v7697_v37 = vld [vmem:[#allocation40_spill] sm:$0xff] }
 0xb45   :  { %2608 = vmatpush1.bf16.msra.mxu0 %v7618_v7  ;;  %v7698_v7 = vld [vmem:[#allocation26_spill] sm:$0xff] }
 0xb46   :  { %2748 = vmatprep.subr.bf16.mxu0 %v6096_v5 }
 0xb48   :  { %2610 = vmatmul.mubr.bf16.vlgmr.msra.gmra.mrb[60].mxu0 %v6189_v32  ;;  %v7700_v32 = vld [vmem:[#allocation42_spill] sm:$0xff] }
 0xb49   :  { %2749 = vmatpush1.bf16.msra.mxu0 %v7690_v22 }
 0xb4a   :  { %2750 = vmatprep.subr.bf16.mxu0 %v7691_v19 }
 0xb4d   :  { %2751 = vmatpush1.bf16.msra.mxu0 %v7692_v1  ;;  %v7703_v1 = vld [vmem:[#allocation29_spill] sm:$0xff] }
 0xb4e   :  { %2752 = vmatprep.subr.bf16.mxu0 %v7693_v35  ;;  %v7704_v35 = vld [vmem:[#allocation46_spill] sm:$0xff] }
 0xb51   :  { %2753 = vmatpush1.bf16.msra.mxu0 %v7694_v10  ;;  %v7705_v10 = vld [vmem:[#allocation48_spill] sm:$0xff] }
 0xb52   :  { %2754 = vmatprep.subr.bf16.mxu0 %v7695_v31  ;;  %v7706_v31 = vld [vmem:[#allocation30_spill] sm:$0xff] }
 0xb55   :  { %2755 = vmatpush1.bf16.msra.mxu0 %v7696_v50  ;;  %v7707_v50 = vld [vmem:[#allocation31_spill] sm:$0xff] }
 0xb56   :  { %2756 = vmatprep.subr.bf16.mxu0 %v7697_v37  ;;  %v7708_v37 = vld [vmem:[#allocation50_spill] sm:$0xff] }
 0xb59   :  { %2757 = vmatpush1.bf16.msra.mxu0 %v7698_v7  ;;  %v7709_v7 = vld [vmem:[#allocation52_spill] sm:$0xff] }
 0xb5a   :  { %2758 = vmatprep.subr.bf16.mxu0 %v7699_v3  ;;  %v7710_v3 = vld [vmem:[#allocation32_spill] sm:$0xff] }
 0xb5d   :  { %2759 = vmatpush1.bf16.msra.mxu0 %v7700_v32  ;;  %v7711_v32 = vld [vmem:[#allocation33_spill] sm:$0xff] }
 0xb5e   :  { %2760 = vmatprep.subr.bf16.mxu0 %v7701_v52  ;;  %v7712_v52 = vld [vmem:[#allocation54_spill] sm:$0xff] }
 0xb61   :  { %2761 = vmatpush1.bf16.msra.mxu0 %v7702_v54  ;;  %v6440_v54 = vld [vmem:[#allocation8 + $0x244] ss:$24 sps:$4 sm:$0xff]  }
 0xb62   :  { %2762 = vmatprep.subr.bf16.mxu0 %v7703_v1  ;;  %7713 = vst [vmem:[#allocation73_spill] sm:$0xff] %v6440_v54 }
 0xb65   :  { %2763 = vmatpush1.bf16.msra.mxu0 %v7704_v35  ;;  %v6443_v35 = vld [vmem:[#allocation8 + $0x240] ss:$24 sps:$4 sm:$0xff]  }
 0xb66   :  { %2764 = vmatprep.subr.bf16.mxu0 %v7705_v10  ;;  %7714 = vst [vmem:[#allocation74_spill] sm:$0xff] %v6443_v35 }
 0xb69   :  { %2765 = vmatpush1.bf16.msra.mxu0 %v7706_v31  ;;  %v6446_v31 = vld [vmem:[#allocation8 + $0x274] ss:$24 sps:$4 sm:$0xff]  }
 0xb6a   :  { %2766 = vmatprep.subr.bf16.mxu0 %v7707_v50  ;;  %7715 = vst [vmem:[#allocation94_spill] sm:$0xff] %v6446_v31 }
 0xb6d   :  { %2767 = vmatpush1.bf16.msra.mxu0 %v7708_v37  ;;  %v6449_v37 = vld [vmem:[#allocation8 + $0x270] ss:$24 sps:$4 sm:$0xff]  }
 0xb6e   :  { %2768 = vmatprep.subr.bf16.mxu0 %v7709_v7  ;;  %7716 = vst [vmem:[#allocation95_spill] sm:$0xff] %v6449_v37  ;;  %v7722_v7 = vld [vmem:[#allocation83_spill] sm:$0xff] }
 0xb71   :  { %2769 = vmatpush1.bf16.msra.mxu0 %v7710_v3  ;;  %v6452_v3 = vld [vmem:[#allocation8 + $0x2a4] ss:$24 sps:$4 sm:$0xff]  }
 0xb72   :  { %2770 = vmatprep.subr.bf16.mxu0 %v7711_v32  ;;  %7717 = vst [vmem:[#allocation62_spill] sm:$0xff] %v6452_v3 }
 0xb75   :  { %2771 = vmatpush1.bf16.msra.mxu0 %v7712_v52  ;;  %v6455_v52 = vld [vmem:[#allocation8 + $0x2a0] ss:$24 sps:$4 sm:$0xff]  }
 0xb76   :  { %2772 = vmatprep.subr.bf16.mxu0 %v6440_v54  ;;  %7718 = vst [vmem:[#allocation64_spill] sm:$0xff] %v6455_v52  ;;  %v6458_v54 = vld [vmem:[#allocation8 + $0x2d4] ss:$24 sps:$4 sm:$0xff]  }
 0xb77   :  { %7719 = vst [vmem:[#allocation105_spill] sm:$0xff] %v6458_v54 }
 0xb79   :  { %2773 = vmatpush1.bf16.msra.mxu0 %v6443_v35  ;;  %v6461_v35 = vld [vmem:[#allocation8 + $0x2d0] ss:$24 sps:$4 sm:$0xff]  }
 0xb7a   :  { %2774 = vmatprep.subr.bf16.mxu0 %v6446_v31  ;;  %7720 = vst [vmem:[#allocation106_spill] sm:$0xff] %v6461_v35  ;;  %v6464_v31 = vld [vmem:[#allocation8 + $0x14] ss:$24 sps:$4 sm:$0xff]  }
 0xb7b   :  { %7721 = vst [vmem:[#allocation107_spill] sm:$0xff] %v6464_v31 }
 0xb7d   :  { %2775 = vmatpush1.bf16.msra.mxu0 %v6449_v37 }
 0xb7e   :  { %2776 = vmatprep.subr.bf16.mxu0 %v6452_v3 }
 0xb81   :  { %2777 = vmatpush1.bf16.msra.mxu0 %v6455_v52  ;;  %v7723_v52 = vld [vmem:[#allocation84_spill] sm:$0xff] }
 0xb82   :  { %2778 = vmatprep.subr.bf16.mxu0 %v6458_v54 }
 0xb85   :  { %2779 = vmatpush1.bf16.msra.mxu0 %v6461_v35 }
 0xb86   :  { %2830 = vmatprep.subr.bf16.mxu0 %v6464_v31 }
 0xbdb   :  { %v2529_v37 = vpop.f32.mrb[56].mxu0  ;;  %v2570_v32 = vpop.f32.mrb[68].mxu1 }
 0xbdc   :  { %v2621_v3 = vadd.f32 %v2529_v37, %v7722_v7  ;;  %v2531_v50 = vpop.f32.mrb[57].mxu0  ;;  %v6468_v10 = vpop.f32.mrb[69].mxu1  ;;  %v2635_v37 = vadd.f32 %v2570_v32, %v5213_v27  ;;  %v7737_v32 = vld [vmem:[#allocation49_spill] sm:$0xff] }
 0xbdd   :  { %v2628_v1 = vadd.f32 %v2531_v50, %v7723_v52  ;;  %v2533_v19 = vpop.f32.mrb[58].mxu0  ;;  %v2574_v22 = vpop.f32.mrb[70].mxu1  ;;  %v7738_v52 = vld [vmem:[#allocation51_spill] sm:$0xff] }
 0xbde   :  { %v3532_v54 = vmul.f32 -1.442695, %v2621_v3  ;;  %v2534_v5 = vpop.f32.mrb[59].mxu0  ;;  %v2575_v63 = vpop.f32.mrb[71].mxu1  ;;  %v7736_v3 = vld [vmem:[#allocation47_spill] sm:$0xff] }
 0xbdf   :  { %v3533_v35 = vmul.f32 -1.442695, %v2628_v1 }
 0xbe0   :  { %4187 = vpow2.f32 %v3532_v54  ;;  %v7739_v54 = vld [vmem:[#allocation76_spill] sm:$0xff] }
 0xbe1   :  { %4189 = vpow2.f32 %v3533_v35 }
 0xbea   :  { %v4188_v17 = vpop.eup %4187 }
 0xbeb   :  { %v2625_v14 = vadd.f32 1.0, %v4188_v17  ;;  %v4190_v31 = vpop.eup %4189  ;;  %v7734_v17 = vld [vmem:[#allocation70_spill] sm:$0xff] }
 0xbec   :  { %v2632_v39 = vadd.f32 1.0, %v4190_v31  ;;  %v7735_v31 = vld [vmem:[#allocation45_spill] sm:$0xff] }
 0xbed   :  { %4191 = vrcp.f32 %v2625_v14 }
 0xbee   :  { %4193 = vrcp.f32 %v2632_v39  ;;  %v7733_v39 = vld [vmem:[#allocation43_spill] sm:$0xff] }
 0xbf7   :  { %v4192_v7 = vpop.eup %4191 }
 0xbf8   :  { %v2636_v61 = vmul.f32 %v4192_v7, %v2635_v37  ;;  %v4194_v22 = vpop.eup %4193  ;;  %v7740_v37 = vld [vmem:[#allocation77_spill] sm:$0xff]  ;;  %v7741_v7 = vld [vmem:[#allocation75_spill] sm:$0xff] }
 0xbf9   :  { %v2639_v19 = vsub.f32 1.0, %v4194_v22  ;;  %v2641_v63 = vmul.f32 %v4194_v22, %v6185_v28  ;;  %v7743_v22 = vld [vmem:[#allocation34_spill] sm:$0xff] }
 0xbfa   :  { %v2637_v50 = vadd.f32 %v2636_v61, %v7724_v18 }
 0xbfc   :  { %4195 = vtanh.f32 %v2637_v50  ;;  %v7742_v50 = vld [vmem:[#allocation56_spill] sm:$0xff] }
 0xc06   :  { %v4196_v5 = vpop.eup %4195 }
 0xc07   :  { %v2640_v1 = vmul.f32 %v4196_v5, %v2639_v19  ;;  %v7744_v19 = vld [vmem:[#allocation53_spill] sm:$0xff] }
 0xc08   :  { %v6529_v5 = vld [vmem:[#allocation8 + $0x2ac] ss:$24 sps:$4 sm:$0xff]  }
 0xc09   :  { %v6474_v35 = vadd.f32 %v2641_v63, %v2640_v1  ;;  %7745 = vst [vmem:[#allocation108_spill] sm:$0xff] %v6529_v5  ;;  %v6532_v63 = vld [vmem:[#allocation8 + $0x2a8] ss:$24 sps:$4 sm:$0xff]   ;;  %v6535_v1 = vld [vmem:[#allocation8 + $0x2dc] ss:$24 sps:$4 sm:$0xff]  }
 0xc0a   :  { %7746 = vst [vmem:[#allocation96_spill] sm:$0xff] %v6532_v63  ;;  %7747 = vst [vmem:[#allocation97_spill] sm:$0xff] %v6535_v1 }
 0xc0b   :  { %v6478_v14 = vpack.c.bf16 %v6474_v35, %v6474_v35 }
 0xc0d   :  { %2677 = vmatmul.mubr.bf16.vlgmr.msra.gmra.mrb[72].mxu1 %v6478_v14 }
 0xc0e   :  { %3770 = vmatpush3.bf16.msra.mxu1 %v5964_v53  ;;  %3785 = vmatprep.mubr.msk.bf16.mxu1 %vm4645_vm0, %v7342_v34 }
 0xc0f   :  { %3771 = vmatprep.subr.bf16.mxu1 %v7342_v34 }
 0xc12   :  { %3772 = vmatpush3.bf16.msra.mxu1 %v5970_v48  ;;  %v7725_v48 = vld [vmem:[#allocation79_spill] sm:$0xff] }
 0xc13   :  { %3773 = vmatprep.subr.bf16.mxu1 %v7342_v34 }
 0xc16   :  { %3774 = vmatpush3.bf16.msra.mxu1 %v5974_v62  ;;  %v7726_v62 = vld [vmem:[#allocation80_spill] sm:$0xff] }
 0xc17   :  { %3775 = vmatprep.subr.bf16.mxu1 %v7342_v34 }
 0xc1a   :  { %3776 = vmatpush3.bf16.msra.mxu1 %v5978_v47  ;;  %v7727_v47 = vld [vmem:[#allocation78_spill] sm:$0xff] }
 0xc1b   :  { %v2611_v28 = vpop.f32.mrb[60].mxu0  ;;  %3777 = vmatprep.subr.bf16.mxu1 %v7342_v34 }
 0xc1c   :  { %v6491_v18 = vpop.f32.mrb[61].mxu0 }
 0xc1d   :  { %v2615_v53 = vpop.f32.mrb[62].mxu0 }
 0xc1e   :  { %v2616_v61 = vpop.f32.mrb[63].mxu0  ;;  %3778 = vmatpush3.bf16.msra.mxu1 %v5984_v44  ;;  %v7728_v44 = vld [vmem:[#allocation38_spill] sm:$0xff]  ;;  %v6538_v53 = vld [vmem:[#allocation8 + $0x2d8] ss:$24 sps:$4 sm:$0xff]  }
 0xc1f   :  { %3779 = vmatprep.subr.bf16.mxu1 %v7342_v34  ;;  %7748 = vst [vmem:[#allocation98_spill] sm:$0xff] %v6538_v53  ;;  %v6541_v61 = vld [vmem:[#allocation9 + $0x4] ss:$16 sps:$4 sm:$0xff]  }
 0xc20   :  { %7749 = vst [vmem:[#allocation99_spill] sm:$0xff] %v6541_v61 }
 0xc22   :  { %3780 = vmatpush3.bf16.msra.mxu1 %v5988_v2  ;;  %v7729_v2 = vld [vmem:[#allocation39_spill] sm:$0xff] }
 0xc23   :  { %3781 = vmatprep.subr.bf16.mxu1 %v7342_v34 }
 0xc26   :  { %3782 = vmatpush3.bf16.msra.mxu1 %v5992_v16  ;;  %v7730_v16 = vld [vmem:[#allocation66_spill] sm:$0xff] }
 0xc27   :  { %3783 = vmatprep.subr.bf16.mxu1 %v7342_v34 }
 0xc2a   :  { %3784 = vmatpush3.bf16.msra.mxu1 %v5996_v0  ;;  %v7731_v0 = vld [vmem:[#allocation68_spill] sm:$0xff] }
 0xc2b   :  { %2789 = vmatprep.subr.bf16.mxu1 %v5999_v30  ;;  %v7732_v30 = vld [vmem:[#allocation41_spill] sm:$0xff] }
 0xc2d   :  { %3786 = vmatmul.mubr.bf16.vlgmr.msra.gmra.mrb[76].mxu1 %v6478_v14 }
 0xc2e   :  { %2790 = vmatpush1.bf16.msra.mxu1 %v6215_v24 }
 0xc2f   :  { %2791 = vmatprep.subr.bf16.mxu1 %v6218_v12 }
 0xc32   :  { %2792 = vmatpush1.bf16.msra.mxu1 %v6221_v45 }
 0xc33   :  { %2793 = vmatprep.subr.bf16.mxu1 %v6224_v33 }
 0xc36   :  { %2794 = vmatpush1.bf16.msra.mxu1 %v6227_v36 }
 0xc37   :  { %2795 = vmatprep.subr.bf16.mxu1 %v6230_v20 }
 0xc3a   :  { %2796 = vmatpush1.bf16.msra.mxu1 %v6233_v11 }
 0xc3b   :  { %2797 = vmatprep.subr.bf16.mxu1 %v7725_v48 }
 0xc3e   :  { %2798 = vmatpush1.bf16.msra.mxu1 %v7726_v62 }
 0xc3f   :  { %2799 = vmatprep.subr.bf16.mxu1 %v7727_v47 }
 0xc42   :  { %2800 = vmatpush1.bf16.msra.mxu1 %v7728_v44 }
 0xc43   :  { %2801 = vmatprep.subr.bf16.mxu1 %v7729_v2 }
 0xc46   :  { %2802 = vmatpush1.bf16.msra.mxu1 %v7730_v16 }
 0xc47   :  { %2803 = vmatprep.subr.bf16.mxu1 %v7731_v0 }
 0xc4a   :  { %2804 = vmatpush1.bf16.msra.mxu1 %v7732_v30 }
 0xc4b   :  { %2805 = vmatprep.subr.bf16.mxu1 %v7733_v39 }
 0xc4e   :  { %2806 = vmatpush1.bf16.msra.mxu1 %v7734_v17 }
 0xc4f   :  { %2807 = vmatprep.subr.bf16.mxu1 %v7735_v31 }
 0xc52   :  { %2808 = vmatpush1.bf16.msra.mxu1 %v7736_v3 }
 0xc53   :  { %2809 = vmatprep.subr.bf16.mxu1 %v7737_v32 }
 0xc56   :  { %2810 = vmatpush1.bf16.msra.mxu1 %v7738_v52 }
 0xc57   :  { %2811 = vmatprep.subr.bf16.mxu1 %v7739_v54 }
 0xc5a   :  { %2812 = vmatpush1.bf16.msra.mxu1 %v7740_v37 }
 0xc5b   :  { %2813 = vmatprep.subr.bf16.mxu1 %v7741_v7 }
 0xc5e   :  { %2814 = vmatpush1.bf16.msra.mxu1 %v7742_v50 }
 0xc5f   :  { %2815 = vmatprep.subr.bf16.mxu1 %v7743_v22  ;;  %v7750_v22 = vld [vmem:[#allocation17_spill] sm:$0xff] }
 0xc62   :  { %2816 = vmatpush1.bf16.msra.mxu1 %v7744_v19 }
 0xc63   :  { %2817 = vmatprep.subr.bf16.mxu1 %v6529_v5 }
 0xc66   :  { %2818 = vmatpush1.bf16.msra.mxu1 %v6532_v63 }
 0xc67   :  { %2819 = vmatprep.subr.bf16.mxu1 %v6535_v1 }
 0xc6a   :  { %2820 = vmatpush1.bf16.msra.mxu1 %v6538_v53 }
 0xc6b   :  { %2897 = vmatprep.subr.bf16.mxu1 %v6541_v61  ;;  %v2739_v61 = vadd.f32 %v6491_v18, %v5306_v57 }
 0xce0   :  { %v2678_v19 = vpop.f32.mrb[72].mxu1 }
 0xce1   :  { %v2679_v50 = vadd.f32 %v2678_v19, %v7750_v22  ;;  %v2680_v5 = vpop.f32.mrb[73].mxu1 }
 0xce2   :  { %v2681_v7 = vadd.f32 %v2680_v5, %v5299_v6  ;;  %v2682_v37 = vpop.f32.mrb[74].mxu1 }
 0xce3   :  { %v2725_v63 = vadd.f32 %v2679_v50, %v6468_v10  ;;  %v2683_v54 = vpop.f32.mrb[75].mxu1 }
 0xce4   :  { %v2732_v52 = vadd.f32 %v2681_v7, %v2611_v28 }
 0xce5   :  { %v3534_v1 = vmul.f32 -1.442695, %v2725_v63 }
 0xce6   :  { %v3535_v32 = vmul.f32 -1.442695, %v2732_v52 }
 0xce7   :  { %4197 = vpow2.f32 %v3534_v1 }
 0xce8   :  { %4199 = vpow2.f32 %v3535_v32 }
 0xcf1   :  { %v4198_v53 = vpop.eup %4197 }
 0xcf2   :  { %v2729_v3 = vadd.f32 1.0, %v4198_v53  ;;  %v4200_v31 = vpop.eup %4199  ;;  %v6577_v53 = vld [vmem:[#allocation9 + $0x64] ss:$16 sps:$4 sm:$0xff]  }
 0xcf3   :  { %v2736_v19 = vadd.f32 1.0, %v4200_v31  ;;  %v6569_v31 = vld [vmem:[#allocation9 + $0x44] ss:$16 sps:$4 sm:$0xff]  }
 0xcf4   :  { %4201 = vrcp.f32 %v2729_v3 }
 0xcf5   :  { %4203 = vrcp.f32 %v2736_v19  ;;  %v6585_v19 = vld [vmem:[#allocation9 + $0x84] ss:$16 sps:$4 sm:$0xff]  }
 0xcfe   :  { %v4202_v22 = vpop.eup %4201 }
 0xcff   :  { %v2740_v17 = vmul.f32 %v4202_v22, %v2739_v61  ;;  %v4204_v32 = vpop.eup %4203  ;;  %v6574_v22 = vld [vmem:[#allocation9 + $0x40] ss:$16 sps:$4 sm:$0xff]  }
 0xd00   :  { %v2719_v5 = vpop.f32.mrb[76].mxu1  ;;  %v2743_v52 = vsub.f32 1.0, %v4204_v32  ;;  %v2745_v63 = vmul.f32 %v4204_v32, %v6309_v46  ;;  %v6566_v46 = vld [vmem:[#allocation9 + $0x20] ss:$16 sps:$4 sm:$0xff]  }
 0xd01   :  { %v2720_v10 = vadd.f32 %v2719_v5, %v5310_v40  ;;  %v3787_v54 = vpop.f32.mrb[77].mxu1  ;;  %v6582_v61 = vld [vmem:[#allocation9 + $0x60] ss:$16 sps:$4 sm:$0xff]  }
 0xd02   :  { %v2722_v28 = vpop.f32.mrb[78].mxu1  ;;  %v6590_v5 = vld [vmem:[#allocation9 + $0x80] ss:$16 sps:$4 sm:$0xff]  }
 0xd03   :  { %v2741_v37 = vadd.f32 %v2740_v17, %v2720_v10  ;;  %v3788_v7 = vpop.f32.mrb[79].mxu1  ;;  %v6560_v17 = vld [vmem:[#allocation9 + $0x24] ss:$16 sps:$4 sm:$0xff]   ;;  %v6598_v54 = vld [vmem:[#allocation9 + $0xa0] ss:$16 sps:$4 sm:$0xff]  }
 0xd04   :  { %v6593_v10 = vld [vmem:[#allocation9 + $0xa4] ss:$16 sps:$4 sm:$0xff]   ;;  %7751 = vst [vmem:[#allocation100_spill] sm:$0xff] %v6598_v54  ;;  %v6614_v32 = vld [vmem:[#allocation9 + $0xe0] ss:$16 sps:$4 sm:$0xff]  }
 0xd05   :  { %4205 = vtanh.f32 %v2741_v37  ;;  %v6601_v28 = vld [vmem:[#allocation9 + $0xc4] ss:$16 sps:$4 sm:$0xff]   ;;  %v6606_v37 = vld [vmem:[#allocation9 + $0xc0] ss:$16 sps:$4 sm:$0xff]   ;;  %7755 = vst [vmem:[#allocation104_spill] sm:$0xff] %v6614_v32 }
 0xd06   :  { %7752 = vst [vmem:[#allocation101_spill] sm:$0xff] %v6601_v28  ;;  %7753 = vst [vmem:[#allocation102_spill] sm:$0xff] %v6606_v37  ;;  %v6609_v7 = vld [vmem:[#allocation9 + $0xe4] ss:$16 sps:$4 sm:$0xff]  }
 0xd07   :  { %7754 = vst [vmem:[#allocation103_spill] sm:$0xff] %v6609_v7 }
 0xd0f   :  { %v4206_v50 = vpop.eup %4205 }
 0xd10   :  { %v2744_v3 = vmul.f32 %v4206_v50, %v2743_v52  ;;  %v7756_v52 = vld [vmem:[#allocation37_spill] sm:$0xff] }
 0xd11   :  { %v7757_v50 = vld [vmem:[#allocation65_spill] sm:$0xff] }
 0xd12   :  { %v6551_v1 = vadd.f32 %v2745_v63, %v2744_v3  ;;  %v7758_v3 = vld [vmem:[#allocation67_spill] sm:$0xff]  ;;  %v7759_v63 = vld [vmem:[#allocation69_spill] sm:$0xff] }
 0xd14   :  { %v2747_v18 = vpack.c.bf16 %v6551_v1, %v6551_v1 }
 0xd16   :  { %2780 = vmatprep.mubr.bf16.mxu0 %v2747_v18  ;;  %2821 = vmatprep.mubr.bf16.mxu1 %v2747_v18 }
 0xd17   :  { %2781 = vmatmul.mubr.bf16.vlgmr.msra.gmra.mrb[64].mxu0 %v6478_v14  ;;  %2822 = vmatmul.mubr.bf16.vlgmr.msra.gmra.mrb[80].mxu1 %v6478_v14 }
 0xd18   :  { %2831 = vmatpush1.bf16.msra.mxu0 %v6315_v41  ;;  %2862 = vmatprep.mubr.bf16.mxu0 %v2747_v18  ;;  %v7760_v18 = vld [vmem:[#allocation71_spill] sm:$0xff] }
 0xd19   :  { %2832 = vmatprep.subr.bf16.mxu0 %v6318_v13  ;;  %2898 = vmatpush1.bf16.msra.mxu1 %v6321_v23 }
 0xd1a   :  { %2899 = vmatprep.subr.bf16.mxu1 %v6560_v17  ;;  %2929 = vmatprep.mubr.bf16.mxu1 %v7358_v42 }
 0xd1c   :  { %2833 = vmatpush1.bf16.msra.mxu0 %v6326_v8 }
 0xd1d   :  { %2834 = vmatprep.subr.bf16.mxu0 %v6329_v4  ;;  %2900 = vmatpush1.bf16.msra.mxu1 %v6566_v46 }
 0xd1e   :  { %2901 = vmatprep.subr.bf16.mxu1 %v6569_v31 }
 0xd20   :  { %2835 = vmatpush1.bf16.msra.mxu0 %v6334_v29 }
 0xd21   :  { %2836 = vmatprep.subr.bf16.mxu0 %v6337_v21  ;;  %2902 = vmatpush1.bf16.msra.mxu1 %v6574_v22 }
 0xd22   :  { %2903 = vmatprep.subr.bf16.mxu1 %v6577_v53 }
 0xd24   :  { %2837 = vmatpush1.bf16.msra.mxu0 %v6342_v56 }
 0xd25   :  { %2838 = vmatprep.subr.bf16.mxu0 %v6345_v25  ;;  %2904 = vmatpush1.bf16.msra.mxu1 %v6582_v61 }
 0xd26   :  { %2905 = vmatprep.subr.bf16.mxu1 %v6585_v19 }
 0xd28   :  { %2839 = vmatpush1.bf16.msra.mxu0 %v6350_v55 }
 0xd29   :  { %2840 = vmatprep.subr.bf16.mxu0 %v6353_v49  ;;  %2906 = vmatpush1.bf16.msra.mxu1 %v6590_v5 }
 0xd2a   :  { %2907 = vmatprep.subr.bf16.mxu1 %v6593_v10 }
 0xd2c   :  { %2841 = vmatpush1.bf16.msra.mxu0 %v6358_v38  ;;  %v7803_v38 = vld [vmem:[#allocation85_spill] sm:$0xff] }
 0xd2d   :  { %2842 = vmatprep.subr.bf16.mxu0 %v6361_v60  ;;  %2908 = vmatpush1.bf16.msra.mxu1 %v6598_v54 }
 0xd2e   :  { %2909 = vmatprep.subr.bf16.mxu1 %v6601_v28 }
 0xd30   :  { %2843 = vmatpush1.bf16.msra.mxu0 %v6366_v15 }
 0xd31   :  { %2844 = vmatprep.subr.bf16.mxu0 %v6369_v43  ;;  %2910 = vmatpush1.bf16.msra.mxu1 %v6606_v37 }
 0xd32   :  { %2911 = vmatprep.subr.bf16.mxu1 %v6609_v7 }
 0xd34   :  { %2845 = vmatpush1.bf16.msra.mxu0 %v6374_v9  ;;  %v7801_v9 = vld [vmem:[#allocation89_spill] sm:$0xff] }
 0xd35   :  { %2846 = vmatprep.subr.bf16.mxu0 %v6377_v51  ;;  %2912 = vmatpush1.bf16.msra.mxu1 %v6614_v32  ;;  %v7761_v51 = vld [vmem:[#allocation72_spill] sm:$0xff] }
 0xd36   :  { %3789 = vmatprep.subr.bf16.mxu1 %v7342_v34  ;;  %v6627_v32 = vld [vmem:[#allocation8 + $0x284] ss:$24 sps:$4 sm:$0xff]  }
 0xd37   :  { %7762 = vst [vmem:[#allocation81_spill] sm:$0xff] %v6627_v32 }
 0xd38   :  { %2847 = vmatpush1.bf16.msra.mxu0 %v6382_v59  ;;  %v6630_v59 = vld [vmem:[#allocation8 + $0x280] ss:$24 sps:$4 sm:$0xff]  }
 0xd39   :  { %2848 = vmatprep.subr.bf16.mxu0 %v6385_v58  ;;  %7763 = vst [vmem:[#allocation82_spill] sm:$0xff] %v6630_v59  ;;  %v7776_v58 = vld [vmem:[#allocation40_spill] sm:$0xff] }
 0xd3c   :  { %2849 = vmatpush1.bf16.msra.mxu0 %v6388_v26  ;;  %v6633_v26 = vld [vmem:[#allocation8 + $0x2b4] ss:$24 sps:$4 sm:$0xff]  }
 0xd3d   :  { %2850 = vmatprep.subr.bf16.mxu0 %v7756_v52  ;;  %7764 = vst [vmem:[#allocation86_spill] sm:$0xff] %v6633_v26  ;;  %v7774_v52 = vld [vmem:[#allocation24_spill] sm:$0xff] }
 0xd40   :  { %2851 = vmatpush1.bf16.msra.mxu0 %v7757_v50  ;;  %v6636_v50 = vld [vmem:[#allocation8 + $0x2b0] ss:$24 sps:$4 sm:$0xff]  }
 0xd41   :  { %2852 = vmatprep.subr.bf16.mxu0 %v7758_v3  ;;  %7765 = vst [vmem:[#allocation83_spill] sm:$0xff] %v6636_v50  ;;  %v7772_v3 = vld [vmem:[#allocation22_spill] sm:$0xff] }
 0xd44   :  { %2853 = vmatpush1.bf16.msra.mxu0 %v7759_v63  ;;  %v6639_v63 = vld [vmem:[#allocation8 + $0x2e4] ss:$24 sps:$4 sm:$0xff]  }
 0xd45   :  { %2854 = vmatprep.subr.bf16.mxu0 %v7760_v18  ;;  %7766 = vst [vmem:[#allocation84_spill] sm:$0xff] %v6639_v63  ;;  %v7770_v18 = vld [vmem:[#allocation20_spill] sm:$0xff] }
 0xd48   :  { %2855 = vmatpush1.bf16.msra.mxu0 %v7761_v51  ;;  %v6642_v51 = vld [vmem:[#allocation8 + $0x2e0] ss:$24 sps:$4 sm:$0xff]  }
 0xd49   :  { %2856 = vmatprep.subr.bf16.mxu0 %v6627_v32  ;;  %7767 = vst [vmem:[#allocation88_spill] sm:$0xff] %v6642_v51  ;;  %v7768_v32 = vld [vmem:[#allocation18_spill] sm:$0xff] }
 0xd4c   :  { %2857 = vmatpush1.bf16.msra.mxu0 %v6630_v59  ;;  %v7769_v59 = vld [vmem:[#allocation19_spill] sm:$0xff] }
 0xd4d   :  { %2858 = vmatprep.subr.bf16.mxu0 %v6633_v26  ;;  %v7771_v26 = vld [vmem:[#allocation21_spill] sm:$0xff] }
 0xd50   :  { %2859 = vmatpush1.bf16.msra.mxu0 %v6636_v50  ;;  %v7773_v50 = vld [vmem:[#allocation23_spill] sm:$0xff] }
 0xd51   :  { %2860 = vmatprep.subr.bf16.mxu0 %v6639_v63  ;;  %v7775_v63 = vld [vmem:[#allocation25_spill] sm:$0xff] }
 0xd54   :  { %2861 = vmatpush1.bf16.msra.mxu0 %v6642_v51  ;;  %v7777_v51 = vld [vmem:[#allocation26_spill] sm:$0xff] }
 0xd55   :  { %3001 = vmatprep.subr.bf16.mxu0 %v7768_v32  ;;  %v7778_v32 = vld [vmem:[#allocation27_spill] sm:$0xff] }
 0xd57   :  { %2863 = vmatmul.mubr.bf16.vlgmr.msra.gmra.mrb[68].mxu0 %v6478_v14  ;;  %v7779_v14 = vld [vmem:[#allocation42_spill] sm:$0xff] }
 0xd58   :  { %3002 = vmatpush1.bf16.msra.mxu0 %v7769_v59  ;;  %v7780_v59 = vld [vmem:[#allocation44_spill] sm:$0xff] }
 0xd59   :  { %3003 = vmatprep.subr.bf16.mxu0 %v7770_v18  ;;  %v7781_v18 = vld [vmem:[#allocation28_spill] sm:$0xff] }
 0xd5c   :  { %3004 = vmatpush1.bf16.msra.mxu0 %v7771_v26  ;;  %v7782_v26 = vld [vmem:[#allocation29_spill] sm:$0xff] }
 0xd5d   :  { %3005 = vmatprep.subr.bf16.mxu0 %v7772_v3  ;;  %v7783_v3 = vld [vmem:[#allocation46_spill] sm:$0xff] }
 0xd60   :  { %3006 = vmatpush1.bf16.msra.mxu0 %v7773_v50  ;;  %v7784_v50 = vld [vmem:[#allocation48_spill] sm:$0xff] }
 0xd61   :  { %3007 = vmatprep.subr.bf16.mxu0 %v7774_v52  ;;  %v7785_v52 = vld [vmem:[#allocation30_spill] sm:$0xff] }
 0xd64   :  { %3008 = vmatpush1.bf16.msra.mxu0 %v7775_v63  ;;  %v7786_v63 = vld [vmem:[#allocation31_spill] sm:$0xff] }
 0xd65   :  { %3009 = vmatprep.subr.bf16.mxu0 %v7776_v58  ;;  %v7787_v58 = vld [vmem:[#allocation50_spill] sm:$0xff] }
 0xd68   :  { %3010 = vmatpush1.bf16.msra.mxu0 %v7777_v51  ;;  %v7788_v51 = vld [vmem:[#allocation52_spill] sm:$0xff] }
 0xd69   :  { %3011 = vmatprep.subr.bf16.mxu0 %v7778_v32  ;;  %v7789_v32 = vld [vmem:[#allocation32_spill] sm:$0xff] }
 0xd6c   :  { %3012 = vmatpush1.bf16.msra.mxu0 %v7779_v14  ;;  %v7790_v14 = vld [vmem:[#allocation33_spill] sm:$0xff] }
 0xd6d   :  { %3013 = vmatprep.subr.bf16.mxu0 %v7780_v59  ;;  %v7791_v59 = vld [vmem:[#allocation54_spill] sm:$0xff] }
 0xd70   :  { %3014 = vmatpush1.bf16.msra.mxu0 %v7781_v18  ;;  %v7792_v18 = vld [vmem:[#allocation73_spill] sm:$0xff] }
 0xd71   :  { %3015 = vmatprep.subr.bf16.mxu0 %v7782_v26  ;;  %v7793_v26 = vld [vmem:[#allocation74_spill] sm:$0xff] }
 0xd74   :  { %3016 = vmatpush1.bf16.msra.mxu0 %v7783_v3  ;;  %v7794_v3 = vld [vmem:[#allocation94_spill] sm:$0xff] }
 0xd75   :  { %3017 = vmatprep.subr.bf16.mxu0 %v7784_v50  ;;  %v7795_v50 = vld [vmem:[#allocation95_spill] sm:$0xff] }
 0xd78   :  { %3018 = vmatpush1.bf16.msra.mxu0 %v7785_v52  ;;  %v7796_v52 = vld [vmem:[#allocation62_spill] sm:$0xff] }
 0xd79   :  { %3019 = vmatprep.subr.bf16.mxu0 %v7786_v63  ;;  %v7797_v63 = vld [vmem:[#allocation64_spill] sm:$0xff] }
 0xd7c   :  { %3020 = vmatpush1.bf16.msra.mxu0 %v7787_v58  ;;  %v7798_v58 = vld [vmem:[#allocation105_spill] sm:$0xff] }
 0xd7d   :  { %3021 = vmatprep.subr.bf16.mxu0 %v7788_v51  ;;  %v7799_v51 = vld [vmem:[#allocation106_spill] sm:$0xff] }
 0xd80   :  { %3022 = vmatpush1.bf16.msra.mxu0 %v7789_v32  ;;  %v7800_v32 = vld [vmem:[#allocation107_spill] sm:$0xff] }
 0xd81   :  { %3023 = vmatprep.subr.bf16.mxu0 %v7790_v14 }
 0xd84   :  { %3024 = vmatpush1.bf16.msra.mxu0 %v7791_v59 }
 0xd85   :  { %3025 = vmatprep.subr.bf16.mxu0 %v7792_v18 }
 0xd88   :  { %3026 = vmatpush1.bf16.msra.mxu0 %v7793_v26 }
 0xd89   :  { %3027 = vmatprep.subr.bf16.mxu0 %v7794_v3  ;;  %v7802_v3 = vld [vmem:[#allocation90_spill] sm:$0xff] }
 0xd8c   :  { %3028 = vmatpush1.bf16.msra.mxu0 %v7795_v50 }
 0xd8d   :  { %3029 = vmatprep.subr.bf16.mxu0 %v7796_v52 }
 0xd90   :  { %3030 = vmatpush1.bf16.msra.mxu0 %v7797_v63 }
 0xd91   :  { %3031 = vmatprep.subr.bf16.mxu0 %v7798_v58 }
 0xd94   :  { %3032 = vmatpush1.bf16.msra.mxu0 %v7799_v51 }
 0xd95   :  { %3083 = vmatprep.subr.bf16.mxu0 %v7800_v32 }
 0xdea   :  { %v2782_v14 = vpop.f32.mrb[64].mxu0  ;;  %v2823_v59 = vpop.f32.mrb[80].mxu1 }
 0xdeb   :  { %v2874_v18 = vadd.f32 %v2782_v14, %v7801_v9  ;;  %v2784_v7 = vpop.f32.mrb[65].mxu0  ;;  %v6680_v26 = vpop.f32.mrb[81].mxu1  ;;  %v2888_v9 = vadd.f32 %v2823_v59, %v5213_v27  ;;  %v6693_v59 = vld [vmem:[#allocation9 + $0x8] ss:$16 sps:$4 sm:$0xff]  }
 0xdec   :  { %v2881_v37 = vadd.f32 %v2784_v7, %v7802_v3  ;;  %v2786_v50 = vpop.f32.mrb[66].mxu0  ;;  %v2827_v43 = vpop.f32.mrb[82].mxu1 }
 0xded   :  { %v3536_v52 = vmul.f32 -1.442695, %v2874_v18  ;;  %v2787_v15 = vpop.f32.mrb[67].mxu0  ;;  %v2828_v63 = vpop.f32.mrb[83].mxu1 }
 0xdee   :  { %v3537_v58 = vmul.f32 -1.442695, %v2881_v37 }
 0xdef   :  { %4207 = vpow2.f32 %v3536_v52 }
 0xdf0   :  { %4209 = vpow2.f32 %v3537_v58 }
 0xdf9   :  { %v4208_v51 = vpop.eup %4207 }
 0xdfa   :  { %v2878_v28 = vadd.f32 1.0, %v4208_v51  ;;  %v4210_v32 = vpop.eup %4209  ;;  %v6713_v51 = vld [vmem:[#allocation9 + $0x88] ss:$16 sps:$4 sm:$0xff]  }
 0xdfb   :  { %v2885_v54 = vadd.f32 1.0, %v4210_v32  ;;  %v6717_v32 = vld [vmem:[#allocation9 + $0xa8] ss:$16 sps:$4 sm:$0xff]  }
 0xdfc   :  { %4211 = vrcp.f32 %v2878_v28 }
 0xdfd   :  { %4213 = vrcp.f32 %v2885_v54 }
 0xe06   :  { %v4212_v14 = vpop.eup %4211 }
 0xe07   :  { %v2889_v60 = vmul.f32 %v4212_v14, %v2888_v9  ;;  %v4214_v43 = vpop.eup %4213  ;;  %v6721_v9 = vld [vmem:[#allocation9 + $0xc8] ss:$16 sps:$4 sm:$0xff]  }
 0xe08   :  { %v2892_v18 = vsub.f32 1.0, %v4214_v43  ;;  %v2894_v3 = vmul.f32 %v4214_v43, %v6474_v35  ;;  %v6707_v35 = vld [vmem:[#allocation9 + $0x68] ss:$16 sps:$4 sm:$0xff]  }
 0xe09   :  { %v2890_v7 = vadd.f32 %v2889_v60, %v7803_v38  ;;  %v6699_v38 = vld [vmem:[#allocation9 + $0x28] ss:$16 sps:$4 sm:$0xff]  }
 0xe0a   :  { %v6703_v60 = vld [vmem:[#allocation9 + $0x48] ss:$16 sps:$4 sm:$0xff]  }
 0xe0b   :  { %4215 = vtanh.f32 %v2890_v7  ;;  %v6725_v14 = vld [vmem:[#allocation9 + $0xe8] ss:$16 sps:$4 sm:$0xff]   ;;  %v4487_v7 = vld [vmem:[#allocation8 + $0xc] ss:$24 sps:$4 sm:$0xff]  }
 0xe15   :  { %v4216_v15 = vpop.eup %4215 }
 0xe16   :  { %v2893_v37 = vmul.f32 %v4216_v15, %v2892_v18  ;;  %v7820_v18 = vld [vmem:[#allocation17_spill] sm:$0xff] }
 0xe18   :  { %v6686_v50 = vadd.f32 %v2894_v3, %v2893_v37 }
 0xe1a   :  { %v6690_v28 = vpack.c.bf16 %v6686_v50, %v6686_v50 }
 0xe1c   :  { %2930 = vmatmul.mubr.bf16.vlgmr.msra.gmra.mrb[84].mxu1 %v6690_v28 }
 0xe1d   :  { %3790 = vmatpush3.bf16.msra.mxu1 %v6693_v59  ;;  %3805 = vmatprep.mubr.msk.bf16.mxu1 %vm4645_vm0, %v7342_v34 }
 0xe1e   :  { %3791 = vmatprep.subr.bf16.mxu1 %v7342_v34 }
 0xe21   :  { %3792 = vmatpush3.bf16.msra.mxu1 %v6699_v38 }
 0xe22   :  { %3793 = vmatprep.subr.bf16.mxu1 %v7342_v34 }
 0xe25   :  { %3794 = vmatpush3.bf16.msra.mxu1 %v6703_v60 }
 0xe26   :  { %3795 = vmatprep.subr.bf16.mxu1 %v7342_v34 }
 0xe29   :  { %3796 = vmatpush3.bf16.msra.mxu1 %v6707_v35 }
 0xe2a   :  { %v2864_v54 = vpop.f32.mrb[68].mxu0  ;;  %3797 = vmatprep.subr.bf16.mxu1 %v7342_v34 }
 0xe2b   :  { %v6711_v52 = vpop.f32.mrb[69].mxu0 }
 0xe2c   :  { %v2868_v63 = vpop.f32.mrb[70].mxu0 }
 0xe2d   :  { %v2869_v58 = vpop.f32.mrb[71].mxu0  ;;  %3798 = vmatpush3.bf16.msra.mxu1 %v6713_v51 }
 0xe2e   :  { %3799 = vmatprep.subr.bf16.mxu1 %v7342_v34 }
 0xe31   :  { %3800 = vmatpush3.bf16.msra.mxu1 %v6717_v32 }
 0xe32   :  { %3801 = vmatprep.subr.bf16.mxu1 %v7342_v34 }
 0xe35   :  { %3802 = vmatpush3.bf16.msra.mxu1 %v6721_v9 }
 0xe36   :  { %3803 = vmatprep.subr.bf16.mxu1 %v7342_v34 }
 0xe39   :  { %3804 = vmatpush3.bf16.msra.mxu1 %v6725_v14 }
 0xe3a   :  { %3042 = vmatprep.subr.bf16.mxu1 %v4487_v7 }
 0xe3c   :  { %3806 = vmatmul.mubr.bf16.vlgmr.msra.gmra.mrb[88].mxu1 %v6690_v28 }
 0xe3d   :  { %3043 = vmatpush1.bf16.msra.mxu1 %v6215_v24  ;;  %v7804_v24 = vld [vmem:[#allocation70_spill] sm:$0xff] }
 0xe3e   :  { %3044 = vmatprep.subr.bf16.mxu1 %v6218_v12  ;;  %v7805_v12 = vld [vmem:[#allocation45_spill] sm:$0xff] }
 0xe41   :  { %3045 = vmatpush1.bf16.msra.mxu1 %v6221_v45  ;;  %v7806_v45 = vld [vmem:[#allocation47_spill] sm:$0xff] }
 0xe42   :  { %3046 = vmatprep.subr.bf16.mxu1 %v6224_v33  ;;  %v7807_v33 = vld [vmem:[#allocation49_spill] sm:$0xff] }
 0xe45   :  { %3047 = vmatpush1.bf16.msra.mxu1 %v6227_v36  ;;  %v7808_v36 = vld [vmem:[#allocation51_spill] sm:$0xff] }
 0xe46   :  { %3048 = vmatprep.subr.bf16.mxu1 %v6230_v20  ;;  %v7809_v20 = vld [vmem:[#allocation76_spill] sm:$0xff] }
 0xe49   :  { %3049 = vmatpush1.bf16.msra.mxu1 %v6233_v11  ;;  %v7810_v11 = vld [vmem:[#allocation77_spill] sm:$0xff] }
 0xe4a   :  { %3050 = vmatprep.subr.bf16.mxu1 %v7725_v48  ;;  %v7811_v48 = vld [vmem:[#allocation75_spill] sm:$0xff] }
 0xe4d   :  { %3051 = vmatpush1.bf16.msra.mxu1 %v7726_v62  ;;  %v7812_v62 = vld [vmem:[#allocation56_spill] sm:$0xff] }
 0xe4e   :  { %3052 = vmatprep.subr.bf16.mxu1 %v7727_v47  ;;  %v7813_v47 = vld [vmem:[#allocation34_spill] sm:$0xff] }
 0xe51   :  { %3053 = vmatpush1.bf16.msra.mxu1 %v7728_v44  ;;  %v7814_v44 = vld [vmem:[#allocation53_spill] sm:$0xff] }
 0xe52   :  { %3054 = vmatprep.subr.bf16.mxu1 %v7729_v2  ;;  %v7815_v2 = vld [vmem:[#allocation108_spill] sm:$0xff] }
 0xe55   :  { %3055 = vmatpush1.bf16.msra.mxu1 %v7730_v16  ;;  %v7816_v16 = vld [vmem:[#allocation96_spill] sm:$0xff] }
 0xe56   :  { %3056 = vmatprep.subr.bf16.mxu1 %v7731_v0  ;;  %v7817_v0 = vld [vmem:[#allocation97_spill] sm:$0xff] }
 0xe59   :  { %3057 = vmatpush1.bf16.msra.mxu1 %v7732_v30  ;;  %v7818_v30 = vld [vmem:[#allocation98_spill] sm:$0xff] }
 0xe5a   :  { %3058 = vmatprep.subr.bf16.mxu1 %v7733_v39  ;;  %v7819_v39 = vld [vmem:[#allocation99_spill] sm:$0xff] }
 0xe5d   :  { %3059 = vmatpush1.bf16.msra.mxu1 %v7804_v24 }
 0xe5e   :  { %3060 = vmatprep.subr.bf16.mxu1 %v7805_v12 }
 0xe61   :  { %3061 = vmatpush1.bf16.msra.mxu1 %v7806_v45 }
 0xe62   :  { %3062 = vmatprep.subr.bf16.mxu1 %v7807_v33 }
 0xe65   :  { %3063 = vmatpush1.bf16.msra.mxu1 %v7808_v36 }
 0xe66   :  { %3064 = vmatprep.subr.bf16.mxu1 %v7809_v20 }
 0xe69   :  { %3065 = vmatpush1.bf16.msra.mxu1 %v7810_v11  ;;  %v2992_v11 = vadd.f32 %v6711_v52, %v5306_v57 }
 0xe6a   :  { %3066 = vmatprep.subr.bf16.mxu1 %v7811_v48 }
 0xe6d   :  { %3067 = vmatpush1.bf16.msra.mxu1 %v7812_v62 }
 0xe6e   :  { %3068 = vmatprep.subr.bf16.mxu1 %v7813_v47 }
 0xe71   :  { %3069 = vmatpush1.bf16.msra.mxu1 %v7814_v44 }
 0xe72   :  { %3070 = vmatprep.subr.bf16.mxu1 %v7815_v2 }
 0xe75   :  { %3071 = vmatpush1.bf16.msra.mxu1 %v7816_v16 }
 0xe76   :  { %3072 = vmatprep.subr.bf16.mxu1 %v7817_v0 }
 0xe79   :  { %3073 = vmatpush1.bf16.msra.mxu1 %v7818_v30 }
 0xe7a   :  { %3150 = vmatprep.subr.bf16.mxu1 %v7819_v39 }
 0xeef   :  { %v2931_v43 = vpop.f32.mrb[84].mxu1 }
 0xef0   :  { %v2932_v15 = vadd.f32 %v2931_v43, %v7820_v18  ;;  %v2933_v3 = vpop.f32.mrb[85].mxu1 }
 0xef1   :  { %v2934_v37 = vadd.f32 %v2933_v3, %v5299_v6  ;;  %v2935_v63 = vpop.f32.mrb[86].mxu1 }
 0xef2   :  { %v2978_v58 = vadd.f32 %v2932_v15, %v6680_v26  ;;  %v2936_v7 = vpop.f32.mrb[87].mxu1  ;;  %v7843_v63 = vld [vmem:[#allocation86_spill] sm:$0xff] }
 0xef3   :  { %v2985_v24 = vadd.f32 %v2934_v37, %v2864_v54  ;;  %v7845_v7 = vld [vmem:[#allocation84_spill] sm:$0xff] }
 0xef4   :  { %v3538_v12 = vmul.f32 -1.442695, %v2978_v58  ;;  %v7844_v58 = vld [vmem:[#allocation83_spill] sm:$0xff] }
 0xef5   :  { %v3539_v45 = vmul.f32 -1.442695, %v2985_v24  ;;  %v7846_v24 = vld [vmem:[#allocation88_spill] sm:$0xff] }
 0xef6   :  { %4217 = vpow2.f32 %v3538_v12 }
 0xef7   :  { %4219 = vpow2.f32 %v3539_v45 }
 0xf00   :  { %v4218_v33 = vpop.eup %4217 }
 0xf01   :  { %v2982_v36 = vadd.f32 1.0, %v4218_v33  ;;  %v4220_v20 = vpop.eup %4219  ;;  %v7847_v33 = vld [vmem:[#allocation91_spill] sm:$0xff] }
 0xf02   :  { %v2989_v48 = vadd.f32 1.0, %v4220_v20 }
 0xf03   :  { %4221 = vrcp.f32 %v2982_v36 }
 0xf04   :  { %4223 = vrcp.f32 %v2989_v48  ;;  %v7848_v48 = vld [vmem:[#allocation92_spill] sm:$0xff] }
 0xf0d   :  { %v4222_v62 = vpop.eup %4221 }
 0xf0e   :  { %v2993_v47 = vmul.f32 %v4222_v62, %v2992_v11  ;;  %v4224_v30 = vpop.eup %4223 }
 0xf0f   :  { %v2972_v44 = vpop.f32.mrb[88].mxu1  ;;  %v2996_v39 = vsub.f32 1.0, %v4224_v30  ;;  %v2998_v3 = vmul.f32 %v4224_v30, %v6551_v1  ;;  %v7833_v1 = vld [vmem:[#allocation61_spill] sm:$0xff] }
 0xf10   :  { %v2973_v26 = vadd.f32 %v2972_v44, %v5310_v40  ;;  %v3807_v2 = vpop.f32.mrb[89].mxu1 }
 0xf11   :  { %v2975_v54 = vpop.f32.mrb[90].mxu1 }
 0xf12   :  { %v2994_v16 = vadd.f32 %v2993_v47, %v2973_v26  ;;  %v3808_v0 = vpop.f32.mrb[91].mxu1 }
 0xf14   :  { %4225 = vtanh.f32 %v2994_v16 }
 0xf1e   :  { %v4226_v43 = vpop.eup %4225 }
 0xf1f   :  { %v2997_v15 = vmul.f32 %v4226_v43, %v2996_v39 }
 0xf21   :  { %v6768_v37 = vadd.f32 %v2998_v3, %v2997_v15 }
 0xf23   :  { %v3000_v52 = vpack.c.bf16 %v6768_v37, %v6768_v37 }
 0xf25   :  { %3033 = vmatprep.mubr.bf16.mxu0 %v3000_v52  ;;  %3074 = vmatprep.mubr.bf16.mxu1 %v3000_v52 }
 0xf26   :  { %3034 = vmatmul.mubr.bf16.vlgmr.msra.gmra.mrb[72].mxu0 %v6690_v28  ;;  %3075 = vmatmul.mubr.bf16.vlgmr.msra.gmra.mrb[92].mxu1 %v6690_v28 }
 0xf27   :  { %3084 = vmatpush1.bf16.msra.mxu0 %v6315_v41  ;;  %3115 = vmatprep.mubr.bf16.mxu0 %v3000_v52  ;;  %v7822_v41 = vld [vmem:[#allocation35_spill] sm:$0xff] }
 0xf28   :  { %3085 = vmatprep.subr.bf16.mxu0 %v6318_v13  ;;  %3151 = vmatpush1.bf16.msra.mxu1 %v6321_v23  ;;  %v7823_v13 = vld [vmem:[#allocation100_spill] sm:$0xff]  ;;  %v7824_v23 = vld [vmem:[#allocation101_spill] sm:$0xff]  ;;  %v7849_v52 = vld [vmem:[#allocation87_spill] sm:$0xff] }
 0xf29   :  { %3152 = vmatprep.subr.bf16.mxu1 %v6560_v17  ;;  %3182 = vmatprep.mubr.bf16.mxu1 %v7358_v42  ;;  %v7821_v42 = vld [vmem:[#allocation55_spill] sm:$0xff] }
 0xf2a   :  { %v7834_v17 = vld [vmem:[#allocation63_spill] sm:$0xff] }
 0xf2b   :  { %3086 = vmatpush1.bf16.msra.mxu0 %v6326_v8  ;;  %v7825_v8 = vld [vmem:[#allocation58_spill] sm:$0xff] }
 0xf2c   :  { %3087 = vmatprep.subr.bf16.mxu0 %v6329_v4  ;;  %3153 = vmatpush1.bf16.msra.mxu1 %v6566_v46  ;;  %v7826_v4 = vld [vmem:[#allocation57_spill] sm:$0xff] }
 0xf2d   :  { %3154 = vmatprep.subr.bf16.mxu1 %v6569_v31  ;;  %v7835_v46 = vld [vmem:[#allocation37_spill] sm:$0xff] }
 0xf2e   :  { %v7836_v31 = vld [vmem:[#allocation65_spill] sm:$0xff] }
 0xf2f   :  { %3088 = vmatpush1.bf16.msra.mxu0 %v6334_v29  ;;  %v7827_v29 = vld [vmem:[#allocation102_spill] sm:$0xff] }
 0xf30   :  { %3089 = vmatprep.subr.bf16.mxu0 %v6337_v21  ;;  %3155 = vmatpush1.bf16.msra.mxu1 %v6574_v22  ;;  %v7828_v21 = vld [vmem:[#allocation103_spill] sm:$0xff] }
 0xf31   :  { %3156 = vmatprep.subr.bf16.mxu1 %v6577_v53  ;;  %v7837_v22 = vld [vmem:[#allocation67_spill] sm:$0xff]  ;;  %v7838_v53 = vld [vmem:[#allocation69_spill] sm:$0xff] }
 0xf33   :  { %3090 = vmatpush1.bf16.msra.mxu0 %v6342_v56  ;;  %v7829_v56 = vld [vmem:[#allocation59_spill] sm:$0xff] }
 0xf34   :  { %3091 = vmatprep.subr.bf16.mxu0 %v6345_v25  ;;  %3157 = vmatpush1.bf16.msra.mxu1 %v6582_v61  ;;  %v7830_v25 = vld [vmem:[#allocation60_spill] sm:$0xff]  ;;  %v7839_v61 = vld [vmem:[#allocation71_spill] sm:$0xff] }
 0xf35   :  { %3158 = vmatprep.subr.bf16.mxu1 %v6585_v19  ;;  %v7840_v19 = vld [vmem:[#allocation72_spill] sm:$0xff] }
 0xf37   :  { %3092 = vmatpush1.bf16.msra.mxu0 %v6350_v55  ;;  %v7831_v55 = vld [vmem:[#allocation104_spill] sm:$0xff] }
 0xf38   :  { %3093 = vmatprep.subr.bf16.mxu0 %v6353_v49  ;;  %3159 = vmatpush1.bf16.msra.mxu1 %v6590_v5  ;;  %v7832_v49 = vld [vmem:[#allocation36_spill] sm:$0xff]  ;;  %v7841_v5 = vld [vmem:[#allocation81_spill] sm:$0xff] }
 0xf39   :  { %3160 = vmatprep.subr.bf16.mxu1 %v6593_v10  ;;  %v7842_v10 = vld [vmem:[#allocation82_spill] sm:$0xff] }
 0xf3b   :  { %3094 = vmatpush1.bf16.msra.mxu0 %v7821_v42 }
 0xf3c   :  { %3095 = vmatprep.subr.bf16.mxu0 %v7822_v41  ;;  %3161 = vmatpush1.bf16.msra.mxu1 %v7823_v13 }
 0xf3d   :  { %3162 = vmatprep.subr.bf16.mxu1 %v7824_v23 }
 0xf3f   :  { %3096 = vmatpush1.bf16.msra.mxu0 %v7825_v8 }
 0xf40   :  { %3097 = vmatprep.subr.bf16.mxu0 %v7826_v4  ;;  %3163 = vmatpush1.bf16.msra.mxu1 %v7827_v29 }
 0xf41   :  { %3164 = vmatprep.subr.bf16.mxu1 %v7828_v21 }
 0xf43   :  { %3098 = vmatpush1.bf16.msra.mxu0 %v7829_v56 }
 0xf44   :  { %3099 = vmatprep.subr.bf16.mxu0 %v7830_v25  ;;  %3165 = vmatpush1.bf16.msra.mxu1 %v7831_v55  ;;  %v4086_v25 = vld [vmem:[#allocation9 + $0xec] ss:$16 sps:$4 sm:$0xff]  }
 0xf45   :  { %3809 = vmatprep.subr.bf16.mxu1 %v7342_v34 }
 0xf47   :  { %3100 = vmatpush1.bf16.msra.mxu0 %v7832_v49 }
 0xf48   :  { %3101 = vmatprep.subr.bf16.mxu0 %v7833_v1 }
 0xf4b   :  { %3102 = vmatpush1.bf16.msra.mxu0 %v7834_v17 }
 0xf4c   :  { %3103 = vmatprep.subr.bf16.mxu0 %v7835_v46 }
 0xf4f   :  { %3104 = vmatpush1.bf16.msra.mxu0 %v7836_v31 }
 0xf50   :  { %3105 = vmatprep.subr.bf16.mxu0 %v7837_v22 }
 0xf53   :  { %3106 = vmatpush1.bf16.msra.mxu0 %v7838_v53 }
 0xf54   :  { %3107 = vmatprep.subr.bf16.mxu0 %v7839_v61 }
 0xf57   :  { %3108 = vmatpush1.bf16.msra.mxu0 %v7840_v19 }
 0xf58   :  { %3109 = vmatprep.subr.bf16.mxu0 %v7841_v5 }
 0xf5b   :  { %3110 = vmatpush1.bf16.msra.mxu0 %v7842_v10 }
 0xf5c   :  { %3111 = vmatprep.subr.bf16.mxu0 %v7843_v63 }
 0xf5f   :  { %3112 = vmatpush1.bf16.msra.mxu0 %v7844_v58 }
 0xf60   :  { %3113 = vmatprep.subr.bf16.mxu0 %v7845_v7 }
 0xf63   :  { %3114 = vmatpush1.bf16.msra.mxu0 %v7846_v24 }
 0xf64   :  { %3829 = vmatprep.subr.bf16.mxu0 %v7342_v34 }
 0xf66   :  { %3116 = vmatmul.mubr.bf16.vlgmr.msra.gmra.mrb[76].mxu0 %v6690_v28 }
 0xf67   :  { %3845 = vmatprep.mubr.msk.bf16.mxu0 %vm4645_vm0, %v7342_v34 }
 0xff9   :  { %v3035_v12 = vpop.f32.mrb[72].mxu0  ;;  %v3076_v45 = vpop.f32.mrb[92].mxu1 }
 0xffa   :  { %v3127_v36 = vadd.f32 %v3035_v12, %v7847_v33  ;;  %v3037_v20 = vpop.f32.mrb[73].mxu0  ;;  %v6827_v11 = vpop.f32.mrb[93].mxu1  ;;  %v3141_v43 = vadd.f32 %v3076_v45, %v5213_v27 }
 0xffb   :  { %v3134_v62 = vadd.f32 %v3037_v20, %v7848_v48  ;;  %v3039_v47 = vpop.f32.mrb[74].mxu0  ;;  %v3080_v44 = vpop.f32.mrb[94].mxu1 }
 0xffc   :  { %v3540_v26 = vmul.f32 -1.442695, %v3127_v36  ;;  %v3040_v2 = vpop.f32.mrb[75].mxu0  ;;  %v3081_v54 = vpop.f32.mrb[95].mxu1 }
 0xffd   :  { %v3541_v16 = vmul.f32 -1.442695, %v3134_v62  ;;  %v7850_v2 = vld [vmem:[#allocation93_spill] sm:$0xff] }
 0xffe   :  { %4227 = vpow2.f32 %v3540_v26  ;;  %v4488_v26 = vld [vmem:[#allocation11 + $0x10] sm:$0xff] }
 0xfff   :  { %4229 = vpow2.f32 %v3541_v16  ;;  %v3257_v54 = vrot.slane %v4488_v26, %v7850_v2 }
0x1008   :  { %v4228_v28 = vpop.eup %4227 }
0x1009   :  { %v3131_v0 = vadd.f32 1.0, %v4228_v28  ;;  %v4230_v30 = vpop.eup %4229 }
0x100a   :  { %v3138_v39 = vadd.f32 1.0, %v4230_v30 }
0x100b   :  { %4231 = vrcp.f32 %v3131_v0 }
0x100c   :  { %4233 = vrcp.f32 %v3138_v39 }
0x1015   :  { %v4232_v15 = vpop.eup %4231 }
0x1016   :  { %v3142_v3 = vmul.f32 %v4232_v15, %v3141_v43  ;;  %v4234_v41 = vpop.eup %4233 }
0x1017   :  { %v3145_v13 = vsub.f32 1.0, %v4234_v41  ;;  %v3147_v4 = vmul.f32 %v4234_v41, %v6686_v50 }
0x1018   :  { %v3143_v42 = vadd.f32 %v3142_v3, %v7849_v52 }
0x101a   :  { %4235 = vtanh.f32 %v3143_v42 }
0x1024   :  { %v4236_v23 = vpop.eup %4235 }
0x1025   :  { %v3146_v8 = vmul.f32 %v4236_v23, %v3145_v13 }
0x1027   :  { %v3148_v29 = vadd.f32 %v3147_v4, %v3146_v8 }
0x1029   :  { %v3149_v21 = vpack.c.bf16 %v3148_v29, %v3148_v29 }
0x102b   :  { %3183 = vmatmul.mubr.bf16.vlgmr.msra.gmra.mrb[96].mxu1 %v3149_v21 }
0x102c   :  { %3810 = vmatpush3.bf16.msra.mxu1 %v6693_v59  ;;  %3825 = vmatprep.mubr.msk.bf16.mxu1 %vm4645_vm0, %v7342_v34 }
0x102d   :  { %3811 = vmatprep.subr.bf16.mxu1 %v7342_v34 }
0x1030   :  { %3812 = vmatpush3.bf16.msra.mxu1 %v6699_v38  ;;  %v4079_v38 = vld [vmem:[#allocation9 + $0xc] ss:$16 sps:$4 sm:$0xff]  }
0x1031   :  { %3813 = vmatprep.subr.bf16.mxu1 %v7342_v34  ;;  %3830 = vmatpush3.bf16.msra.mxu0 %v4079_v38 }
0x1032   :  { %3831 = vmatprep.subr.bf16.mxu0 %v7342_v34 }
0x1034   :  { %3814 = vmatpush3.bf16.msra.mxu1 %v6703_v60  ;;  %v4080_v60 = vld [vmem:[#allocation9 + $0x2c] ss:$16 sps:$4 sm:$0xff]  }
0x1035   :  { %3815 = vmatprep.subr.bf16.mxu1 %v7342_v34  ;;  %3832 = vmatpush3.bf16.msra.mxu0 %v4080_v60 }
0x1036   :  { %3833 = vmatprep.subr.bf16.mxu0 %v7342_v34 }
0x1038   :  { %3816 = vmatpush3.bf16.msra.mxu1 %v6707_v35  ;;  %v4081_v35 = vld [vmem:[#allocation9 + $0x4c] ss:$16 sps:$4 sm:$0xff]  }
0x1039   :  { %v3117_v27 = vpop.f32.mrb[76].mxu0  ;;  %3817 = vmatprep.subr.bf16.mxu1 %v7342_v34  ;;  %3834 = vmatpush3.bf16.msra.mxu0 %v4081_v35 }
0x103a   :  { %v3119_v50 = vpop.f32.mrb[77].mxu0  ;;  %3835 = vmatprep.subr.bf16.mxu0 %v7342_v34 }
0x103b   :  { %v3121_v59 = vpop.f32.mrb[78].mxu0  ;;  %v3245_v63 = vadd.f32 %v3119_v50, %v5306_v57 }
0x103c   :  { %v3122_v56 = vpop.f32.mrb[79].mxu0  ;;  %3818 = vmatpush3.bf16.msra.mxu1 %v6713_v51  ;;  %v4082_v51 = vld [vmem:[#allocation9 + $0x6c] ss:$16 sps:$4 sm:$0xff]  }
0x103d   :  { %3819 = vmatprep.subr.bf16.mxu1 %v7342_v34  ;;  %3836 = vmatpush3.bf16.msra.mxu0 %v4082_v51 }
0x103e   :  { %3837 = vmatprep.subr.bf16.mxu0 %v7342_v34 }
0x1040   :  { %3820 = vmatpush3.bf16.msra.mxu1 %v6717_v32  ;;  %v4083_v32 = vld [vmem:[#allocation9 + $0x8c] ss:$16 sps:$4 sm:$0xff]  }
0x1041   :  { %3821 = vmatprep.subr.bf16.mxu1 %v7342_v34  ;;  %3838 = vmatpush3.bf16.msra.mxu0 %v4083_v32 }
0x1042   :  { %3839 = vmatprep.subr.bf16.mxu0 %v7342_v34 }
0x1044   :  { %3822 = vmatpush3.bf16.msra.mxu1 %v6721_v9  ;;  %v4084_v9 = vld [vmem:[#allocation9 + $0xac] ss:$16 sps:$4 sm:$0xff]  }
0x1045   :  { %3823 = vmatprep.subr.bf16.mxu1 %v7342_v34  ;;  %3840 = vmatpush3.bf16.msra.mxu0 %v4084_v9 }
0x1046   :  { %3841 = vmatprep.subr.bf16.mxu0 %v7342_v34 }
0x1048   :  { %3824 = vmatpush3.bf16.msra.mxu1 %v6725_v14  ;;  %v4085_v14 = vld [vmem:[#allocation9 + $0xcc] ss:$16 sps:$4 sm:$0xff]  }
0x1049   :  { %3842 = vmatpush3.bf16.msra.mxu0 %v4085_v14 }
0x104a   :  { %3843 = vmatprep.subr.bf16.mxu0 %v7342_v34 }
0x104b   :  { %3826 = vmatmul.mubr.bf16.vlgmr.msra.gmra.mrb[100].mxu1 %v3149_v21 }
0x104d   :  { %3844 = vmatpush3.bf16.msra.mxu0 %v4086_v25 }
0x10fe   :  { %v3184_v55 = vpop.f32.mrb[96].mxu1 }
0x10ff   :  { %v3185_v49 = vadd.f32 %v3184_v55, %v7820_v18  ;;  %v3186_v1 = vpop.f32.mrb[97].mxu1 }
0x1100   :  { %v3187_v17 = vadd.f32 %v3186_v1, %v5299_v6  ;;  %v3188_v46 = vpop.f32.mrb[98].mxu1 }
0x1101   :  { %v3231_v31 = vadd.f32 %v3185_v49, %v6827_v11  ;;  %v3189_v22 = vpop.f32.mrb[99].mxu1 }
0x1102   :  { %v3238_v53 = vadd.f32 %v3187_v17, %v3117_v27 }
0x1103   :  { %v3542_v61 = vmul.f32 -1.442695, %v3231_v31 }
0x1104   :  { %v3543_v19 = vmul.f32 -1.442695, %v3238_v53 }
0x1105   :  { %4237 = vpow2.f32 %v3542_v61 }
0x1106   :  { %4239 = vpow2.f32 %v3543_v19 }
0x110f   :  { %v4238_v5 = vpop.eup %4237 }
0x1110   :  { %v3235_v10 = vadd.f32 1.0, %v4238_v5  ;;  %v4240_v34 = vpop.eup %4239 }
0x1111   :  { %v3242_v58 = vadd.f32 1.0, %v4240_v34 }
0x1112   :  { %4241 = vrcp.f32 %v3235_v10 }
0x1113   :  { %4243 = vrcp.f32 %v3242_v58 }
0x111c   :  { %v4242_v18 = vpop.eup %4241 }
0x111d   :  { %v3246_v7 = vmul.f32 %v4242_v18, %v3245_v63  ;;  %v4244_v20 = vpop.eup %4243 }
0x111e   :  { %v3225_v24 = vpop.f32.mrb[100].mxu1  ;;  %v3249_v11 = vsub.f32 1.0, %v4244_v20  ;;  %v3251_v47 = vmul.f32 %v4244_v20, %v6768_v37 }
0x111f   :  { %v3226_v6 = vadd.f32 %v3225_v24, %v5310_v40  ;;  %v3827_v12 = vpop.f32.mrb[101].mxu1 }
0x1120   :  { %v3228_v45 = vpop.f32.mrb[102].mxu1 }
0x1121   :  { %v3247_v33 = vadd.f32 %v3246_v7, %v3226_v6  ;;  %v3828_v36 = vpop.f32.mrb[103].mxu1 }
0x1123   :  { %4245 = vtanh.f32 %v3247_v33 }
0x112d   :  { %v4246_v48 = vpop.eup %4245 }
0x112e   :  { %v3250_v62 = vmul.f32 %v4246_v48, %v3249_v11 }
0x1130   :  { %v3252_v44 = vadd.f32 %v3251_v47, %v3250_v62 }
0x1132   :  { %v3253_v57 = vpack.c.bf16 %v3252_v44, %v3252_v44 }
0x1134   :  { %3846 = vmatmul.mubr.bf16.vlgmr.msra.gmra.mrb[80].mxu0 %v3253_v57 }
0x1207   :  { %v3340_v40 = vpop.f32.mrb[80].mxu0 }
0x1208   :  { %v3341_v16 = vadd.f32 %v3340_v40, %v3257_v54  ;;  %v3847_v28 = vpop.f32.mrb[81].mxu0 }
0x1209   :  { %v3343_v0 = vpop.f32.mrb[82].mxu0 }
0x120a   :  { %3346 = vst [vmem:[#allocation12] sm:$0xff] %v3341_v16  ;;  %v3848_v30 = vpop.f32.mrb[83].mxu0 }
0x120b   :  { %4610 = shalt.err (!%p4607_p2)
}
0x120c   :  { %s4611_s9 = scalar_lea.hbm %s6881_s5, 128 }
0x120d   :  { %p4612_p3 = scmp.ne.s32.totalorder %s6881_s5, %s4611_s9  ;;  %p4615_p4 = scmp.lt.u32.totalorder %s4611_s9, %s6881_s5 }
0x120f   :  { %p4617_p5 = pnand %p4615_p4, %p4612_p3 }
0x1211   :  { %4620 = shalt.err (!%p4617_p5)
}
0x1212   :  { %3356 = dma.vmem_to_hbm [thread:$0]  %s3354_s30, 128, %s6881_s5, [#allocation5]  }
0x1213   :  { %4627 = dma.done.wait [#allocation5], 128  }
0x1214   :  { %4628 = vsyncadd [#allocation5], 4294967168 }
0x1215   :  { %3360 = vsyncpa [#allocation4], 1 }
0x1216   :  { %3361 = vsyncpa [#allocation7], 1 }
0x1217   :  { %3362 = vsyncpa [#allocation10], 1 }
0x1218   :  { %3363 = vsyncpa [#allocation5], 1 }

</bundles_post_ra>
